<compile_context>
chip_gen: v5e
topology: v5e:2x2
jax: 0.10.0
libtpu: 0.0.40
codegen_flags: <defaults>
</compile_context>

<pallas_src>
import functools

import jax
import jax.numpy as jnp
import numpy as np
from jax.experimental import pallas as pl
from jax.experimental.pallas import tpu as pltpu


def sdpa_kernel(q_ref, k_ref, v_ref,
                wq_ref, bq_ref, wk_ref, bk_ref, wv_ref, bv_ref,
                wo_ref, bo_ref,
                o_ref,
                qh_scr, kh_scr, vh_scr, cat_scr,
                *, h, d_k, d_v):
    """One batch tile (b_tile elements, all heads) per grid step."""
    bt, nq, d_model = q_ref.shape
    nk = k_ref.shape[1]
    mq = bt * nq
    mk = bt * nk
    f32 = jnp.float32
    bf16 = jnp.bfloat16

    # ---- fused Q/K/V projections over the whole batch tile (M = bt*seq) ----
    q2 = q_ref[...].reshape(mq, d_model)            # bf16 activations
    k2 = k_ref[...].reshape(mk, d_model)
    v2 = v_ref[...].reshape(mk, d_model)

    scale = f32(1.0 / np.sqrt(d_k))
    # Bias add, 1/sqrt(d_k) scale (folded once into Q) and the bf16 cast are
    # one fused expression: the f32 and bf16 projected tensors are never both
    # live.  f32 accumulation on the MXU, f32 elementwise math.
    qp = (((jnp.dot(q2, wq_ref[...], preferred_element_type=f32)
            + bq_ref[...]) * scale).astype(bf16))   # (mq, h*d_k)
    kp = ((jnp.dot(k2, wk_ref[...], preferred_element_type=f32)
           + bk_ref[...]).astype(bf16))             # (mk, h*d_k)
    vp = ((jnp.dot(v2, wv_ref[...], preferred_element_type=f32)
           + bv_ref[...]).astype(bf16))             # (mk, h*d_v)

    # ---- layout shim: head-interleaved lanes -> head-major batch axis ------
    # Pure data movement at static lane offsets into pre-allocated VMEM
    # scratch; each head's slice is dead right after its store, so the small
    # unroll does not extend live ranges.  All compute below is batched.
    for hh in range(h):
        qh_scr[hh] = qp[:, hh * d_k:(hh + 1) * d_k].reshape(bt, nq, d_k)
        kh_scr[hh] = kp[:, hh * d_k:(hh + 1) * d_k].reshape(bt, nk, d_k)
        vh_scr[hh] = vp[:, hh * d_v:(hh + 1) * d_v].reshape(bt, nk, d_v)

    qh = qh_scr[...].reshape(h * bt, nq, d_k)        # bf16, head-major
    kh = kh_scr[...].reshape(h * bt, nk, d_k)
    vh = vh_scr[...].reshape(h * bt, nk, d_v)

    # ---- attention: ONE batched matmul over all (head, batch) pairs --------
    s = jnp.einsum('bqd,bkd->bqk', qh, kh,
                   preferred_element_type=f32)       # (h*bt, nq, nk) f32
    # TODO(synk): attention_weights (multiplicative) and attention_mask
    # (-inf fill) would be applied to `s` here; module is called with None.
    s = s - jnp.max(s, axis=-1, keepdims=True)
    p = jnp.exp(s)
    p = p * pl.reciprocal(jnp.sum(p, axis=-1, keepdims=True), approx=True)
    # TODO(synk): training-mode dropout(p=0.1) on `p` (eval mode implemented).
    # TODO(synk): for production nk (esp. v7x, 64 MiB per-TC VMEM) add an nk
    # grid axis ('arbitrary', last) with online-softmax m/l/acc scratch rather
    # than materialising the full (h*bt, nq, nk) score tensor.

    oh = jnp.einsum('bqk,bkv->bqv', p.astype(bf16), vh,
                    preferred_element_type=f32)      # (h*bt, nq, d_v) f32
    oh = oh.astype(bf16).reshape(h, mq, d_v)

    # ---- inverse shim: heads back onto lanes for the fused fc_o matmul -----
    for hh in range(h):
        cat_scr[:, hh * d_v:(hh + 1) * d_v] = oh[hh]

    # ---- single fused output projection, K = h*d_v -------------------------
    out = (jnp.dot(cat_scr[...], wo_ref[...], preferred_element_type=f32)
           + bo_ref[...])                            # (mq, d_model) f32
    # d_model >= 128 => lane-dense, unmasked stores.  TODO(synk): for
    # d_model < 128 fold the output block to (b_tile, nq*d_model) instead.
    o_ref[...] = out.reshape(bt, nq, d_model).astype(o_ref.dtype)


def _choose_batch_tile(b_s, nq, *, target_rows=256, min_grid_steps=1):
    """Largest divisor of b_s with b_tile*nq <= target_rows while keeping at
    least `min_grid_steps` grid steps.  target_rows=256 fills the 256-wide MXU
    on v6e/v7x (v6e/v5e can pass 512); pass min_grid_steps=2 on v7x so both
    TensorCores get work via dimension_semantics=('parallel',)."""
    best = 1
    for d in range(1, b_s + 1):
        if b_s % d:
            continue
        if d * nq > max(target_rows, nq):
            continue
        if b_s // d < min_grid_steps:
            continue
        best = d
    return best


def scaled_dot_product_attention(queries, keys, values, params, *,
                                 h, d_k, d_v, b_tile=None, out_dtype=None,
                                 target_rows=256, min_grid_steps=1):
    b_s, nq, d_model = queries.shape
    nk = keys.shape[1]
    wq, bq, wk, bk, wv, bv, wo, bo = params
    if out_dtype is None:
        # Pass jnp.bfloat16 here to halve HBM writeback if downstream allows.
        out_dtype = queries.dtype

    if b_tile is None:
        b_tile = _choose_batch_tile(b_s, nq, target_rows=target_rows,
                                    min_grid_steps=min_grid_steps)
    assert b_s % b_tile == 0, "b_tile must divide b_s"

    bf16 = jnp.bfloat16
    # bf16 MXU inputs (halves HBM traffic / VMEM footprint); f32 accumulation
    # and f32 softmax / bias math stay inside the kernel.
    q_in = queries.astype(bf16)
    k_in = keys.astype(bf16)
    v_in = values.astype(bf16)
    # TODO(synk): on v7x only, these four could be cast to fp8 (e4m3) instead.
    wq_b, wk_b, wv_b, wo_b = (w.astype(bf16) for w in (wq, wk, wv, wo))

    kernel = functools.partial(sdpa_kernel, h=h, d_k=d_k, d_v=d_v)

    # Weights / biases: whole-array VMEM residents.  Their block never changes
    # across the grid, so no blocking and no per-step double-buffering — one
    # copy lives in VMEM for the duration of the call.
    w_spec = pl.BlockSpec(memory_space=pltpu.MemorySpace.VMEM)

    flops = 2 * b_s * (
        nq * d_model * h * d_k        # Q projection
        + nk * d_model * h * d_k      # K projection
        + nk * d_model * h * d_v      # V projection
        + h * nq * nk * d_k           # scores
        + h * nq * nk * d_v           # att @ V
        + nq * h * d_v * d_model      # output projection
    )
    transcendentals = b_s * h * nq * nk
    bytes_accessed = (
        2 * (q_in.size + k_in.size + v_in.size)                   # bf16 in
        + 2 * (wq_b.size + wk_b.size + wv_b.size + wo_b.size)     # bf16 w
        + 4 * (bq.size + bk.size + bv.size + bo.size)             # f32 bias
        + np.dtype(out_dtype).itemsize * b_s * nq * d_model       # out
    )

    out = pl.pallas_call(
        kernel,
        out_shape=jax.ShapeDtypeStruct((b_s, nq, d_model), out_dtype),
        grid_spec=pltpu.PrefetchScalarGridSpec(
            num_scalar_prefetch=0,
            grid=(b_s // b_tile,),
            in_specs=[
                pl.BlockSpec((b_tile, nq, d_model), lambda b: (b, 0, 0)),
                pl.BlockSpec((b_tile, nk, d_model), lambda b: (b, 0, 0)),
                pl.BlockSpec((b_tile, nk, d_model), lambda b: (b, 0, 0)),
                w_spec, w_spec, w_spec, w_spec,
                w_spec, w_spec, w_spec, w_spec,
            ],
            out_specs=pl.BlockSpec((b_tile, nq, d_model), lambda b: (b, 0, 0)),
            scratch_shapes=[
                pltpu.VMEM((h, b_tile, nq, d_k), bf16),    # head-major Q
                pltpu.VMEM((h, b_tile, nk, d_k), bf16),    # head-major K
                pltpu.VMEM((h, b_tile, nk, d_v), bf16),    # head-major V
                pltpu.VMEM((b_tile * nq, h * d_v), bf16),  # concat(att @ V)
            ],
        ),
        compiler_params=pltpu.CompilerParams(
            dimension_semantics=("parallel",),
            # v5e's default scoped VMEM is only 16 MiB; allow bigger tiles.
            vmem_limit_bytes=64 * 1024 * 1024,
        ),
        cost_estimate=pl.CostEstimate(flops=int(flops),
                                      transcendentals=int(transcendentals),
                                      bytes_accessed=int(bytes_accessed)),
    )(q_in, k_in, v_in,
      wq_b, bq.reshape(1, -1), wk_b, bk.reshape(1, -1),
      wv_b, bv.reshape(1, -1), wo_b, bo.reshape(1, -1))
    return out


def init_params(key, d_model, d_k, d_v, h):
    """Matches init_weights: Linear weights ~ N(0, 0.001), biases = 0.
    Weights stored transposed: (in_features, out_features)."""
    k1, k2, k3, k4 = jax.random.split(key, 4)
    std = 0.001
    wq = std * jax.random.normal(k1, (d_model, h * d_k), jnp.float32)
    wk = std * jax.random.normal(k2, (d_model, h * d_k), jnp.float32)
    wv = std * jax.random.normal(k3, (d_model, h * d_v), jnp.float32)
    wo = std * jax.random.normal(k4, (h * d_v, d_model), jnp.float32)
    bq = jnp.zeros((h * d_k,), jnp.float32)
    bk = jnp.zeros((h * d_k,), jnp.float32)
    bv = jnp.zeros((h * d_v,), jnp.float32)
    bo = jnp.zeros((d_model,), jnp.float32)
    return (wq, bq, wk, bk, wv, bv, wo, bo)


def reference(queries, keys, values, params, *, h, d_k, d_v):
    """Pure-JAX f32 reference mirroring the PyTorch forward (eval mode)."""
    wq, bq, wk, bk, wv, bv, wo, bo = params
    b_s, nq, d_model = queries.shape
    nk = keys.shape[1]
    q = (queries @ wq + bq).reshape(b_s, nq, h, d_k).transpose(0, 2, 1, 3)
    k = (keys @ wk + bk).reshape(b_s, nk, h, d_k).transpose(0, 2, 3, 1)
    v = (values @ wv + bv).reshape(b_s, nk, h, d_v).transpose(0, 2, 1, 3)
    att = jnp.matmul(q, k) / np.sqrt(d_k)
    att = jax.nn.softmax(att, axis=-1)
    out = jnp.matmul(att, v).transpose(0, 2, 1, 3).reshape(b_s, nq, h * d_v)
    return out @ wo + bo


if __name__ == "__main__":
    # Demo shapes chosen so every minor dim is lane-dense (128) and sequence
    # dims are bf16-sublane aligned (16), per the review's layout guidance.
    b_s, nq, nk = 8, 16, 16
    d_model, d_k, d_v, h = 128, 32, 32, 4

    key = jax.random.PRNGKey(0)
    kq, kk, kv, kp = jax.random.split(key, 4)
    queries = jax.random.normal(kq, (b_s, nq, d_model), jnp.float32)
    keys = jax.random.normal(kk, (b_s, nk, d_model), jnp.float32)
    values = jax.random.normal(kv, (b_s, nk, d_model), jnp.float32)
    params = init_params(kp, d_model, d_k, d_v, h)

    out = scaled_dot_product_attention(queries, keys, values, params,
                                       h=h, d_k=d_k, d_v=d_v)
    out = jax.block_until_ready(out)

    ref = reference(queries, keys, values, params, h=h, d_k=d_k, d_v=d_v)
    # bf16 MXU inputs + approx reciprocal vs f32 reference -> ~1e-2 relative.
    np.testing.assert_allclose(np.asarray(out), np.asarray(ref),
                               rtol=5e-2, atol=5e-6)
    print("KERNEL_OK")
</pallas_src>

<mosaic_0001>
module attributes {stable_mosaic.version = 11 : i64} {
  func.func @sdpa_kernel(%arg0: i32, %arg1: memref<8x16x128xbf16, #tpu.memory_space<vmem>>, %arg2: memref<8x16x128xbf16, #tpu.memory_space<vmem>>, %arg3: memref<8x16x128xbf16, #tpu.memory_space<vmem>>, %arg4: memref<128x128xbf16, #tpu.memory_space<vmem>>, %arg5: memref<1x128xf32, #tpu.memory_space<vmem>>, %arg6: memref<128x128xbf16, #tpu.memory_space<vmem>>, %arg7: memref<1x128xf32, #tpu.memory_space<vmem>>, %arg8: memref<128x128xbf16, #tpu.memory_space<vmem>>, %arg9: memref<1x128xf32, #tpu.memory_space<vmem>>, %arg10: memref<128x128xbf16, #tpu.memory_space<vmem>>, %arg11: memref<1x128xf32, #tpu.memory_space<vmem>>, %arg12: memref<8x16x128xf32, #tpu.memory_space<vmem>>, %arg13: memref<4x8x16x32xbf16, #tpu.memory_space<vmem>>, %arg14: memref<4x8x16x32xbf16, #tpu.memory_space<vmem>>, %arg15: memref<4x8x16x32xbf16, #tpu.memory_space<vmem>>, %arg16: memref<128x128xbf16, #tpu.memory_space<vmem>>) attributes {dimension_semantics = [#tpu.dimension_semantics<parallel>], iteration_bounds = array<i64: 1>, scalar_prefetch = 0 : i64, scratch_operands = 4 : i64, tpu.core_type = #tpu.core_type<tc>, window_params = [{transform_indices = @transform_0, window_bounds = array<i64: 8, 16, 128>}, {transform_indices = @transform_1, window_bounds = array<i64: 8, 16, 128>}, {transform_indices = @transform_2, window_bounds = array<i64: 8, 16, 128>}, {pipeline_mode = #tpu.pipeline_mode<synchronous>, transform_indices = @transform_3, window_bounds = array<i64: 128, 128>}, {pipeline_mode = #tpu.pipeline_mode<synchronous>, transform_indices = @transform_4, window_bounds = array<i64: 1, 128>}, {pipeline_mode = #tpu.pipeline_mode<synchronous>, transform_indices = @transform_5, window_bounds = array<i64: 128, 128>}, {pipeline_mode = #tpu.pipeline_mode<synchronous>, transform_indices = @transform_6, window_bounds = array<i64: 1, 128>}, {pipeline_mode = #tpu.pipeline_mode<synchronous>, transform_indices = @transform_7, window_bounds = array<i64: 128, 128>}, {pipeline_mode = #tpu.pipeline_mode<synchronous>, transform_indices = @transform_8, window_bounds = array<i64: 1, 128>}, {pipeline_mode = #tpu.pipeline_mode<synchronous>, transform_indices = @transform_9, window_bounds = array<i64: 128, 128>}, {pipeline_mode = #tpu.pipeline_mode<synchronous>, transform_indices = @transform_10, window_bounds = array<i64: 1, 128>}, {transform_indices = @transform_11, window_bounds = array<i64: 8, 16, 128>}]} {
    %c0 = arith.constant 0 : index
    %c0_0 = arith.constant 0 : index
    %c0_1 = arith.constant 0 : index
    %0 = vector.load %arg1[%c0, %c0_0, %c0_1] : memref<8x16x128xbf16, #tpu.memory_space<vmem>>, vector<8x16x128xbf16>
    %1 = vector.shape_cast %0 : vector<8x16x128xbf16> to vector<128x128xbf16>
    %c0_2 = arith.constant 0 : index
    %c0_3 = arith.constant 0 : index
    %c0_4 = arith.constant 0 : index
    %2 = vector.load %arg2[%c0_2, %c0_3, %c0_4] : memref<8x16x128xbf16, #tpu.memory_space<vmem>>, vector<8x16x128xbf16>
    %3 = vector.shape_cast %2 : vector<8x16x128xbf16> to vector<128x128xbf16>
    %c0_5 = arith.constant 0 : index
    %c0_6 = arith.constant 0 : index
    %c0_7 = arith.constant 0 : index
    %4 = vector.load %arg3[%c0_5, %c0_6, %c0_7] : memref<8x16x128xbf16, #tpu.memory_space<vmem>>, vector<8x16x128xbf16>
    %5 = vector.shape_cast %4 : vector<8x16x128xbf16> to vector<128x128xbf16>
    %c0_8 = arith.constant 0 : index
    %c0_9 = arith.constant 0 : index
    %6 = vector.load %arg4[%c0_8, %c0_9] : memref<128x128xbf16, #tpu.memory_space<vmem>>, vector<128x128xbf16>
    %cst = arith.constant dense<0.000000e+00> : vector<128x128xf32>
    %7 = tpu.matmul %1, %6, %cst {dimension_numbers = #tpu.dot_dimension_numbers<[1], [0], [0], [1], [0, 0, 1, 1], [], []>} : vector<128x128xbf16>, vector<128x128xbf16>, vector<128x128xf32> -> vector<128x128xf32>
    %c0_10 = arith.constant 0 : index
    %c0_11 = arith.constant 0 : index
    %8 = vector.load %arg5[%c0_10, %c0_11] : memref<1x128xf32, #tpu.memory_space<vmem>>, vector<1x128xf32>
    %9 = vector.broadcast %8 : vector<1x128xf32> to vector<128x128xf32>
    %10 = arith.addf %7, %9 : vector<128x128xf32>
    %cst_12 = arith.constant 0.176776692 : f32
    %11 = vector.broadcast %cst_12 : f32 to vector<128x128xf32>
    %12 = arith.mulf %10, %11 : vector<128x128xf32>
    %13 = arith.truncf %12 : vector<128x128xf32> to vector<128x128xbf16>
    %c0_13 = arith.constant 0 : index
    %c0_14 = arith.constant 0 : index
    %14 = vector.load %arg6[%c0_13, %c0_14] : memref<128x128xbf16, #tpu.memory_space<vmem>>, vector<128x128xbf16>
    %cst_15 = arith.constant dense<0.000000e+00> : vector<128x128xf32>
    %15 = tpu.matmul %3, %14, %cst_15 {dimension_numbers = #tpu.dot_dimension_numbers<[1], [0], [0], [1], [0, 0, 1, 1], [], []>} : vector<128x128xbf16>, vector<128x128xbf16>, vector<128x128xf32> -> vector<128x128xf32>
    %c0_16 = arith.constant 0 : index
    %c0_17 = arith.constant 0 : index
    %16 = vector.load %arg7[%c0_16, %c0_17] : memref<1x128xf32, #tpu.memory_space<vmem>>, vector<1x128xf32>
    %17 = vector.broadcast %16 : vector<1x128xf32> to vector<128x128xf32>
    %18 = arith.addf %15, %17 : vector<128x128xf32>
    %19 = arith.truncf %18 : vector<128x128xf32> to vector<128x128xbf16>
    %c0_18 = arith.constant 0 : index
    %c0_19 = arith.constant 0 : index
    %20 = vector.load %arg8[%c0_18, %c0_19] : memref<128x128xbf16, #tpu.memory_space<vmem>>, vector<128x128xbf16>
    %cst_20 = arith.constant dense<0.000000e+00> : vector<128x128xf32>
    %21 = tpu.matmul %5, %20, %cst_20 {dimension_numbers = #tpu.dot_dimension_numbers<[1], [0], [0], [1], [0, 0, 1, 1], [], []>} : vector<128x128xbf16>, vector<128x128xbf16>, vector<128x128xf32> -> vector<128x128xf32>
    %c0_21 = arith.constant 0 : index
    %c0_22 = arith.constant 0 : index
    %22 = vector.load %arg9[%c0_21, %c0_22] : memref<1x128xf32, #tpu.memory_space<vmem>>, vector<1x128xf32>
    %23 = vector.broadcast %22 : vector<1x128xf32> to vector<128x128xf32>
    %24 = arith.addf %21, %23 : vector<128x128xf32>
    %25 = arith.truncf %24 : vector<128x128xf32> to vector<128x128xbf16>
    %26 = vector.extract_strided_slice %13 {offsets = [0, 0], sizes = [128, 32], strides = [1, 1]} : vector<128x128xbf16> to vector<128x32xbf16>
    %27 = vector.shape_cast %26 : vector<128x32xbf16> to vector<8x16x32xbf16>
    %c0_23 = arith.constant 0 : index
    %c0_24 = arith.constant 0 : index
    %c0_25 = arith.constant 0 : index
    %c0_26 = arith.constant 0 : index
    %28 = vector.load %arg13[%c0_23, %c0_24, %c0_25, %c0_26] : memref<4x8x16x32xbf16, #tpu.memory_space<vmem>>, vector<1x8x16x32xbf16>
    %29 = vector.shape_cast %28 : vector<1x8x16x32xbf16> to vector<8x16x32xbf16>
    %30 = vector.shape_cast %27 : vector<8x16x32xbf16> to vector<1x8x16x32xbf16>
    tpu.vector_store %arg13[%c0_23, %c0_24, %c0_25, %c0_26], %30 {strides = array<i32>} : memref<4x8x16x32xbf16, #tpu.memory_space<vmem>>, vector<1x8x16x32xbf16>,
    %31 = vector.extract_strided_slice %19 {offsets = [0, 0], sizes = [128, 32], strides = [1, 1]} : vector<128x128xbf16> to vector<128x32xbf16>
    %32 = vector.shape_cast %31 : vector<128x32xbf16> to vector<8x16x32xbf16>
    %c0_27 = arith.constant 0 : index
    %c0_28 = arith.constant 0 : index
    %c0_29 = arith.constant 0 : index
    %c0_30 = arith.constant 0 : index
    %33 = vector.load %arg14[%c0_27, %c0_28, %c0_29, %c0_30] : memref<4x8x16x32xbf16, #tpu.memory_space<vmem>>, vector<1x8x16x32xbf16>
    %34 = vector.shape_cast %33 : vector<1x8x16x32xbf16> to vector<8x16x32xbf16>
    %35 = vector.shape_cast %32 : vector<8x16x32xbf16> to vector<1x8x16x32xbf16>
    tpu.vector_store %arg14[%c0_27, %c0_28, %c0_29, %c0_30], %35 {strides = array<i32>} : memref<4x8x16x32xbf16, #tpu.memory_space<vmem>>, vector<1x8x16x32xbf16>,
    %36 = vector.extract_strided_slice %25 {offsets = [0, 0], sizes = [128, 32], strides = [1, 1]} : vector<128x128xbf16> to vector<128x32xbf16>
    %37 = vector.shape_cast %36 : vector<128x32xbf16> to vector<8x16x32xbf16>
    %c0_31 = arith.constant 0 : index
    %c0_32 = arith.constant 0 : index
    %c0_33 = arith.constant 0 : index
    %c0_34 = arith.constant 0 : index
    %38 = vector.load %arg15[%c0_31, %c0_32, %c0_33, %c0_34] : memref<4x8x16x32xbf16, #tpu.memory_space<vmem>>, vector<1x8x16x32xbf16>
    %39 = vector.shape_cast %38 : vector<1x8x16x32xbf16> to vector<8x16x32xbf16>
    %40 = vector.shape_cast %37 : vector<8x16x32xbf16> to vector<1x8x16x32xbf16>
    tpu.vector_store %arg15[%c0_31, %c0_32, %c0_33, %c0_34], %40 {strides = array<i32>} : memref<4x8x16x32xbf16, #tpu.memory_space<vmem>>, vector<1x8x16x32xbf16>,
    %41 = vector.extract_strided_slice %13 {offsets = [0, 32], sizes = [128, 32], strides = [1, 1]} : vector<128x128xbf16> to vector<128x32xbf16>
    %42 = vector.shape_cast %41 : vector<128x32xbf16> to vector<8x16x32xbf16>
    %c1 = arith.constant 1 : index
    %c0_35 = arith.constant 0 : index
    %c0_36 = arith.constant 0 : index
    %c0_37 = arith.constant 0 : index
    %43 = vector.load %arg13[%c1, %c0_35, %c0_36, %c0_37] : memref<4x8x16x32xbf16, #tpu.memory_space<vmem>>, vector<1x8x16x32xbf16>
    %44 = vector.shape_cast %43 : vector<1x8x16x32xbf16> to vector<8x16x32xbf16>
    %45 = vector.shape_cast %42 : vector<8x16x32xbf16> to vector<1x8x16x32xbf16>
    tpu.vector_store %arg13[%c1, %c0_35, %c0_36, %c0_37], %45 {strides = array<i32>} : memref<4x8x16x32xbf16, #tpu.memory_space<vmem>>, vector<1x8x16x32xbf16>,
    %46 = vector.extract_strided_slice %19 {offsets = [0, 32], sizes = [128, 32], strides = [1, 1]} : vector<128x128xbf16> to vector<128x32xbf16>
    %47 = vector.shape_cast %46 : vector<128x32xbf16> to vector<8x16x32xbf16>
    %c1_38 = arith.constant 1 : index
    %c0_39 = arith.constant 0 : index
    %c0_40 = arith.constant 0 : index
    %c0_41 = arith.constant 0 : index
    %48 = vector.load %arg14[%c1_38, %c0_39, %c0_40, %c0_41] : memref<4x8x16x32xbf16, #tpu.memory_space<vmem>>, vector<1x8x16x32xbf16>
    %49 = vector.shape_cast %48 : vector<1x8x16x32xbf16> to vector<8x16x32xbf16>
    %50 = vector.shape_cast %47 : vector<8x16x32xbf16> to vector<1x8x16x32xbf16>
    tpu.vector_store %arg14[%c1_38, %c0_39, %c0_40, %c0_41], %50 {strides = array<i32>} : memref<4x8x16x32xbf16, #tpu.memory_space<vmem>>, vector<1x8x16x32xbf16>,
    %51 = vector.extract_strided_slice %25 {offsets = [0, 32], sizes = [128, 32], strides = [1, 1]} : vector<128x128xbf16> to vector<128x32xbf16>
    %52 = vector.shape_cast %51 : vector<128x32xbf16> to vector<8x16x32xbf16>
    %c1_42 = arith.constant 1 : index
    %c0_43 = arith.constant 0 : index
    %c0_44 = arith.constant 0 : index
    %c0_45 = arith.constant 0 : index
    %53 = vector.load %arg15[%c1_42, %c0_43, %c0_44, %c0_45] : memref<4x8x16x32xbf16, #tpu.memory_space<vmem>>, vector<1x8x16x32xbf16>
    %54 = vector.shape_cast %53 : vector<1x8x16x32xbf16> to vector<8x16x32xbf16>
    %55 = vector.shape_cast %52 : vector<8x16x32xbf16> to vector<1x8x16x32xbf16>
    tpu.vector_store %arg15[%c1_42, %c0_43, %c0_44, %c0_45], %55 {strides = array<i32>} : memref<4x8x16x32xbf16, #tpu.memory_space<vmem>>, vector<1x8x16x32xbf16>,
    %56 = vector.extract_strided_slice %13 {offsets = [0, 64], sizes = [128, 32], strides = [1, 1]} : vector<128x128xbf16> to vector<128x32xbf16>
    %57 = vector.shape_cast %56 : vector<128x32xbf16> to vector<8x16x32xbf16>
    %c2 = arith.constant 2 : index
    %c0_46 = arith.constant 0 : index
    %c0_47 = arith.constant 0 : index
    %c0_48 = arith.constant 0 : index
    %58 = vector.load %arg13[%c2, %c0_46, %c0_47, %c0_48] : memref<4x8x16x32xbf16, #tpu.memory_space<vmem>>, vector<1x8x16x32xbf16>
    %59 = vector.shape_cast %58 : vector<1x8x16x32xbf16> to vector<8x16x32xbf16>
    %60 = vector.shape_cast %57 : vector<8x16x32xbf16> to vector<1x8x16x32xbf16>
    tpu.vector_store %arg13[%c2, %c0_46, %c0_47, %c0_48], %60 {strides = array<i32>} : memref<4x8x16x32xbf16, #tpu.memory_space<vmem>>, vector<1x8x16x32xbf16>,
    %61 = vector.extract_strided_slice %19 {offsets = [0, 64], sizes = [128, 32], strides = [1, 1]} : vector<128x128xbf16> to vector<128x32xbf16>
    %62 = vector.shape_cast %61 : vector<128x32xbf16> to vector<8x16x32xbf16>
    %c2_49 = arith.constant 2 : index
    %c0_50 = arith.constant 0 : index
    %c0_51 = arith.constant 0 : index
    %c0_52 = arith.constant 0 : index
    %63 = vector.load %arg14[%c2_49, %c0_50, %c0_51, %c0_52] : memref<4x8x16x32xbf16, #tpu.memory_space<vmem>>, vector<1x8x16x32xbf16>
    %64 = vector.shape_cast %63 : vector<1x8x16x32xbf16> to vector<8x16x32xbf16>
    %65 = vector.shape_cast %62 : vector<8x16x32xbf16> to vector<1x8x16x32xbf16>
    tpu.vector_store %arg14[%c2_49, %c0_50, %c0_51, %c0_52], %65 {strides = array<i32>} : memref<4x8x16x32xbf16, #tpu.memory_space<vmem>>, vector<1x8x16x32xbf16>,
    %66 = vector.extract_strided_slice %25 {offsets = [0, 64], sizes = [128, 32], strides = [1, 1]} : vector<128x128xbf16> to vector<128x32xbf16>
    %67 = vector.shape_cast %66 : vector<128x32xbf16> to vector<8x16x32xbf16>
    %c2_53 = arith.constant 2 : index
    %c0_54 = arith.constant 0 : index
    %c0_55 = arith.constant 0 : index
    %c0_56 = arith.constant 0 : index
    %68 = vector.load %arg15[%c2_53, %c0_54, %c0_55, %c0_56] : memref<4x8x16x32xbf16, #tpu.memory_space<vmem>>, vector<1x8x16x32xbf16>
    %69 = vector.shape_cast %68 : vector<1x8x16x32xbf16> to vector<8x16x32xbf16>
    %70 = vector.shape_cast %67 : vector<8x16x32xbf16> to vector<1x8x16x32xbf16>
    tpu.vector_store %arg15[%c2_53, %c0_54, %c0_55, %c0_56], %70 {strides = array<i32>} : memref<4x8x16x32xbf16, #tpu.memory_space<vmem>>, vector<1x8x16x32xbf16>,
    %71 = vector.extract_strided_slice %13 {offsets = [0, 96], sizes = [128, 32], strides = [1, 1]} : vector<128x128xbf16> to vector<128x32xbf16>
    %72 = vector.shape_cast %71 : vector<128x32xbf16> to vector<8x16x32xbf16>
    %c3 = arith.constant 3 : index
    %c0_57 = arith.constant 0 : index
    %c0_58 = arith.constant 0 : index
    %c0_59 = arith.constant 0 : index
    %73 = vector.load %arg13[%c3, %c0_57, %c0_58, %c0_59] : memref<4x8x16x32xbf16, #tpu.memory_space<vmem>>, vector<1x8x16x32xbf16>
    %74 = vector.shape_cast %73 : vector<1x8x16x32xbf16> to vector<8x16x32xbf16>
    %75 = vector.shape_cast %72 : vector<8x16x32xbf16> to vector<1x8x16x32xbf16>
    tpu.vector_store %arg13[%c3, %c0_57, %c0_58, %c0_59], %75 {strides = array<i32>} : memref<4x8x16x32xbf16, #tpu.memory_space<vmem>>, vector<1x8x16x32xbf16>,
    %76 = vector.extract_strided_slice %19 {offsets = [0, 96], sizes = [128, 32], strides = [1, 1]} : vector<128x128xbf16> to vector<128x32xbf16>
    %77 = vector.shape_cast %76 : vector<128x32xbf16> to vector<8x16x32xbf16>
    %c3_60 = arith.constant 3 : index
    %c0_61 = arith.constant 0 : index
    %c0_62 = arith.constant 0 : index
    %c0_63 = arith.constant 0 : index
    %78 = vector.load %arg14[%c3_60, %c0_61, %c0_62, %c0_63] : memref<4x8x16x32xbf16, #tpu.memory_space<vmem>>, vector<1x8x16x32xbf16>
    %79 = vector.shape_cast %78 : vector<1x8x16x32xbf16> to vector<8x16x32xbf16>
    %80 = vector.shape_cast %77 : vector<8x16x32xbf16> to vector<1x8x16x32xbf16>
    tpu.vector_store %arg14[%c3_60, %c0_61, %c0_62, %c0_63], %80 {strides = array<i32>} : memref<4x8x16x32xbf16, #tpu.memory_space<vmem>>, vector<1x8x16x32xbf16>,
    %81 = vector.extract_strided_slice %25 {offsets = [0, 96], sizes = [128, 32], strides = [1, 1]} : vector<128x128xbf16> to vector<128x32xbf16>
    %82 = vector.shape_cast %81 : vector<128x32xbf16> to vector<8x16x32xbf16>
    %c3_64 = arith.constant 3 : index
    %c0_65 = arith.constant 0 : index
    %c0_66 = arith.constant 0 : index
    %c0_67 = arith.constant 0 : index
    %83 = vector.load %arg15[%c3_64, %c0_65, %c0_66, %c0_67] : memref<4x8x16x32xbf16, #tpu.memory_space<vmem>>, vector<1x8x16x32xbf16>
    %84 = vector.shape_cast %83 : vector<1x8x16x32xbf16> to vector<8x16x32xbf16>
    %85 = vector.shape_cast %82 : vector<8x16x32xbf16> to vector<1x8x16x32xbf16>
    tpu.vector_store %arg15[%c3_64, %c0_65, %c0_66, %c0_67], %85 {strides = array<i32>} : memref<4x8x16x32xbf16, #tpu.memory_space<vmem>>, vector<1x8x16x32xbf16>,
    %c0_68 = arith.constant 0 : index
    %c0_69 = arith.constant 0 : index
    %c0_70 = arith.constant 0 : index
    %c0_71 = arith.constant 0 : index
    %86 = vector.load %arg13[%c0_68, %c0_69, %c0_70, %c0_71] : memref<4x8x16x32xbf16, #tpu.memory_space<vmem>>, vector<4x8x16x32xbf16>
    %87 = vector.shape_cast %86 : vector<4x8x16x32xbf16> to vector<32x16x32xbf16>
    %c0_72 = arith.constant 0 : index
    %c0_73 = arith.constant 0 : index
    %c0_74 = arith.constant 0 : index
    %c0_75 = arith.constant 0 : index
    %88 = vector.load %arg14[%c0_72, %c0_73, %c0_74, %c0_75] : memref<4x8x16x32xbf16, #tpu.memory_space<vmem>>, vector<4x8x16x32xbf16>
    %89 = vector.shape_cast %88 : vector<4x8x16x32xbf16> to vector<32x16x32xbf16>
    %c0_76 = arith.constant 0 : index
    %c0_77 = arith.constant 0 : index
    %c0_78 = arith.constant 0 : index
    %c0_79 = arith.constant 0 : index
    %90 = vector.load %arg15[%c0_76, %c0_77, %c0_78, %c0_79] : memref<4x8x16x32xbf16, #tpu.memory_space<vmem>>, vector<4x8x16x32xbf16>
    %91 = vector.shape_cast %90 : vector<4x8x16x32xbf16> to vector<32x16x32xbf16>
    "tpu.trace_start"() <{level = 10 : i32, message = "bqd,bkd->bqk"}> : () -> ()
    %cst_80 = arith.constant dense<0.000000e+00> : vector<32x16x16xf32>
    %92 = tpu.matmul %87, %89, %cst_80 {dimension_numbers = #tpu.dot_dimension_numbers<[2], [2], [1], [1], [0, 0, 0, 1, 1, 1], [0], [0]>} : vector<32x16x32xbf16>, vector<32x16x32xbf16>, vector<32x16x16xf32> -> vector<32x16x16xf32>
    "tpu.trace_stop"() : () -> ()
    %cst_81 = arith.constant dense<0xFF800000> : vector<32x16xf32>
    %93 = vector.multi_reduction <maximumf>, %92, %cst_81 [2] : vector<32x16x16xf32> to vector<32x16xf32>
    %94 = vector.shape_cast %93 : vector<32x16xf32> to vector<32x16x1xf32>
    %95 = vector.broadcast %94 : vector<32x16x1xf32> to vector<32x16x16xf32>
    %96 = arith.subf %92, %95 : vector<32x16x16xf32>
    %97 = math.exp %96 : vector<32x16x16xf32>
    %cst_82 = arith.constant dense<0.000000e+00> : vector<32x16xf32>
    %98 = vector.multi_reduction <add>, %97, %cst_82 [2] : vector<32x16x16xf32> to vector<32x16xf32>
    %99 = vector.shape_cast %98 : vector<32x16xf32> to vector<32x16x1xf32>
    %100 = tpu.reciprocal %99 {approx = true} : vector<32x16x1xf32> -> vector<32x16x1xf32>
    %101 = vector.broadcast %100 : vector<32x16x1xf32> to vector<32x16x16xf32>
    %102 = arith.mulf %97, %101 : vector<32x16x16xf32>
    %103 = arith.truncf %102 : vector<32x16x16xf32> to vector<32x16x16xbf16>
    "tpu.trace_start"() <{level = 10 : i32, message = "bqk,bkv->bqv"}> : () -> ()
    %cst_83 = arith.constant dense<0.000000e+00> : vector<32x16x32xf32>
    %104 = tpu.matmul %103, %91, %cst_83 {dimension_numbers = #tpu.dot_dimension_numbers<[2], [1], [1], [2], [0, 0, 0, 1, 1, 2], [0], [0]>} : vector<32x16x16xbf16>, vector<32x16x32xbf16>, vector<32x16x32xf32> -> vector<32x16x32xf32>
    "tpu.trace_stop"() : () -> ()
    %105 = arith.truncf %104 : vector<32x16x32xf32> to vector<32x16x32xbf16>
    %106 = vector.shape_cast %105 : vector<32x16x32xbf16> to vector<4x128x32xbf16>
    %107 = vector.extract_strided_slice %106 {offsets = [0, 0, 0], sizes = [1, 128, 32], strides = [1, 1, 1]} : vector<4x128x32xbf16> to vector<1x128x32xbf16>
    %108 = vector.shape_cast %107 : vector<1x128x32xbf16> to vector<128x32xbf16>
    %c0_84 = arith.constant 0 : index
    %c0_85 = arith.constant 0 : index
    %109 = vector.load %arg16[%c0_84, %c0_85] : memref<128x128xbf16, #tpu.memory_space<vmem>>, vector<128x32xbf16>
    tpu.vector_store %arg16[%c0_84, %c0_85], %108 {strides = array<i32>} : memref<128x128xbf16, #tpu.memory_space<vmem>>, vector<128x32xbf16>,
    %110 = vector.extract_strided_slice %106 {offsets = [1, 0, 0], sizes = [1, 128, 32], strides = [1, 1, 1]} : vector<4x128x32xbf16> to vector<1x128x32xbf16>
    %111 = vector.shape_cast %110 : vector<1x128x32xbf16> to vector<128x32xbf16>
    %c0_86 = arith.constant 0 : index
    %c32 = arith.constant 32 : index
    %112 = vector.load %arg16[%c0_86, %c32] : memref<128x128xbf16, #tpu.memory_space<vmem>>, vector<128x32xbf16>
    tpu.vector_store %arg16[%c0_86, %c32], %111 {strides = array<i32>} : memref<128x128xbf16, #tpu.memory_space<vmem>>, vector<128x32xbf16>,
    %113 = vector.extract_strided_slice %106 {offsets = [2, 0, 0], sizes = [1, 128, 32], strides = [1, 1, 1]} : vector<4x128x32xbf16> to vector<1x128x32xbf16>
    %114 = vector.shape_cast %113 : vector<1x128x32xbf16> to vector<128x32xbf16>
    %c0_87 = arith.constant 0 : index
    %c64 = arith.constant 64 : index
    %115 = vector.load %arg16[%c0_87, %c64] : memref<128x128xbf16, #tpu.memory_space<vmem>>, vector<128x32xbf16>
    tpu.vector_store %arg16[%c0_87, %c64], %114 {strides = array<i32>} : memref<128x128xbf16, #tpu.memory_space<vmem>>, vector<128x32xbf16>,
    %116 = vector.extract_strided_slice %106 {offsets = [3, 0, 0], sizes = [1, 128, 32], strides = [1, 1, 1]} : vector<4x128x32xbf16> to vector<1x128x32xbf16>
    %117 = vector.shape_cast %116 : vector<1x128x32xbf16> to vector<128x32xbf16>
    %c0_88 = arith.constant 0 : index
    %c96 = arith.constant 96 : index
    %118 = vector.load %arg16[%c0_88, %c96] : memref<128x128xbf16, #tpu.memory_space<vmem>>, vector<128x32xbf16>
    tpu.vector_store %arg16[%c0_88, %c96], %117 {strides = array<i32>} : memref<128x128xbf16, #tpu.memory_space<vmem>>, vector<128x32xbf16>,
    %c0_89 = arith.constant 0 : index
    %c0_90 = arith.constant 0 : index
    %119 = vector.load %arg16[%c0_89, %c0_90] : memref<128x128xbf16, #tpu.memory_space<vmem>>, vector<128x128xbf16>
    %c0_91 = arith.constant 0 : index
    %c0_92 = arith.constant 0 : index
    %120 = vector.load %arg10[%c0_91, %c0_92] : memref<128x128xbf16, #tpu.memory_space<vmem>>, vector<128x128xbf16>
    %cst_93 = arith.constant dense<0.000000e+00> : vector<128x128xf32>
    %121 = tpu.matmul %119, %120, %cst_93 {dimension_numbers = #tpu.dot_dimension_numbers<[1], [0], [0], [1], [0, 0, 1, 1], [], []>} : vector<128x128xbf16>, vector<128x128xbf16>, vector<128x128xf32> -> vector<128x128xf32>
    %c0_94 = arith.constant 0 : index
    %c0_95 = arith.constant 0 : index
    %122 = vector.load %arg11[%c0_94, %c0_95] : memref<1x128xf32, #tpu.memory_space<vmem>>, vector<1x128xf32>
    %123 = vector.broadcast %122 : vector<1x128xf32> to vector<128x128xf32>
    %124 = arith.addf %121, %123 : vector<128x128xf32>
    %125 = vector.shape_cast %124 : vector<128x128xf32> to vector<8x16x128xf32>
    %c0_96 = arith.constant 0 : index
    %c0_97 = arith.constant 0 : index
    %c0_98 = arith.constant 0 : index
    %126 = vector.load %arg12[%c0_96, %c0_97, %c0_98] : memref<8x16x128xf32, #tpu.memory_space<vmem>>, vector<8x16x128xf32>
    tpu.vector_store %arg12[%c0_96, %c0_97, %c0_98], %125 {strides = array<i32>} : memref<8x16x128xf32, #tpu.memory_space<vmem>>, vector<8x16x128xf32>,
    return
  }
  func.func @transform_0(%arg0: i32) -> (i32, i32, i32) {
    %c0_i32 = arith.constant 0 : i32
    %c0_i32_0 = arith.constant 0 : i32
    %c0_i32_1 = arith.constant 0 : i32
    return %arg0, %c0_i32, %c0_i32_0 : i32, i32, i32
  }
  func.func @transform_1(%arg0: i32) -> (i32, i32, i32) {
    %c0_i32 = arith.constant 0 : i32
    %c0_i32_0 = arith.constant 0 : i32
    %c0_i32_1 = arith.constant 0 : i32
    return %arg0, %c0_i32, %c0_i32_0 : i32, i32, i32
  }
  func.func @transform_2(%arg0: i32) -> (i32, i32, i32) {
    %c0_i32 = arith.constant 0 : i32
    %c0_i32_0 = arith.constant 0 : i32
    %c0_i32_1 = arith.constant 0 : i32
    return %arg0, %c0_i32, %c0_i32_0 : i32, i32, i32
  }
  func.func @transform_3(%arg0: i32) -> (i32, i32) {
    %c0_i32 = arith.constant 0 : i32
    %c0_i32_0 = arith.constant 0 : i32
    %c0_i32_1 = arith.constant 0 : i32
    return %c0_i32, %c0_i32_0 : i32, i32
  }
  func.func @transform_4(%arg0: i32) -> (i32, i32) {
    %c0_i32 = arith.constant 0 : i32
    %c0_i32_0 = arith.constant 0 : i32
    %c0_i32_1 = arith.constant 0 : i32
    return %c0_i32, %c0_i32_0 : i32, i32
  }
  func.func @transform_5(%arg0: i32) -> (i32, i32) {
    %c0_i32 = arith.constant 0 : i32
    %c0_i32_0 = arith.constant 0 : i32
    %c0_i32_1 = arith.constant 0 : i32
    return %c0_i32, %c0_i32_0 : i32, i32
  }
  func.func @transform_6(%arg0: i32) -> (i32, i32) {
    %c0_i32 = arith.constant 0 : i32
    %c0_i32_0 = arith.constant 0 : i32
    %c0_i32_1 = arith.constant 0 : i32
    return %c0_i32, %c0_i32_0 : i32, i32
  }
  func.func @transform_7(%arg0: i32) -> (i32, i32) {
    %c0_i32 = arith.constant 0 : i32
    %c0_i32_0 = arith.constant 0 : i32
    %c0_i32_1 = arith.constant 0 : i32
    return %c0_i32, %c0_i32_0 : i32, i32
  }
  func.func @transform_8(%arg0: i32) -> (i32, i32) {
    %c0_i32 = arith.constant 0 : i32
    %c0_i32_0 = arith.constant 0 : i32
    %c0_i32_1 = arith.constant 0 : i32
    return %c0_i32, %c0_i32_0 : i32, i32
  }
  func.func @transform_9(%arg0: i32) -> (i32, i32) {
    %c0_i32 = arith.constant 0 : i32
    %c0_i32_0 = arith.constant 0 : i32
    %c0_i32_1 = arith.constant 0 : i32
    return %c0_i32, %c0_i32_0 : i32, i32
  }
  func.func @transform_10(%arg0: i32) -> (i32, i32) {
    %c0_i32 = arith.constant 0 : i32
    %c0_i32_0 = arith.constant 0 : i32
    %c0_i32_1 = arith.constant 0 : i32
    return %c0_i32, %c0_i32_0 : i32, i32
  }
  func.func @transform_11(%arg0: i32) -> (i32, i32, i32) {
    %c0_i32 = arith.constant 0 : i32
    %c0_i32_0 = arith.constant 0 : i32
    %c0_i32_1 = arith.constant 0 : i32
    return %arg0, %c0_i32, %c0_i32_0 : i32, i32, i32
  }
}

</mosaic_0001>

<bundles_post_ra>
// kernel: tpu_custom_call.1
= control target key start
LH: loop header
LB: loop body
LE: loop exit
PB: predicated region body
PF: predicated region fallthrough
CT: control target
= control target key end

     0   :  { %16 = vsyncpa [#allocation7], 0  ;;  %s7912_s0 = inlined_call_operand.hbm [shape: bf16[8,16,128], index: 0, kind: input, shape index: {}]   ;;  %s7913_s1 = inlined_call_operand.hbm [shape: bf16[8,16,128], index: 1, kind: input, shape index: {}]   ;;  %s7914_s2 = inlined_call_operand.hbm [shape: bf16[8,16,128], index: 2, kind: input, shape index: {}]   ;;  %s7915_s3 = inlined_call_operand.hbm [shape: bf16[128,128], index: 3, kind: input, shape index: {}]   ;;  %s7916_s4 = inlined_call_operand.vmem [shape: f32[1,128], index: 4, kind: input, shape index: {}]   ;;  %s7917_s5 = inlined_call_operand.hbm [shape: bf16[128,128], index: 5, kind: input, shape index: {}]   ;;  %s7918_s6 = inlined_call_operand.vmem [shape: f32[1,128], index: 6, kind: input, shape index: {}]   ;;  %s7919_s7 = inlined_call_operand.hbm [shape: bf16[128,128], index: 7, kind: input, shape index: {}]   ;;  %s7920_s8 = inlined_call_operand.vmem [shape: f32[1,128], index: 8, kind: input, shape index: {}]   ;;  %s7921_s9 = inlined_call_operand.hbm [shape: bf16[128,128], index: 9, kind: input, shape index: {}]   ;;  %s7922_s10 = inlined_call_operand.vmem [shape: f32[1,128], index: 10, kind: input, shape index: {}]   ;;  %s7923_s11 = inlined_call_operand.hbm [shape: f32[8,16,128], index: 11, kind: output, shape index: {}]  }
   0x1   :  { %17 = vsyncpa [#allocation10], 0 }
   0x2   :  { %18 = vsyncpa [#allocation13], 0 }
   0x3   :  { %19 = vsyncpa [#allocation16], 0 }
   0x4   :  { %20 = vsyncpa [#allocation8], 0  ;;  %s38_s19 = sshll.u32 %s7913_s1, 4  ;;  %s6154_s20 = smov [#allocation9]   ;;  %s39_s19 = int_to_ptr.hbm [resolvable:$true] %s38_s19 }
   0x5   :  { %s40_s21 = sshll.u32 %s6154_s20, 4  ;;  %s64_s24 = sshll.u32 %s7915_s3, 4  ;;  %s41_s21 = int_to_ptr.vmem [resolvable:$true] %s40_s21  ;;  %s65_s24 = int_to_ptr.hbm [resolvable:$true] %s64_s24 }
   0x6   :  { %s6155_s25 = smov 64   ;;  %s6156_s26 = smov 4  }
   0x7   :  { %46 = dma.hbm_to_vmem [thread:$0]  %s39_s19, 1024, %s41_s21, [#allocation10], %s6155_s25, %s6155_s25, %s6156_s26  }
   0x8   :  { %s6157_s27 = smov [#allocation12]   ;;  %s94_s1 = sshll.u32 %s7919_s7, 4  ;;  %s95_s1 = int_to_ptr.hbm [resolvable:$true] %s94_s1 }
   0x9   :  { %s66_s28 = sshll.u32 %s6157_s27, 4  ;;  %s25_s13 = sshll.u32 %s7912_s0, 4  ;;  %s67_s28 = int_to_ptr.vmem [resolvable:$true] %s66_s28  ;;  %s26_s13 = int_to_ptr.hbm [resolvable:$true] %s25_s13 }
   0xa   :  { %72 = dma.hbm_to_vmem [thread:$0]  %s65_s24, 1024, %s67_s28, [#allocation13], %s6155_s25, %s6155_s25, %s6156_s26  }
   0xb   :  { %s6158_s14 = smov [#allocation15]   ;;  %s6159_s16 = smov [#allocation6]  }
   0xc   :  { %s96_s15 = sshll.u32 %s6158_s14, 4  ;;  %s27_s7 = sshll.u32 %s6159_s16, 4  ;;  %s97_s15 = int_to_ptr.vmem [resolvable:$true] %s96_s15  ;;  %s28_s7 = int_to_ptr.vmem [resolvable:$true] %s27_s7 }
   0xd   :  { %102 = dma.hbm_to_vmem [thread:$0]  %s95_s1, 1024, %s97_s15, [#allocation16], %s6155_s25, %s6155_s25, %s6156_s26  }
   0xe   :  { %s51_s19 = sshll.u32 %s7914_s2, 4  ;;  %s79_s21 = sshll.u32 %s7917_s5, 4  ;;  %s52_s19 = int_to_ptr.hbm [resolvable:$true] %s51_s19  ;;  %s80_s21 = int_to_ptr.hbm [resolvable:$true] %s79_s21 }
   0xf   :  { %33 = dma.hbm_to_vmem [thread:$0]  %s26_s13, 1024, %s28_s7, [#allocation7], %s6155_s25, %s6155_s25, %s6156_s26  }
  0x10   :  { %s6160_s22 = smov [#allocation11]   ;;  %s6161_s24 = smov [#allocation14]  }
  0x11   :  { %s53_s23 = sshll.u32 %s6160_s22, 4  ;;  %s81_s2 = sshll.u32 %s6161_s24, 4  ;;  %s54_s23 = int_to_ptr.vmem [resolvable:$true] %s53_s23  ;;  %s82_s2 = int_to_ptr.vmem [resolvable:$true] %s81_s2 }
  0x12   :  { %59 = dma.hbm_to_vmem [thread:$0]  %s52_s19, 1024, %s54_s23, [#allocation10], %s6155_s25, %s6155_s25, %s6156_s26  }
  0x13   :  { %s109_s29 = sshll.u32 %s7921_s9, 4  ;;  %s6162_s5 = smov [#allocation17]   ;;  %s110_s29 = int_to_ptr.hbm [resolvable:$true] %s109_s29 }
  0x14   :  { %87 = dma.hbm_to_vmem [thread:$0]  %s80_s21, 1024, %s82_s2, [#allocation13], %s6155_s25, %s6155_s25, %s6156_s26  }
  0x15   :  { %s111_s30 = sshll.u32 %s6162_s5, 4  ;;  %s112_s30 = int_to_ptr.vmem [resolvable:$true] %s111_s30 }
  0x16   :  { %117 = dma.hbm_to_vmem [thread:$0]  %s110_s29, 1024, %s112_s30, [#allocation16], %s6155_s25, %s6155_s25, %s6156_s26  }
  0x17   :  { %6144 = dma.done.wait [#allocation7], 1024  }
  0x18   :  { %6145 = vsyncadd [#allocation7], 4294966272 }
  0x19   :  { %6146 = dma.done.wait [#allocation10], 2048  }
  0x1a   :  { %6147 = vsyncadd [#allocation10], 4294965248 }
  0x1b   :  { %6148 = dma.done.wait [#allocation13], 2048  }
  0x1c   :  { %6149 = vsyncadd [#allocation13], 4294965248 }
  0x1d   :  { %6150 = dma.done.wait [#allocation16], 2048  }
  0x1e   :  { %6151 = vsyncadd [#allocation16], 4294965248  ;;  %v5541_v0 = vld [vmem:[#allocation14 + $0x38] sm:$0xff]  ;;  %v5540_v3 = vld [vmem:[#allocation14 + $0x30] sm:$0xff]  ;;  %vm756_vm0 = vcmask 257024   ;;  %vm1640_vm1 = vcmask 261120  }
  0x1f   :  { %v5549_v1 = vld [vmem:[#allocation15 + $0x38] sm:$0xff]  ;;  %510 = vmatpush.bf16.msra.mxu1 %v5541_v0  ;;  %v5548_v4 = vld [vmem:[#allocation15 + $0x30] sm:$0xff]  ;;  %v5539_v6 = vld [vmem:[#allocation14 + $0x28] sm:$0xff]  ;;  %vm2591_vm2 = vcmask 130048   ;;  %vm4400_vm3 = vcmask 519424   ;;  %vm4481_vm4 = vcmask 781824  }
  0x20   :  { %v5533_v2 = vld [vmem:[#allocation12 + $0x38] sm:$0xff]  ;;  %691 = vmatpush.bf16.msra.mxu2 %v5549_v1  ;;  %v5532_v5 = vld [vmem:[#allocation12 + $0x30] sm:$0xff]  ;;  %v5547_v7 = vld [vmem:[#allocation15 + $0x28] sm:$0xff]  ;;  %vm4562_vm5 = vcmask 1044224   ;;  %s4782_s7 = sshll.u32 %s7923_s11, 4  ;;  %s6166_s17 = smov 128   ;;  %s4783_s7 = int_to_ptr.hbm [resolvable:$true] %s4782_s7 }
  0x21   :  { %313 = vmatpush.bf16.msra.mxu0 %v5533_v2  ;;  %v5531_v8 = vld [vmem:[#allocation12 + $0x28] sm:$0xff]  ;;  %v5538_v9 = vld [vmem:[#allocation14 + $0x20] sm:$0xff]  ;;  %v5537_v12 = vld [vmem:[#allocation14 + $0x18] sm:$0xff]  ;;  %s6167_s18 = smov 8  }
  0x22   :  { %v5546_v10 = vld [vmem:[#allocation15 + $0x20] sm:$0xff]  ;;  %v5545_v13 = vld [vmem:[#allocation15 + $0x18] sm:$0xff]  ;;  %v5536_v15 = vld [vmem:[#allocation14 + $0x10] sm:$0xff] }
  0x23   :  { %511 = vmatpush.bf16.msra.mxu1 %v5540_v3  ;;  %v5530_v11 = vld [vmem:[#allocation12 + $0x20] sm:$0xff]  ;;  %v5529_v14 = vld [vmem:[#allocation12 + $0x18] sm:$0xff]  ;;  %v5544_v16 = vld [vmem:[#allocation15 + $0x10] sm:$0xff] }
  0x24   :  { %692 = vmatpush.bf16.msra.mxu2 %v5548_v4  ;;  %v5528_v17 = vld [vmem:[#allocation12 + $0x10] sm:$0xff]  ;;  %v5535_v18 = vld [vmem:[#allocation14 + $0x8] sm:$0xff]  ;;  %v5534_v21 = vld [vmem:[#allocation14] sm:$0xff] }
  0x25   :  { %314 = vmatpush.bf16.msra.mxu0 %v5532_v5  ;;  %v5543_v19 = vld [vmem:[#allocation15 + $0x8] sm:$0xff]  ;;  %v5542_v22 = vld [vmem:[#allocation15] sm:$0xff]  ;;  %v5512_v30 = vld [vmem:[#allocation9 + $0x10] sm:$0xff] }
  0x26   :  { %v5527_v20 = vld [vmem:[#allocation12 + $0x8] sm:$0xff]  ;;  %v5526_v23 = vld [vmem:[#allocation12] sm:$0xff]  ;;  %v5504_v31 = vld [vmem:[#allocation6 + $0x10] sm:$0xff] }
  0x27   :  { %512 = vmatpush.bf16.msra.mxu1 %v5539_v6  ;;  %v5510_v24 = vld [vmem:[#allocation9] sm:$0xff]  ;;  %v5511_v27 = vld [vmem:[#allocation9 + $0x8] sm:$0xff]  ;;  %v5513_v32 = vld [vmem:[#allocation9 + $0x18] sm:$0xff] }
  0x28   :  { %693 = vmatpush.bf16.msra.mxu2 %v5547_v7  ;;  %v5518_v25 = vld [vmem:[#allocation11] sm:$0xff]  ;;  %v5519_v28 = vld [vmem:[#allocation11 + $0x8] sm:$0xff]  ;;  %v5505_v33 = vld [vmem:[#allocation6 + $0x18] sm:$0xff] }
  0x29   :  { %315 = vmatpush.bf16.msra.mxu0 %v5531_v8  ;;  %v5502_v26 = vld [vmem:[#allocation6] sm:$0xff]  ;;  %v5503_v29 = vld [vmem:[#allocation6 + $0x8] sm:$0xff]  ;;  %v5520_v34 = vld [vmem:[#allocation11 + $0x10] sm:$0xff] }
  0x2a   :  { %v5514_v35 = vld [vmem:[#allocation9 + $0x20] sm:$0xff]  ;;  %v5515_v37 = vld [vmem:[#allocation9 + $0x28] sm:$0xff]  ;;  %v5516_v39 = vld [vmem:[#allocation9 + $0x30] sm:$0xff] }
  0x2b   :  { %513 = vmatpush.bf16.msra.mxu1 %v5538_v9  ;;  %v5506_v36 = vld [vmem:[#allocation6 + $0x20] sm:$0xff]  ;;  %v5507_v38 = vld [vmem:[#allocation6 + $0x28] sm:$0xff]  ;;  %v5508_v40 = vld [vmem:[#allocation6 + $0x30] sm:$0xff] }
  0x2c   :  { %694 = vmatpush.bf16.msra.mxu2 %v5546_v10  ;;  %v5521_v41 = vld [vmem:[#allocation11 + $0x18] sm:$0xff]  ;;  %v5522_v44 = vld [vmem:[#allocation11 + $0x20] sm:$0xff] }
  0x2d   :  { %316 = vmatpush.bf16.msra.mxu0 %v5530_v11  ;;  %v5517_v42 = vld [vmem:[#allocation9 + $0x38] sm:$0xff]  ;;  %v6273_v45 = vld [vmem:[%s7918_s6] ss:$0 sm:$0xff]  ;;  %s6163_s6 = smov 32  }
  0x2e   :  { %v5509_v43 = vld [vmem:[#allocation6 + $0x38] sm:$0xff]  ;;  %v6278_v46 = vld [vmem:[%s7916_s4] ss:$0 sm:$0xff]  ;;  %s6164_s4 = smov 96  }
  0x2f   :  { %514 = vmatpush.bf16.msra.mxu1 %v5537_v12  ;;  %v6285_v52 = vld [vmem:[%s7920_s8] ss:$0 sm:$0xff] }
  0x30   :  { %695 = vmatpush.bf16.msra.mxu2 %v5545_v13 }
  0x31   :  { %317 = vmatpush.bf16.msra.mxu0 %v5529_v14 }
  0x33   :  { %515 = vmatpush.bf16.msra.mxu1 %v5536_v15 }
  0x34   :  { %696 = vmatpush.bf16.msra.mxu2 %v5544_v16 }
  0x35   :  { %318 = vmatpush.bf16.msra.mxu0 %v5528_v17 }
  0x37   :  { %516 = vmatpush.bf16.msra.mxu1 %v5535_v18 }
  0x38   :  { %697 = vmatpush.bf16.msra.mxu2 %v5543_v19 }
  0x39   :  { %319 = vmatpush.bf16.msra.mxu0 %v5527_v20 }
  0x3b   :  { %517 = vmatpush.bf16.msra.mxu1 %v5534_v21 }
  0x3c   :  { %698 = vmatpush.bf16.msra.mxu2 %v5542_v22 }
  0x3d   :  { %320 = vmatpush.bf16.msra.mxu0 %v5526_v23 }
  0x3e   :  { %518 = vmatmul.bf16.vlgmr.msra.gmra.mxu1 %v5510_v24 }
  0x3f   :  { %699 = vmatmul.bf16.vlgmr.msra.gmra.mxu2 %v5518_v25 }
  0x40   :  { %321 = vmatmul.bf16.vlgmr.msra.gmra.mxu0 %v5502_v26 }
  0x4e   :  { %523 = vmatmul.bf16.gmra.mxu1 %v5511_v27 }
  0x4f   :  { %704 = vmatmul.bf16.gmra.mxu2 %v5519_v28 }
  0x50   :  { %326 = vmatmul.bf16.gmra.mxu0 %v5503_v29 }
  0x5e   :  { %528 = vmatmul.bf16.gmra.mxu1 %v5512_v30 }
  0x5f   :  { %709 = vmatmul.bf16.gmra.mxu2 %v5520_v34 }
  0x60   :  { %331 = vmatmul.bf16.gmra.mxu0 %v5504_v31 }
  0x6e   :  { %533 = vmatmul.bf16.gmra.mxu1 %v5513_v32  ;;  %v5523_v32 = vld [vmem:[#allocation11 + $0x28] sm:$0xff] }
  0x6f   :  { %714 = vmatmul.bf16.gmra.mxu2 %v5521_v41 }
  0x70   :  { %336 = vmatmul.bf16.gmra.mxu0 %v5505_v33 }
  0x7e   :  { %538 = vmatmul.bf16.gmra.mxu1 %v5514_v35 }
  0x7f   :  { %719 = vmatmul.bf16.gmra.mxu2 %v5522_v44 }
  0x80   :  { %341 = vmatmul.bf16.gmra.mxu0 %v5506_v36 }
  0x8e   :  { %543 = vmatmul.bf16.gmra.mxu1 %v5515_v37 }
  0x8f   :  { %724 = vmatmul.bf16.gmra.mxu2 %v5523_v32 }
  0x90   :  { %346 = vmatmul.bf16.gmra.mxu0 %v5507_v38 }
  0x9e   :  { %548 = vmatmul.bf16.gmra.mxu1 %v5516_v39 }
  0xa0   :  { %351 = vmatmul.bf16.gmra.mxu0 %v5508_v40 }
  0xae   :  { %553 = vmatmul.bf16.gmra.mxu1 %v5517_v42 }
  0xb0   :  { %356 = vmatmul.bf16.gmra.mxu0 %v5509_v43 }
  0xbb   :  { %v519_v47 = vpop.f32.mrf.mxu1 }
  0xbc   :  { %v520_v48 = vadd.f32 %v6273_v45, %v519_v47 }
  0xbd   :  { %v322_v49 = vpop.f32.mrf.mxu0 }
  0xbe   :  { %v323_v50 = vadd.f32 %v6278_v46, %v322_v49  ;;  %v559_v51 = vpack.c.bf16 %v520_v48, %v520_v48 }
  0xc0   :  { %v362_v53 = vmul.f32 0.17677669, %v323_v50  ;;  %773 = vst.msk [vmem:[#allocation3] sm:$0xf] %vm756_vm0, %v559_v51  ;;  %1308 = vrot.lane.b32.xlu0 %v559_v51, %s6163_s6  ;;  %902 = vrot.lane.b32.xlu1 %v559_v51, %s6164_s4 }
  0xc2   :  { %v378_v54 = vpack.c.bf16 %v362_v53, %v362_v53  ;;  %v700_v55 = vpop.f32.mrf.mxu2 }
  0xc3   :  { %v701_v56 = vadd.f32 %v6285_v52, %v700_v55  ;;  %v521_v57 = vpop.f32.mrf.mxu1 }
  0xc4   :  { %757 = vst.msk [vmem:[#allocation2] sm:$0xf] %vm756_vm0, %v378_v54  ;;  %v522_v59 = vadd.f32 %v6273_v45, %v521_v57 }
  0xc5   :  { %v6292_v58 = vpack.c.bf16 %v701_v56, %v701_v56  ;;  %v324_v60 = vpop.f32.mrf.mxu0 }
  0xc6   :  { %v325_v61 = vadd.f32 %v6278_v46, %v324_v60  ;;  %v560_v62 = vpack.c.bf16 %v522_v59, %v522_v59 }
  0xc7   :  { %789 = vst.msk [vmem:[#allocation4] sm:$0xf] %vm756_vm0, %v6292_v58  ;;  %983 = vrot.lane.b32.xlu2 %v6292_v58, %s6164_s4 }
  0xc8   :  { %v363_v63 = vmul.f32 0.17677669, %v325_v61  ;;  %774 = vst.msk [vmem:[#allocation3 + $0x4] sm:$0xf] %vm756_vm0, %v560_v62  ;;  %1113 = vrot.lane.b32.xlu1 %v559_v51, %s6155_s25  ;;  %821 = vrot.lane.b32.xlu0 %v378_v54, %s6164_s4 }
  0xca   :  { %v379_v0 = vpack.c.bf16 %v363_v63, %v363_v63  ;;  %v702_v1 = vpop.f32.mrf.mxu2 }
  0xcb   :  { %v703_v2 = vadd.f32 %v6285_v52, %v702_v1  ;;  %v524_v3 = vpop.f32.mrf.mxu1 }
  0xcc   :  { %758 = vst.msk [vmem:[#allocation2 + $0x4] sm:$0xf] %vm756_vm0, %v379_v0  ;;  %v525_v5 = vadd.f32 %v6273_v45, %v524_v3 }
  0xcd   :  { %v6305_v4 = vpack.c.bf16 %v703_v2, %v703_v2  ;;  %v327_v6 = vpop.f32.mrf.mxu0 }
  0xce   :  { %v328_v7 = vadd.f32 %v6278_v46, %v327_v6  ;;  %v6311_v8 = vpack.c.bf16 %v525_v5, %v525_v5 }
  0xcf   :  { %790 = vst.msk [vmem:[#allocation4 + $0x4] sm:$0xf] %vm756_vm0, %v6305_v4  ;;  %1178 = vrot.lane.b32.xlu2 %v6292_v58, %s6155_s25  ;;  %v5582_v10 = vld [vmem:[#allocation3] sm:$0xff] }
  0xd0   :  { %v364_v9 = vmul.f32 0.17677669, %v328_v7  ;;  %775 = vst.msk [vmem:[#allocation3 + $0x8] sm:$0xf] %vm756_vm0, %v6311_v8  ;;  %1310 = vrot.lane.b32.xlu1 %v560_v62, %s6163_s6  ;;  %1048 = vrot.lane.b32.xlu0 %v378_v54, %s6155_s25  ;;  %v1645_v12 = vsel %vm1640_vm1, %v5582_v10, 0 }
  0xd1   :  { %1654 = vmatpush.bf16.xpose.msra.mxu3 %v1645_v12 }
  0xd2   :  { %v6319_v11 = vpack.c.bf16 %v364_v9, %v364_v9  ;;  %v705_v13 = vpop.f32.mrf.mxu2 }
  0xd3   :  { %v706_v14 = vadd.f32 %v6285_v52, %v705_v13  ;;  %v526_v15 = vpop.f32.mrf.mxu1  ;;  %v5550_v20 = vld [vmem:[#allocation2] sm:$0xff] }
  0xd4   :  { %759 = vst.msk [vmem:[#allocation2 + $0x8] sm:$0xf] %vm756_vm0, %v6319_v11  ;;  %v527_v16 = vadd.f32 %v6273_v45, %v526_v15 }
  0xd5   :  { %v329_v17 = vpop.f32.mrf.mxu0  ;;  %v6326_v18 = vpack.c.bf16 %v706_v14, %v706_v14 }
  0xd6   :  { %v330_v19 = vadd.f32 %v6278_v46, %v329_v17  ;;  %v6329_v21 = vpack.c.bf16 %v527_v16, %v527_v16  ;;  %v5524_v17 = vld [vmem:[#allocation11 + $0x30] sm:$0xff] }
  0xd7   :  { %904 = vrot.lane.b32.xlu2 %v560_v62, %s6164_s4  ;;  %791 = vst.msk [vmem:[#allocation4 + $0x8] sm:$0xf] %vm756_vm0, %v6326_v18  ;;  %729 = vmatmul.bf16.gmra.mxu2 %v5524_v17 }
  0xd8   :  { %v365_v22 = vmul.f32 0.17677669, %v330_v19  ;;  %776 = vst.msk [vmem:[#allocation3 + $0xc] sm:$0xf] %vm756_vm0, %v6329_v21  ;;  %1050 = vrot.lane.b32.xlu1 %v379_v0, %s6155_s25  ;;  %1243 = vrot.lane.b32.xlu0 %v378_v54, %s6163_s6 }
  0xd9   :  { %4998 = vmatmul.msk.bf16.vlgmr.msra.gmra.mxu3 %vm1640_vm1, %v5550_v20 }
  0xda   :  { %v6338_v23 = vpack.c.bf16 %v365_v22, %v365_v22  ;;  %v707_v24 = vpop.f32.mrf.mxu2 }
  0xdb   :  { %v708_v25 = vadd.f32 %v6285_v52, %v707_v24  ;;  %v529_v26 = vpop.f32.mrf.mxu1 }
  0xdc   :  { %760 = vst.msk [vmem:[#allocation2 + $0xc] sm:$0xf] %vm756_vm0, %v6338_v23  ;;  %v530_v27 = vadd.f32 %v6273_v45, %v529_v26 }
  0xdd   :  { %v332_v28 = vpop.f32.mrf.mxu0  ;;  %v6345_v29 = vpack.c.bf16 %v708_v25, %v708_v25 }
  0xde   :  { %v333_v30 = vadd.f32 %v6278_v46, %v332_v28  ;;  %v6348_v31 = vpack.c.bf16 %v530_v27, %v530_v27 }
  0xdf   :  { %1115 = vrot.lane.b32.xlu2 %v560_v62, %s6155_s25  ;;  %792 = vst.msk [vmem:[#allocation4 + $0xc] sm:$0xf] %vm756_vm0, %v6345_v29  ;;  %v5583_v33 = vld [vmem:[#allocation3 + $0x8] sm:$0xff] }
  0xe0   :  { %v366_v34 = vmul.f32 0.17677669, %v333_v30  ;;  %777 = vst.msk [vmem:[#allocation3 + $0x10] sm:$0xf] %vm756_vm0, %v6348_v31  ;;  %1245 = vrot.lane.b32.xlu1 %v379_v0, %s6163_s6  ;;  %823 = vrot.lane.b32.xlu0 %v379_v0, %s6164_s4  ;;  %v1675_v35 = vsel %vm1640_vm1, %v5583_v33, 0 }
  0xe1   :  { %1684 = vmatpush.bf16.xpose.msrb.mxu3 %v1675_v35 }
  0xe2   :  { %v6358_v36 = vpack.c.bf16 %v366_v34, %v366_v34  ;;  %v710_v59 = vpop.f32.mrf.mxu2 }
  0xe3   :  { %v531_v37 = vpop.f32.mrf.mxu1  ;;  %v5551_v40 = vld [vmem:[#allocation2 + $0x8] sm:$0xff]  ;;  %v711_v62 = vadd.f32 %v6285_v52, %v710_v59 }
  0xe4   :  { %761 = vst.msk [vmem:[#allocation2 + $0x10] sm:$0xf] %vm756_vm0, %v6358_v36  ;;  %v532_v38 = vadd.f32 %v6273_v45, %v531_v37 }
  0xe5   :  { %v334_v39 = vpop.f32.mrf.mxu0  ;;  %v6403_v3 = vpack.c.bf16 %v711_v62, %v711_v62 }
  0xe6   :  { %v335_v41 = vadd.f32 %v6278_v46, %v334_v39  ;;  %v6364_v42 = vpack.c.bf16 %v532_v38, %v532_v38 }
  0xe7   :  { %1312 = vrot.lane.b32.xlu2 %v6311_v8, %s6163_s6  ;;  %793 = vst.msk [vmem:[#allocation4 + $0x10] sm:$0xf] %vm756_vm0, %v6403_v3 }
  0xe8   :  { %v367_v43 = vmul.f32 0.17677669, %v335_v41  ;;  %778 = vst.msk [vmem:[#allocation3 + $0x14] sm:$0xf] %vm756_vm0, %v6364_v42  ;;  %825 = vrot.lane.b32.xlu1 %v6319_v11, %s6164_s4  ;;  %985 = vrot.lane.b32.xlu0 %v6305_v4, %s6164_s4 }
  0xe9   :  { %5007 = vmatmul.msk.bf16.vlgmr.msrb.gmra.mxu3 %vm1640_vm1, %v5551_v40 }
  0xea   :  { %v6375_v44 = vpack.c.bf16 %v367_v43, %v367_v43  ;;  %v712_v7 = vpop.f32.mrf.mxu2 }
  0xeb   :  { %v534_v47 = vpop.f32.mrf.mxu1 }
  0xec   :  { %762 = vst.msk [vmem:[#allocation2 + $0x14] sm:$0xf] %vm756_vm0, %v6375_v44  ;;  %v535_v48 = vadd.f32 %v6273_v45, %v534_v47 }
  0xed   :  { %v337_v49 = vpop.f32.mrf.mxu0 }
  0xee   :  { %v338_v50 = vadd.f32 %v6278_v46, %v337_v49  ;;  %v6381_v51 = vpack.c.bf16 %v535_v48, %v535_v48 }
  0xef   :  { %1052 = vrot.lane.b32.xlu2 %v6319_v11, %s6155_s25  ;;  %v5584_v54 = vld [vmem:[#allocation3 + $0x10] sm:$0xff] }
  0xf0   :  { %v368_v53 = vmul.f32 0.17677669, %v338_v50  ;;  %779 = vst.msk [vmem:[#allocation3 + $0x18] sm:$0xf] %vm756_vm0, %v6381_v51  ;;  %987 = vrot.lane.b32.xlu1 %v6326_v18, %s6164_s4  ;;  %1180 = vrot.lane.b32.xlu0 %v6305_v4, %s6155_s25  ;;  %v1705_v56 = vsel %vm1640_vm1, %v5584_v54, 0  ;;  %v5525_v54 = vld [vmem:[#allocation11 + $0x38] sm:$0xff] }
  0xf1   :  { %1714 = vmatpush.bf16.xpose.msra.mxu3 %v1705_v56  ;;  %734 = vmatmul.bf16.gmra.mxu2 %v5525_v54 }
  0xf2   :  { %v6391_v55 = vpack.c.bf16 %v368_v53, %v368_v53 }
  0xf3   :  { %v536_v57 = vpop.f32.mrf.mxu1  ;;  %v5552_v0 = vld [vmem:[#allocation2 + $0x10] sm:$0xff] }
  0xf4   :  { %763 = vst.msk [vmem:[#allocation2 + $0x18] sm:$0xf] %vm756_vm0, %v6391_v55  ;;  %v537_v60 = vadd.f32 %v6273_v45, %v536_v57 }
  0xf5   :  { %v339_v61 = vpop.f32.mrf.mxu0 }
  0xf6   :  { %v340_v63 = vadd.f32 %v6278_v46, %v339_v61  ;;  %v6399_v1 = vpack.c.bf16 %v537_v60, %v537_v60 }
  0xf7   :  { %1247 = vrot.lane.b32.xlu2 %v6319_v11, %s6163_s6  ;;  %v713_v11 = vadd.f32 %v6285_v52, %v712_v7 }
  0xf8   :  { %v369_v2 = vmul.f32 0.17677669, %v340_v63  ;;  %780 = vst.msk [vmem:[#allocation3 + $0x1c] sm:$0xf] %vm756_vm0, %v6399_v1  ;;  %1182 = vrot.lane.b32.xlu1 %v6326_v18, %s6155_s25  ;;  %906 = vrot.lane.b32.xlu0 %v6311_v8, %s6164_s4 }
  0xf9   :  { %5016 = vmatmul.msk.bf16.vlgmr.msra.gmra.mxu3 %vm1640_vm1, %v5552_v0  ;;  %v6425_v14 = vpack.c.bf16 %v713_v11, %v713_v11  ;;  %v715_v11 = vpop.f32.mrf.mxu2 }
  0xfa   :  { %v6411_v5 = vpack.c.bf16 %v369_v2, %v369_v2 }
  0xfb   :  { %v539_v6 = vpop.f32.mrf.mxu1  ;;  %794 = vst.msk [vmem:[#allocation4 + $0x14] sm:$0xf] %vm756_vm0, %v6425_v14 }
  0xfc   :  { %764 = vst.msk [vmem:[#allocation2 + $0x1c] sm:$0xf] %vm756_vm0, %v6411_v5  ;;  %v540_v9 = vadd.f32 %v6273_v45, %v539_v6 }
  0xfd   :  { %v342_v10 = vpop.f32.mrf.mxu0 }
  0xfe   :  { %v343_v12 = vadd.f32 %v6278_v46, %v342_v10  ;;  %v6421_v13 = vpack.c.bf16 %v540_v9, %v540_v9 }
  0xff   :  { %989 = vrot.lane.b32.xlu2 %v6345_v29, %s6164_s4  ;;  %v5585_v16 = vld [vmem:[#allocation3 + $0x18] sm:$0xff] }
 0x100   :  { %v370_v15 = vmul.f32 0.17677669, %v343_v12  ;;  %781 = vst.msk [vmem:[#allocation3 + $0x20] sm:$0xf] %vm756_vm0, %v6421_v13  ;;  %908 = vrot.lane.b32.xlu1 %v6329_v21, %s6164_s4  ;;  %1117 = vrot.lane.b32.xlu0 %v6311_v8, %s6155_s25  ;;  %v1735_v20 = vsel %vm1640_vm1, %v5585_v16, 0  ;;  %v716_v16 = vadd.f32 %v6285_v52, %v715_v11 }
 0x101   :  { %1744 = vmatpush.bf16.xpose.msrb.mxu3 %v1735_v20 }
 0x102   :  { %v6433_v19 = vpack.c.bf16 %v370_v15, %v370_v15 }
 0x103   :  { %v541_v22 = vpop.f32.mrf.mxu1  ;;  %v5553_v27 = vld [vmem:[#allocation2 + $0x18] sm:$0xff] }
 0x104   :  { %765 = vst.msk [vmem:[#allocation2 + $0x20] sm:$0xf] %vm756_vm0, %v6433_v19  ;;  %v542_v24 = vadd.f32 %v6273_v45, %v541_v22 }
 0x105   :  { %v344_v25 = vpop.f32.mrf.mxu0 }
 0x106   :  { %v345_v26 = vadd.f32 %v6278_v46, %v344_v25  ;;  %v6442_v8 = vpack.c.bf16 %v542_v24, %v542_v24  ;;  %v6522_v24 = vpack.c.bf16 %v716_v16, %v716_v16 }
 0x107   :  { %1184 = vrot.lane.b32.xlu2 %v6345_v29, %s6155_s25 }
 0x108   :  { %v371_v28 = vmul.f32 0.17677669, %v345_v26  ;;  %782 = vst.msk [vmem:[#allocation3 + $0x24] sm:$0xf] %vm756_vm0, %v6442_v8  ;;  %1119 = vrot.lane.b32.xlu1 %v6329_v21, %s6155_s25  ;;  %1054 = vrot.lane.b32.xlu0 %v6338_v23, %s6155_s25 }
 0x109   :  { %5025 = vmatmul.msk.bf16.vlgmr.msrb.gmra.mxu3 %vm1640_vm1, %v5553_v27  ;;  %795 = vst.msk [vmem:[#allocation4 + $0x18] sm:$0xf] %vm756_vm0, %v6522_v24 }
 0x10a   :  { %v6452_v30 = vpack.c.bf16 %v371_v28, %v371_v28  ;;  %v717_v28 = vpop.f32.mrf.mxu2 }
 0x10b   :  { %v544_v32 = vpop.f32.mrf.mxu1 }
 0x10c   :  { %766 = vst.msk [vmem:[#allocation2 + $0x24] sm:$0xf] %vm756_vm0, %v6452_v30  ;;  %v545_v33 = vadd.f32 %v6273_v45, %v544_v32 }
 0x10d   :  { %v347_v34 = vpop.f32.mrf.mxu0 }
 0x10e   :  { %v348_v35 = vadd.f32 %v6278_v46, %v347_v34  ;;  %v6459_v37 = vpack.c.bf16 %v545_v33, %v545_v33  ;;  %v718_v33 = vadd.f32 %v6285_v52, %v717_v28 }
 0x10f   :  { %910 = vrot.lane.b32.xlu2 %v6348_v31, %s6164_s4  ;;  %v5586_v39 = vld [vmem:[#allocation3 + $0x20] sm:$0xff] }
 0x110   :  { %v372_v38 = vmul.f32 0.17677669, %v348_v35  ;;  %783 = vst.msk [vmem:[#allocation3 + $0x28] sm:$0xf] %vm756_vm0, %v6459_v37  ;;  %827 = vrot.lane.b32.xlu1 %v6338_v23, %s6164_s4  ;;  %1249 = vrot.lane.b32.xlu0 %v6338_v23, %s6163_s6  ;;  %v1765_v41 = vsel %vm1640_vm1, %v5586_v39, 0  ;;  %v6539_v39 = vpack.c.bf16 %v718_v33, %v718_v33 }
 0x111   :  { %1774 = vmatpush.bf16.xpose.msra.mxu3 %v1765_v41 }
 0x112   :  { %v6469_v40 = vpack.c.bf16 %v372_v38, %v372_v38  ;;  %796 = vst.msk [vmem:[#allocation4 + $0x1c] sm:$0xf] %vm756_vm0, %v6539_v39 }
 0x113   :  { %v546_v43 = vpop.f32.mrf.mxu1  ;;  %v5554_v50 = vld [vmem:[#allocation2 + $0x20] sm:$0xff] }
 0x114   :  { %767 = vst.msk [vmem:[#allocation2 + $0x28] sm:$0xf] %vm756_vm0, %v6469_v40  ;;  %v547_v47 = vadd.f32 %v6273_v45, %v546_v43 }
 0x115   :  { %v349_v48 = vpop.f32.mrf.mxu0 }
 0x116   :  { %v350_v49 = vadd.f32 %v6278_v46, %v349_v48  ;;  %v6476_v53 = vpack.c.bf16 %v547_v47, %v547_v47 }
 0x117   :  { %1121 = vrot.lane.b32.xlu2 %v6348_v31, %s6155_s25 }
 0x118   :  { %v373_v23 = vmul.f32 0.17677669, %v350_v49  ;;  %784 = vst.msk [vmem:[#allocation3 + $0x2c] sm:$0xf] %vm756_vm0, %v6476_v53  ;;  %1316 = vrot.lane.b32.xlu1 %v6348_v31, %s6163_s6  ;;  %991 = vrot.lane.b32.xlu0 %v6403_v3, %s6164_s4 }
 0x119   :  { %5034 = vmatmul.msk.bf16.vlgmr.msra.gmra.mxu3 %vm1640_vm1, %v5554_v50 }
 0x11a   :  { %v6486_v56 = vpack.c.bf16 %v373_v23, %v373_v23 }
 0x11b   :  { %v549_v57 = vpop.f32.mrf.mxu1 }
 0x11c   :  { %768 = vst.msk [vmem:[#allocation2 + $0x2c] sm:$0xf] %vm756_vm0, %v6486_v56  ;;  %v550_v59 = vadd.f32 %v6273_v45, %v549_v57 }
 0x11d   :  { %v352_v60 = vpop.f32.mrf.mxu0 }
 0x11e   :  { %v353_v61 = vadd.f32 %v6278_v46, %v352_v60  ;;  %v6493_v62 = vpack.c.bf16 %v550_v59, %v550_v59 }
 0x11f   :  { %829 = vrot.lane.b32.xlu2 %v6358_v36, %s6164_s4  ;;  %v5587_v63 = vld [vmem:[#allocation3 + $0x28] sm:$0xff] }
 0x120   :  { %v374_v31 = vmul.f32 0.17677669, %v353_v61  ;;  %785 = vst.msk [vmem:[#allocation3 + $0x30] sm:$0xf] %vm756_vm0, %v6493_v62  ;;  %1056 = vrot.lane.b32.xlu1 %v6358_v36, %s6155_s25  ;;  %1186 = vrot.lane.b32.xlu0 %v6403_v3, %s6155_s25  ;;  %v1795_v6 = vsel %vm1640_vm1, %v5587_v63, 0  ;;  %v720_v63 = vpop.f32.mrf.mxu2 }
 0x121   :  { %v984_v0 = vpop.permute.xlu2 %983  ;;  %1804 = vmatpush.bf16.xpose.msrb.mxu3 %v1795_v6 }
 0x122   :  { %1032 = vst.msk [vmem:[#allocation4 + $0x40] sm:$0xf] %vm756_vm0, %v984_v0  ;;  %v6504_v2 = vpack.c.bf16 %v374_v31, %v374_v31  ;;  %v721_v0 = vadd.f32 %v6285_v52, %v720_v63 }
 0x123   :  { %v551_v7 = vpop.f32.mrf.mxu1  ;;  %v5555_v15 = vld [vmem:[#allocation2 + $0x28] sm:$0xff] }
 0x124   :  { %769 = vst.msk [vmem:[#allocation2 + $0x30] sm:$0xf] %vm756_vm0, %v6504_v2  ;;  %v552_v9 = vadd.f32 %v6273_v45, %v551_v7 }
 0x125   :  { %v354_v10 = vpop.f32.mrf.mxu0 }
 0x126   :  { %v355_v12 = vadd.f32 %v6278_v46, %v354_v10  ;;  %v6512_v17 = vpack.c.bf16 %v552_v9, %v552_v9  ;;  %v6580_v9 = vpack.c.bf16 %v721_v0, %v721_v0 }
 0x127   :  { %1318 = vrot.lane.b32.xlu2 %v6364_v42, %s6163_s6 }
 0x128   :  { %v375_v20 = vmul.f32 0.17677669, %v355_v12  ;;  %786 = vst.msk [vmem:[#allocation3 + $0x34] sm:$0xf] %vm756_vm0, %v6512_v17  ;;  %1251 = vrot.lane.b32.xlu1 %v6358_v36, %s6163_s6  ;;  %912 = vrot.lane.b32.xlu0 %v6364_v42, %s6164_s4  ;;  %v722_v16 = vpop.f32.mrf.mxu2 }
 0x129   :  { %v1179_v22 = vpop.permute.xlu2 %1178  ;;  %5043 = vmatmul.msk.bf16.vlgmr.msrb.gmra.mxu3 %vm1640_vm1, %v5555_v15  ;;  %7943 = vst [vmem:[#allocation24_spill] sm:$0xff] %v6580_v9 }
 0x12a   :  { %1227 = vst.msk [vmem:[#allocation4 + $0x80] sm:$0xf] %vm756_vm0, %v1179_v22  ;;  %v6525_v25 = vpack.c.bf16 %v375_v20, %v375_v20  ;;  %v723_v22 = vadd.f32 %v6285_v52, %v722_v16 }
 0x12b   :  { %v554_v26 = vpop.f32.mrf.mxu1  ;;  %797 = vst.msk [vmem:[#allocation4 + $0x20] sm:$0xf] %vm756_vm0, %v6580_v9 }
 0x12c   :  { %770 = vst.msk [vmem:[#allocation2 + $0x34] sm:$0xf] %vm756_vm0, %v6525_v25  ;;  %v555_v36 = vadd.f32 %v6273_v45, %v554_v26  ;;  %v6596_v26 = vpack.c.bf16 %v723_v22, %v723_v22 }
 0x12d   :  { %v357_v27 = vpop.f32.mrf.mxu0 }
 0x12e   :  { %v358_v32 = vadd.f32 %v6278_v46, %v357_v27  ;;  %v6535_v34 = vpack.c.bf16 %v555_v36, %v555_v36  ;;  %7944 = vst [vmem:[#allocation25_spill] sm:$0xff] %v6596_v26 }
 0x12f   :  { %831 = vrot.lane.b32.xlu2 %v6375_v44, %s6164_s4  ;;  %v5588_v38 = vld [vmem:[#allocation3 + $0x30] sm:$0xff]  ;;  %798 = vst.msk [vmem:[#allocation4 + $0x24] sm:$0xf] %vm756_vm0, %v6596_v26 }
 0x130   :  { %v376_v35 = vmul.f32 0.17677669, %v358_v32  ;;  %787 = vst.msk [vmem:[#allocation3 + $0x38] sm:$0xf] %vm756_vm0, %v6535_v34  ;;  %993 = vrot.lane.b32.xlu1 %v6425_v14, %s6164_s4  ;;  %1123 = vrot.lane.b32.xlu0 %v6364_v42, %s6155_s25  ;;  %v1825_v47 = vsel %vm1640_vm1, %v5588_v38, 0 }
 0x131   :  { %v905_v41 = vpop.permute.xlu2 %904  ;;  %1834 = vmatpush.bf16.xpose.msra.mxu3 %v1825_v47 }
 0x132   :  { %952 = vst.msk [vmem:[#allocation3 + $0x44] sm:$0xf] %vm756_vm0, %v905_v41  ;;  %v6548_v43 = vpack.c.bf16 %v376_v35, %v376_v35  ;;  %v1309_v48 = vpop.permute.xlu0 %1308  ;;  %v903_v49 = vpop.permute.xlu1 %902 }
 0x133   :  { %1357 = vst.msk [vmem:[#allocation3 + $0xc0] sm:$0xf] %vm756_vm0, %v1309_v48  ;;  %v556_v50 = vpop.f32.mrf.mxu1  ;;  %v5556_v57 = vld [vmem:[#allocation2 + $0x30] sm:$0xff] }
 0x134   :  { %951 = vst.msk [vmem:[#allocation3 + $0x40] sm:$0xf] %vm756_vm0, %v903_v49  ;;  %v557_v23 = vadd.f32 %v6273_v45, %v556_v50  ;;  %v725_v50 = vpop.f32.mrf.mxu2 }
 0x135   :  { %v359_v42 = vpop.f32.mrf.mxu0  ;;  %771 = vst.msk [vmem:[#allocation2 + $0x38] sm:$0xf] %vm756_vm0, %v6548_v43 }
 0x136   :  { %v360_v54 = vadd.f32 %v6278_v46, %v359_v42  ;;  %v6559_v59 = vpack.c.bf16 %v557_v23, %v557_v23  ;;  %v726_v23 = vadd.f32 %v6285_v52, %v725_v50 }
 0x137   :  { %1058 = vrot.lane.b32.xlu2 %v6375_v44, %s6155_s25 }
 0x138   :  { %v377_v60 = vmul.f32 0.17677669, %v360_v54  ;;  %788 = vst.msk [vmem:[#allocation3 + $0x3c] sm:$0xf] %vm756_vm0, %v6559_v59  ;;  %1188 = vrot.lane.b32.xlu1 %v6425_v14, %s6155_s25  ;;  %1320 = vrot.lane.b32.xlu0 %v6381_v51, %s6163_s6 }
 0x139   :  { %v1116_v61 = vpop.permute.xlu2 %1115  ;;  %5052 = vmatmul.msk.bf16.vlgmr.msra.gmra.mxu3 %vm1640_vm1, %v5556_v57 }
 0x13a   :  { %1163 = vst.msk [vmem:[#allocation3 + $0x84] sm:$0xf] %vm756_vm0, %v1116_v61  ;;  %v6570_v45 = vpack.c.bf16 %v377_v60, %v377_v60  ;;  %v1114_v46 = vpop.permute.xlu1 %1113  ;;  %v822_v31 = vpop.permute.xlu0 %821 }
 0x13b   :  { %1162 = vst.msk [vmem:[#allocation3 + $0x80] sm:$0xf] %vm756_vm0, %v1114_v46  ;;  %v5590_v6 = vld [vmem:[#allocation3 + $0x40] sm:$0xff] }
 0x13c   :  { %870 = vst.msk [vmem:[#allocation2 + $0x40] sm:$0xf] %vm756_vm0, %v822_v31 }
 0x13d   :  { %772 = vst.msk [vmem:[#allocation2 + $0x3c] sm:$0xf] %vm756_vm0, %v6570_v45 }
 0x13f   :  { %1253 = vrot.lane.b32.xlu2 %v6375_v44, %s6163_s6  ;;  %v5589_v7 = vld [vmem:[#allocation3 + $0x38] sm:$0xff]  ;;  %v1885_v44 = vsel %vm1640_vm1, %v5590_v6, 0 }
 0x140   :  { %914 = vrot.lane.b32.xlu1 %v6381_v51, %s6164_s4  ;;  %833 = vrot.lane.b32.xlu0 %v6391_v55, %s6164_s4  ;;  %v1855_v11 = vsel %vm1640_vm1, %v5589_v7, 0 }
 0x141   :  { %v1313_v10 = vpop.permute.xlu2 %1312  ;;  %1864 = vmatpush.bf16.xpose.msrb.mxu3 %v1855_v11 }
 0x142   :  { %1359 = vst.msk [vmem:[#allocation3 + $0xc8] sm:$0xf] %vm756_vm0, %v1313_v10  ;;  %v1311_v12 = vpop.permute.xlu1 %1310  ;;  %v1049_v15 = vpop.permute.xlu0 %1048 }
 0x143   :  { %1358 = vst.msk [vmem:[#allocation3 + $0xc4] sm:$0xf] %vm756_vm0, %v1311_v12 }
 0x144   :  { %1097 = vst.msk [vmem:[#allocation2 + $0x80] sm:$0xf] %vm756_vm0, %v1049_v15  ;;  %v5557_v20 = vld [vmem:[#allocation2 + $0x38] sm:$0xff] }
 0x147   :  { %1255 = vrot.lane.b32.xlu2 %v6391_v55, %s6163_s6 }
 0x148   :  { %1125 = vrot.lane.b32.xlu1 %v6381_v51, %s6155_s25  ;;  %1060 = vrot.lane.b32.xlu0 %v6391_v55, %s6155_s25 }
 0x149   :  { %1894 = vmatpush.bf16.xpose.msra.mxu3 %v1885_v44  ;;  %v1053_v36 = vpop.permute.xlu2 %1052 }
 0x14a   :  { %1099 = vst.msk [vmem:[#allocation2 + $0x88] sm:$0xf] %vm756_vm0, %v1053_v36  ;;  %5061 = vmatmul.msk.bf16.vlgmr.msrb.gmra.mxu3 %vm1640_vm1, %v5557_v20  ;;  %v1051_v27 = vpop.permute.xlu1 %1050  ;;  %v1244_v28 = vpop.permute.xlu0 %1243 }
 0x14b   :  { %1098 = vst.msk [vmem:[#allocation2 + $0x84] sm:$0xf] %vm756_vm0, %v1051_v27 }
 0x14c   :  { %1292 = vst.msk [vmem:[#allocation2 + $0xc0] sm:$0xf] %vm756_vm0, %v1244_v28 }
 0x14f   :  { %995 = vrot.lane.b32.xlu2 %v6522_v24, %s6164_s4 }
 0x150   :  { %1322 = vrot.lane.b32.xlu1 %v6399_v1, %s6163_s6  ;;  %1257 = vrot.lane.b32.xlu0 %v6411_v5, %s6163_s6 }
 0x151   :  { %v1248_v51 = vpop.permute.xlu2 %1247 }
 0x152   :  { %1294 = vst.msk [vmem:[#allocation2 + $0xc8] sm:$0xf] %vm756_vm0, %v1248_v51  ;;  %v1246_v55 = vpop.permute.xlu1 %1245  ;;  %v824_v32 = vpop.permute.xlu0 %823 }
 0x153   :  { %1293 = vst.msk [vmem:[#allocation2 + $0xc4] sm:$0xf] %vm756_vm0, %v1246_v55 }
 0x154   :  { %871 = vst.msk [vmem:[#allocation2 + $0x44] sm:$0xf] %vm756_vm0, %v824_v32 }
 0x157   :  { %1190 = vrot.lane.b32.xlu2 %v6522_v24, %s6155_s25 }
 0x158   :  { %835 = vrot.lane.b32.xlu1 %v6411_v5, %s6164_s4  ;;  %997 = vrot.lane.b32.xlu0 %v6539_v39, %s6164_s4 }
 0x159   :  { %v990_v33 = vpop.permute.xlu2 %989 }
 0x15a   :  { %1035 = vst.msk [vmem:[#allocation4 + $0x4c] sm:$0xf] %vm756_vm0, %v990_v33  ;;  %v826_v35 = vpop.permute.xlu1 %825  ;;  %v986_v38 = vpop.permute.xlu0 %985 }
 0x15b   :  { %872 = vst.msk [vmem:[#allocation2 + $0x48] sm:$0xf] %vm756_vm0, %v826_v35  ;;  %v5558_v41 = vld [vmem:[#allocation2 + $0x40] sm:$0xff] }
 0x15c   :  { %1033 = vst.msk [vmem:[#allocation4 + $0x44] sm:$0xf] %vm756_vm0, %v986_v38  ;;  %5070 = vmatmul.msk.bf16.vlgmr.msra.gmra.mxu3 %vm1640_vm1, %v5558_v41 }
 0x15f   :  { %916 = vrot.lane.b32.xlu2 %v6399_v1, %s6164_s4 }
 0x160   :  { %1062 = vrot.lane.b32.xlu1 %v6411_v5, %s6155_s25  ;;  %1192 = vrot.lane.b32.xlu0 %v6539_v39, %s6155_s25  ;;  %v6643_v5 = vpack.c.bf16 %v726_v23, %v726_v23 }
 0x161   :  { %v1185_v47 = vpop.permute.xlu2 %1184 }
 0x162   :  { %1230 = vst.msk [vmem:[#allocation4 + $0x8c] sm:$0xf] %vm756_vm0, %v1185_v47  ;;  %v988_v48 = vpop.permute.xlu1 %987  ;;  %v1181_v49 = vpop.permute.xlu0 %1180 }
 0x163   :  { %1034 = vst.msk [vmem:[#allocation4 + $0x48] sm:$0xf] %vm756_vm0, %v988_v48 }
 0x164   :  { %1228 = vst.msk [vmem:[#allocation4 + $0x84] sm:$0xf] %vm756_vm0, %v1181_v49 }
 0x165   :  { %7945 = vst [vmem:[#allocation26_spill] sm:$0xff] %v6643_v5 }
 0x166   :  { %799 = vst.msk [vmem:[#allocation4 + $0x28] sm:$0xf] %vm756_vm0, %v6643_v5 }
 0x167   :  { %1127 = vrot.lane.b32.xlu2 %v6399_v1, %s6155_s25  ;;  %v727_v1 = vpop.f32.mrf.mxu2 }
 0x168   :  { %999 = vrot.lane.b32.xlu1 %v6580_v9, %s6164_s4  ;;  %918 = vrot.lane.b32.xlu0 %v6421_v13, %s6164_s4  ;;  %v728_v60 = vadd.f32 %v6285_v52, %v727_v1 }
 0x169   :  { %v911_v42 = vpop.permute.xlu2 %910 }
 0x16a   :  { %955 = vst.msk [vmem:[#allocation3 + $0x50] sm:$0xf] %vm756_vm0, %v911_v42  ;;  %v1183_v54 = vpop.permute.xlu1 %1182  ;;  %v907_v57 = vpop.permute.xlu0 %906  ;;  %v6653_v61 = vpack.c.bf16 %v728_v60, %v728_v60 }
 0x16b   :  { %1229 = vst.msk [vmem:[#allocation4 + $0x88] sm:$0xf] %vm756_vm0, %v1183_v54 }
 0x16c   :  { %953 = vst.msk [vmem:[#allocation3 + $0x48] sm:$0xf] %vm756_vm0, %v907_v57 }
 0x16d   :  { %7946 = vst [vmem:[#allocation27_spill] sm:$0xff] %v6653_v61 }
 0x16e   :  { %800 = vst.msk [vmem:[#allocation4 + $0x2c] sm:$0xf] %vm756_vm0, %v6653_v61 }
 0x16f   :  { %837 = vrot.lane.b32.xlu2 %v6433_v19, %s6164_s4  ;;  %v730_v16 = vpop.f32.mrf.mxu2 }
 0x170   :  { %1194 = vrot.lane.b32.xlu1 %v6580_v9, %s6155_s25  ;;  %1129 = vrot.lane.b32.xlu0 %v6421_v13, %s6155_s25  ;;  %v731_v20 = vadd.f32 %v6285_v52, %v730_v16 }
 0x171   :  { %v1122_v46 = vpop.permute.xlu2 %1121 }
 0x172   :  { %1166 = vst.msk [vmem:[#allocation3 + $0x90] sm:$0xf] %vm756_vm0, %v1122_v46  ;;  %v909_v31 = vpop.permute.xlu1 %908  ;;  %v1118_v63 = vpop.permute.xlu0 %1117  ;;  %v6690_v36 = vpack.c.bf16 %v731_v20, %v731_v20 }
 0x173   :  { %954 = vst.msk [vmem:[#allocation3 + $0x4c] sm:$0xf] %vm756_vm0, %v909_v31 }
 0x174   :  { %1164 = vst.msk [vmem:[#allocation3 + $0x88] sm:$0xf] %vm756_vm0, %v1118_v63 }
 0x175   :  { %7947 = vst [vmem:[#allocation28_spill] sm:$0xff] %v6690_v36 }
 0x176   :  { %801 = vst.msk [vmem:[#allocation4 + $0x30] sm:$0xf] %vm756_vm0, %v6690_v36 }
 0x177   :  { %1064 = vrot.lane.b32.xlu2 %v6433_v19, %s6155_s25  ;;  %v732_v55 = vpop.f32.mrf.mxu2 }
 0x178   :  { %920 = vrot.lane.b32.xlu1 %v6442_v8, %s6164_s4  ;;  %839 = vrot.lane.b32.xlu0 %v6452_v30, %s6164_s4  ;;  %v733_v32 = vadd.f32 %v6285_v52, %v732_v55 }
 0x179   :  { %v830_v0 = vpop.permute.xlu2 %829 }
 0x17a   :  { %874 = vst.msk [vmem:[#allocation2 + $0x50] sm:$0xf] %vm756_vm0, %v830_v0  ;;  %v1120_v6 = vpop.permute.xlu1 %1119  ;;  %v1055_v7 = vpop.permute.xlu0 %1054  ;;  %v5591_v10 = vld [vmem:[#allocation3 + $0x48] sm:$0xff]  ;;  %v6705_v35 = vpack.c.bf16 %v733_v32, %v733_v32 }
 0x17b   :  { %1165 = vst.msk [vmem:[#allocation3 + $0x8c] sm:$0xf] %vm756_vm0, %v1120_v6  ;;  %v1915_v11 = vsel %vm1640_vm1, %v5591_v10, 0 }
 0x17c   :  { %1100 = vst.msk [vmem:[#allocation2 + $0x8c] sm:$0xf] %vm756_vm0, %v1055_v7  ;;  %1924 = vmatpush.bf16.xpose.msrb.mxu3 %v1915_v11 }
 0x17d   :  { %7948 = vst [vmem:[#allocation29_spill] sm:$0xff] %v6705_v35 }
 0x17e   :  { %802 = vst.msk [vmem:[#allocation4 + $0x34] sm:$0xf] %vm756_vm0, %v6705_v35 }
 0x17f   :  { %1001 = vrot.lane.b32.xlu2 %v6596_v26, %s6164_s4  ;;  %v735_v50 = vpop.f32.mrf.mxu2 }
 0x180   :  { %1131 = vrot.lane.b32.xlu1 %v6442_v8, %s6155_s25  ;;  %1066 = vrot.lane.b32.xlu0 %v6452_v30, %s6155_s25  ;;  %v736_v23 = vadd.f32 %v6285_v52, %v735_v50 }
 0x181   :  { %v1319_v12 = vpop.permute.xlu2 %1318 }
 0x182   :  { %1362 = vst.msk [vmem:[#allocation3 + $0xd4] sm:$0xf] %vm756_vm0, %v1319_v12  ;;  %v828_v15 = vpop.permute.xlu1 %827  ;;  %v1250_v44 = vpop.permute.xlu0 %1249  ;;  %v6724_v42 = vpack.c.bf16 %v736_v23, %v736_v23 }
 0x183   :  { %873 = vst.msk [vmem:[#allocation2 + $0x4c] sm:$0xf] %vm756_vm0, %v828_v15 }
 0x184   :  { %1295 = vst.msk [vmem:[#allocation2 + $0xcc] sm:$0xf] %vm756_vm0, %v1250_v44 }
 0x185   :  { %7949 = vst [vmem:[#allocation30_spill] sm:$0xff] %v6724_v42 }
 0x186   :  { %803 = vst.msk [vmem:[#allocation4 + $0x38] sm:$0xf] %vm756_vm0, %v6724_v42 }
 0x187   :  { %1196 = vrot.lane.b32.xlu2 %v6596_v26, %s6155_s25  ;;  %v737_v46 = vpop.f32.mrf.mxu2 }
 0x188   :  { %841 = vrot.lane.b32.xlu1 %v6469_v40, %s6164_s4  ;;  %1003 = vrot.lane.b32.xlu0 %v6643_v5, %s6164_s4  ;;  %v738_v63 = vadd.f32 %v6285_v52, %v737_v46 }
 0x189   :  { %v832_v22 = vpop.permute.xlu2 %831 }
 0x18a   :  { %875 = vst.msk [vmem:[#allocation2 + $0x54] sm:$0xf] %vm756_vm0, %v832_v22  ;;  %v1317_v27 = vpop.permute.xlu1 %1316  ;;  %v992_v28 = vpop.permute.xlu0 %991  ;;  %v5559_v51 = vld [vmem:[#allocation2 + $0x48] sm:$0xff]  ;;  %v6739_v0 = vpack.c.bf16 %v738_v63, %v738_v63 }
 0x18b   :  { %1361 = vst.msk [vmem:[#allocation3 + $0xd0] sm:$0xf] %vm756_vm0, %v1317_v27  ;;  %5079 = vmatmul.msk.bf16.vlgmr.msrb.gmra.mxu3 %vm1640_vm1, %v5559_v51 }
 0x18c   :  { %1036 = vst.msk [vmem:[#allocation4 + $0x50] sm:$0xf] %vm756_vm0, %v992_v28 }
 0x18d   :  { %7950 = vst [vmem:[#allocation31_spill] sm:$0xff] %v6739_v0 }
 0x18e   :  { %804 = vst.msk [vmem:[#allocation4 + $0x3c] sm:$0xf] %vm756_vm0, %v6739_v0 }
 0x18f   :  { %922 = vrot.lane.b32.xlu2 %v6459_v37, %s6164_s4 }
 0x190   :  { %1068 = vrot.lane.b32.xlu1 %v6469_v40, %s6155_s25  ;;  %1198 = vrot.lane.b32.xlu0 %v6643_v5, %s6155_s25 }
 0x191   :  { %v1059_v33 = vpop.permute.xlu2 %1058  ;;  %v5560_v52 = vld [vmem:[#allocation2 + $0x50] sm:$0xff] }
 0x192   :  { %1102 = vst.msk [vmem:[#allocation2 + $0x94] sm:$0xf] %vm756_vm0, %v1059_v33  ;;  %v1057_v38 = vpop.permute.xlu1 %1056  ;;  %v1187_v41 = vpop.permute.xlu0 %1186 }
 0x193   :  { %1101 = vst.msk [vmem:[#allocation2 + $0x90] sm:$0xf] %vm756_vm0, %v1057_v38 }
 0x194   :  { %1231 = vst.msk [vmem:[#allocation4 + $0x90] sm:$0xf] %vm756_vm0, %v1187_v41  ;;  %v6781_v41 = vpop.f32.mrf.mxu3 }
 0x197   :  { %1133 = vrot.lane.b32.xlu2 %v6459_v37, %s6155_s25 }
 0x198   :  { %1005 = vrot.lane.b32.xlu1 %v6653_v61, %s6164_s4  ;;  %924 = vrot.lane.b32.xlu0 %v6476_v53, %s6164_s4 }
 0x199   :  { %v1254_v47 = vpop.permute.xlu2 %1253 }
 0x19a   :  { %1297 = vst.msk [vmem:[#allocation2 + $0xd4] sm:$0xf] %vm756_vm0, %v1254_v47  ;;  %v1252_v48 = vpop.permute.xlu1 %1251  ;;  %v913_v49 = vpop.permute.xlu0 %912  ;;  %v5568_v20 = vld [vmem:[#allocation2 + $0x90] sm:$0xff] }
 0x19b   :  { %1296 = vst.msk [vmem:[#allocation2 + $0xd0] sm:$0xf] %vm756_vm0, %v1252_v48 }
 0x19c   :  { %956 = vst.msk [vmem:[#allocation3 + $0x54] sm:$0xf] %vm756_vm0, %v913_v49  ;;  %v6794_v50 = vpop.f32.mrf.mxu3 }
 0x19f   :  { %843 = vrot.lane.b32.xlu2 %v6486_v56, %s6164_s4 }
 0x1a0   :  { %1200 = vrot.lane.b32.xlu1 %v6653_v61, %s6155_s25  ;;  %1135 = vrot.lane.b32.xlu0 %v6476_v53, %s6155_s25 }
 0x1a1   :  { %v1256_v54 = vpop.permute.xlu2 %1255 }
 0x1a2   :  { %1298 = vst.msk [vmem:[#allocation2 + $0xd8] sm:$0xf] %vm756_vm0, %v1256_v54  ;;  %v994_v57 = vpop.permute.xlu1 %993  ;;  %v1124_v1 = vpop.permute.xlu0 %1123 }
 0x1a3   :  { %1037 = vst.msk [vmem:[#allocation4 + $0x54] sm:$0xf] %vm756_vm0, %v994_v57  ;;  %v5592_v60 = vld [vmem:[#allocation3 + $0x50] sm:$0xff] }
 0x1a4   :  { %1167 = vst.msk [vmem:[#allocation3 + $0x94] sm:$0xf] %vm756_vm0, %v1124_v1  ;;  %v1945_v31 = vsel %vm1640_vm1, %v5592_v60, 0  ;;  %v6810_v46 = vpop.f32.mrf.mxu3 }
 0x1a5   :  { %1954 = vmatpush.bf16.xpose.msrb.mxu1 %v1945_v31 }
 0x1a7   :  { %1070 = vrot.lane.b32.xlu2 %v6486_v56, %s6155_s25 }
 0x1a8   :  { %926 = vrot.lane.b32.xlu1 %v6493_v62, %s6164_s4  ;;  %845 = vrot.lane.b32.xlu0 %v6504_v2, %s6164_s4 }
 0x1a9   :  { %v996_v6 = vpop.permute.xlu2 %995 }
 0x1aa   :  { %1038 = vst.msk [vmem:[#allocation4 + $0x58] sm:$0xf] %vm756_vm0, %v996_v6  ;;  %v1189_v7 = vpop.permute.xlu1 %1188  ;;  %v1321_v10 = vpop.permute.xlu0 %1320 }
 0x1ab   :  { %1232 = vst.msk [vmem:[#allocation4 + $0x94] sm:$0xf] %vm756_vm0, %v1189_v7  ;;  %v5600_v11 = vld [vmem:[#allocation3 + $0x90] sm:$0xff] }
 0x1ac   :  { %1363 = vst.msk [vmem:[#allocation3 + $0xd8] sm:$0xf] %vm756_vm0, %v1321_v10  ;;  %5088 = vmatmul.msk.bf16.vlgmr.msrb.gmra.mxu1 %vm1640_vm1, %v5560_v52  ;;  %v2185_v12 = vsel %vm1640_vm1, %v5600_v11, 0  ;;  %v6822_v52 = vpop.f32.mrf.mxu3 }
 0x1ad   :  { %2194 = vmatpush.bf16.xpose.msrb.mxu0 %v2185_v12 }
 0x1af   :  { %1007 = vrot.lane.b32.xlu2 %v6690_v36, %s6164_s4 }
 0x1b0   :  { %1137 = vrot.lane.b32.xlu1 %v6493_v62, %s6155_s25  ;;  %1072 = vrot.lane.b32.xlu0 %v6504_v2, %s6155_s25 }
 0x1b1   :  { %v1191_v15 = vpop.permute.xlu2 %1190 }
 0x1b2   :  { %1233 = vst.msk [vmem:[#allocation4 + $0x98] sm:$0xf] %vm756_vm0, %v1191_v15  ;;  %v915_v44 = vpop.permute.xlu1 %914  ;;  %v834_v16 = vpop.permute.xlu0 %833 }
 0x1b3   :  { %957 = vst.msk [vmem:[#allocation3 + $0x58] sm:$0xf] %vm756_vm0, %v915_v44 }
 0x1b4   :  { %876 = vst.msk [vmem:[#allocation2 + $0x58] sm:$0xf] %vm756_vm0, %v834_v16  ;;  %5160 = vmatmul.msk.bf16.vlgmr.msrb.gmra.mxu0 %vm1640_vm1, %v5568_v20  ;;  %v6833_v15 = vpop.f32.mrf.mxu3 }
 0x1b7   :  { %1202 = vrot.lane.b32.xlu2 %v6690_v36, %s6155_s25 }
 0x1b8   :  { %847 = vrot.lane.b32.xlu1 %v6525_v25, %s6164_s4  ;;  %1009 = vrot.lane.b32.xlu0 %v6705_v35, %s6164_s4 }
 0x1b9   :  { %v917_v22 = vpop.permute.xlu2 %916 }
 0x1ba   :  { %958 = vst.msk [vmem:[#allocation3 + $0x5c] sm:$0xf] %vm756_vm0, %v917_v22  ;;  %v1126_v27 = vpop.permute.xlu1 %1125  ;;  %v1061_v28 = vpop.permute.xlu0 %1060 }
 0x1bb   :  { %1168 = vst.msk [vmem:[#allocation3 + $0x98] sm:$0xf] %vm756_vm0, %v1126_v27 }
 0x1bc   :  { %1103 = vst.msk [vmem:[#allocation2 + $0x98] sm:$0xf] %vm756_vm0, %v1061_v28  ;;  %v6847_v27 = vpop.f32.mrf.mxu3 }
 0x1bf   :  { %928 = vrot.lane.b32.xlu2 %v6512_v17, %s6164_s4 }
 0x1c0   :  { %1074 = vrot.lane.b32.xlu1 %v6525_v25, %s6155_s25  ;;  %1204 = vrot.lane.b32.xlu0 %v6705_v35, %s6155_s25 }
 0x1c1   :  { %v1128_v51 = vpop.permute.xlu2 %1127  ;;  %v5593_v55 = vld [vmem:[#allocation3 + $0x58] sm:$0xff] }
 0x1c2   :  { %1169 = vst.msk [vmem:[#allocation3 + $0x9c] sm:$0xf] %vm756_vm0, %v1128_v51  ;;  %v1323_v32 = vpop.permute.xlu1 %1322  ;;  %v1258_v33 = vpop.permute.xlu0 %1257  ;;  %v1975_v38 = vsel %vm1640_vm1, %v5593_v55, 0 }
 0x1c3   :  { %1364 = vst.msk [vmem:[#allocation3 + $0xdc] sm:$0xf] %vm756_vm0, %v1323_v32  ;;  %1984 = vmatpush.bf16.xpose.msra.mxu1 %v1975_v38 }
 0x1c4   :  { %1299 = vst.msk [vmem:[#allocation2 + $0xdc] sm:$0xf] %vm756_vm0, %v1258_v33 }
 0x1c7   :  { %1139 = vrot.lane.b32.xlu2 %v6512_v17, %s6155_s25 }
 0x1c8   :  { %1011 = vrot.lane.b32.xlu1 %v6724_v42, %s6164_s4  ;;  %930 = vrot.lane.b32.xlu0 %v6535_v34, %s6164_s4 }
 0x1c9   :  { %v838_v47 = vpop.permute.xlu2 %837 }
 0x1ca   :  { %878 = vst.msk [vmem:[#allocation2 + $0x60] sm:$0xf] %vm756_vm0, %v838_v47  ;;  %v836_v48 = vpop.permute.xlu1 %835  ;;  %v998_v49 = vpop.permute.xlu0 %997 }
 0x1cb   :  { %877 = vst.msk [vmem:[#allocation2 + $0x5c] sm:$0xf] %vm756_vm0, %v836_v48 }
 0x1cc   :  { %1039 = vst.msk [vmem:[#allocation4 + $0x5c] sm:$0xf] %vm756_vm0, %v998_v49  ;;  %v5566_v49 = vld [vmem:[#allocation2 + $0x80] sm:$0xff] }
 0x1cf   :  { %849 = vrot.lane.b32.xlu2 %v6548_v43, %s6164_s4 }
 0x1d0   :  { %1206 = vrot.lane.b32.xlu1 %v6724_v42, %s6155_s25  ;;  %1141 = vrot.lane.b32.xlu0 %v6535_v34, %s6155_s25 }
 0x1d1   :  { %v1065_v23 = vpop.permute.xlu2 %1064 }
 0x1d2   :  { %1105 = vst.msk [vmem:[#allocation2 + $0xa0] sm:$0xf] %vm756_vm0, %v1065_v23  ;;  %v1063_v54 = vpop.permute.xlu1 %1062  ;;  %v1193_v57 = vpop.permute.xlu0 %1192  ;;  %v5561_v1 = vld [vmem:[#allocation2 + $0x58] sm:$0xff] }
 0x1d3   :  { %1104 = vst.msk [vmem:[#allocation2 + $0x9c] sm:$0xf] %vm756_vm0, %v1063_v54  ;;  %5097 = vmatmul.msk.bf16.vlgmr.msra.gmra.mxu1 %vm1640_vm1, %v5561_v1  ;;  %v5599_v54 = vld [vmem:[#allocation3 + $0x88] sm:$0xff] }
 0x1d4   :  { %1234 = vst.msk [vmem:[#allocation4 + $0x9c] sm:$0xf] %vm756_vm0, %v1193_v57 }
 0x1d7   :  { %1076 = vrot.lane.b32.xlu2 %v6548_v43, %s6155_s25 }
 0x1d8   :  { %932 = vrot.lane.b32.xlu1 %v6559_v59, %s6164_s4  ;;  %851 = vrot.lane.b32.xlu0 %v6570_v45, %s6164_s4 }
 0x1d9   :  { %v1002_v60 = vpop.permute.xlu2 %1001 }
 0x1da   :  { %1041 = vst.msk [vmem:[#allocation4 + $0x64] sm:$0xf] %vm756_vm0, %v1002_v60  ;;  %v1000_v31 = vpop.permute.xlu1 %999  ;;  %v919_v63 = vpop.permute.xlu0 %918 }
 0x1db   :  { %1040 = vst.msk [vmem:[#allocation4 + $0x60] sm:$0xf] %vm756_vm0, %v1000_v31 }
 0x1dc   :  { %959 = vst.msk [vmem:[#allocation3 + $0x60] sm:$0xf] %vm756_vm0, %v919_v63 }
 0x1df   :  { %1326 = vrot.lane.b32.xlu2 %v6442_v8, %s6163_s6 }
 0x1e0   :  { %1143 = vrot.lane.b32.xlu1 %v6559_v59, %s6155_s25  ;;  %1078 = vrot.lane.b32.xlu0 %v6570_v45, %s6155_s25 }
 0x1e1   :  { %v1197_v6 = vpop.permute.xlu2 %1196 }
 0x1e2   :  { %1236 = vst.msk [vmem:[#allocation4 + $0xa4] sm:$0xf] %vm756_vm0, %v1197_v6  ;;  %v1195_v7 = vpop.permute.xlu1 %1194  ;;  %v1130_v10 = vpop.permute.xlu0 %1129 }
 0x1e3   :  { %1235 = vst.msk [vmem:[#allocation4 + $0xa0] sm:$0xf] %vm756_vm0, %v1195_v7 }
 0x1e4   :  { %1170 = vst.msk [vmem:[#allocation3 + $0xa0] sm:$0xf] %vm756_vm0, %v1130_v10 }
 0x1e7   :  { %1013 = vrot.lane.b32.xlu2 %v6739_v0, %s6164_s4 }
 0x1e8   :  { %1324 = vrot.lane.b32.xlu1 %v6421_v13, %s6163_s6  ;;  %1314 = vrot.lane.b32.xlu0 %v6329_v21, %s6163_s6  ;;  %v5598_v21 = vld [vmem:[#allocation3 + $0x80] sm:$0xff] }
 0x1e9   :  { %v923_v8 = vpop.permute.xlu2 %922 }
 0x1ea   :  { %961 = vst.msk [vmem:[#allocation3 + $0x68] sm:$0xf] %vm756_vm0, %v923_v8  ;;  %v921_v11 = vpop.permute.xlu1 %920  ;;  %v840_v12 = vpop.permute.xlu0 %839 }
 0x1eb   :  { %960 = vst.msk [vmem:[#allocation3 + $0x64] sm:$0xf] %vm756_vm0, %v921_v11 }
 0x1ec   :  { %879 = vst.msk [vmem:[#allocation2 + $0x64] sm:$0xf] %vm756_vm0, %v840_v12 }
 0x1ef   :  { %1208 = vrot.lane.b32.xlu2 %v6739_v0, %s6155_s25 }
 0x1f0   :  { %1261 = vrot.lane.b32.xlu1 %v6452_v30, %s6163_s6  ;;  %1259 = vrot.lane.b32.xlu0 %v6433_v19, %s6163_s6  ;;  %v2125_v30 = vsel %vm1640_vm1, %v5598_v21, 0  ;;  %v5574_v21 = vld [vmem:[#allocation2 + $0xc0] sm:$0xff] }
 0x1f1   :  { %v1134_v44 = vpop.permute.xlu2 %1133 }
 0x1f2   :  { %1172 = vst.msk [vmem:[#allocation3 + $0xa8] sm:$0xf] %vm756_vm0, %v1134_v44  ;;  %v1132_v13 = vpop.permute.xlu1 %1131  ;;  %v1067_v16 = vpop.permute.xlu0 %1066  ;;  %v5594_v20 = vld [vmem:[#allocation3 + $0x60] sm:$0xff] }
 0x1f3   :  { %1171 = vst.msk [vmem:[#allocation3 + $0xa4] sm:$0xf] %vm756_vm0, %v1132_v13  ;;  %v2005_v22 = vsel %vm1640_vm1, %v5594_v20, 0  ;;  %v5562_v55 = vld [vmem:[#allocation2 + $0x60] sm:$0xff]  ;;  %v5567_v20 = vld [vmem:[#allocation2 + $0x88] sm:$0xff] }
 0x1f4   :  { %1106 = vst.msk [vmem:[#allocation2 + $0xa4] sm:$0xf] %vm756_vm0, %v1067_v16  ;;  %2014 = vmatpush.bf16.xpose.msrb.mxu2 %v2005_v22 }
 0x1f7   :  { %1332 = vrot.lane.b32.xlu2 %v6493_v62, %s6163_s6 }
 0x1f8   :  { %1328 = vrot.lane.b32.xlu1 %v6459_v37, %s6163_s6  ;;  %1334 = vrot.lane.b32.xlu0 %v6512_v17, %s6163_s6  ;;  %v6863_v37 = vpop.f32.mrf.mxu3 }
 0x1f9   :  { %v844_v19 = vpop.permute.xlu2 %843 }
 0x1fa   :  { %881 = vst.msk [vmem:[#allocation2 + $0x6c] sm:$0xf] %vm756_vm0, %v844_v19  ;;  %v842_v28 = vpop.permute.xlu1 %841  ;;  %v1004_v51 = vpop.permute.xlu0 %1003  ;;  %v5602_v32 = vld [vmem:[#allocation3 + $0xa0] sm:$0xff] }
 0x1fb   :  { %880 = vst.msk [vmem:[#allocation2 + $0x68] sm:$0xf] %vm756_vm0, %v842_v28  ;;  %5106 = vmatmul.msk.bf16.vlgmr.msrb.gmra.mxu2 %vm1640_vm1, %v5562_v55  ;;  %v2245_v62 = vsel %vm1640_vm1, %v5602_v32, 0  ;;  %v5570_v63 = vld [vmem:[#allocation2 + $0xa0] sm:$0xff] }
 0x1fc   :  { %2134 = vmatpush.bf16.xpose.msra.mxu2 %v2125_v30  ;;  %1042 = vst.msk [vmem:[#allocation4 + $0x68] sm:$0xf] %vm756_vm0, %v1004_v51 }
 0x1ff   :  { %1330 = vrot.lane.b32.xlu2 %v6476_v53, %s6163_s6 }
 0x200   :  { %1269 = vrot.lane.b32.xlu1 %v6525_v25, %s6163_s6  ;;  %1267 = vrot.lane.b32.xlu0 %v6504_v2, %s6163_s6  ;;  %v5606_v25 = vld [vmem:[#allocation3 + $0xc0] sm:$0xff]  ;;  %v6878_v2 = vpop.f32.mrf.mxu3 }
 0x201   :  { %v1071_v17 = vpop.permute.xlu2 %1070 }
 0x202   :  { %1108 = vst.msk [vmem:[#allocation2 + $0xac] sm:$0xf] %vm756_vm0, %v1071_v17  ;;  %v1069_v33 = vpop.permute.xlu1 %1068  ;;  %v1199_v38 = vpop.permute.xlu0 %1198  ;;  %v5563_v6 = vld [vmem:[#allocation2 + $0x68] sm:$0xff] }
 0x203   :  { %1107 = vst.msk [vmem:[#allocation2 + $0xa8] sm:$0xf] %vm756_vm0, %v1069_v33 }
 0x204   :  { %2254 = vmatpush.bf16.xpose.msrb.mxu2 %v2245_v62  ;;  %1237 = vst.msk [vmem:[#allocation4 + $0xa8] sm:$0xf] %vm756_vm0, %v1199_v38 }
 0x207   :  { %1263 = vrot.lane.b32.xlu2 %v6469_v40, %s6163_s6  ;;  %v2365_v40 = vsel %vm1640_vm1, %v5606_v25, 0 }
 0x208   :  { %1336 = vrot.lane.b32.xlu1 %v6535_v34, %s6163_s6  ;;  %1265 = vrot.lane.b32.xlu0 %v6486_v56, %s6163_s6  ;;  %v6893_v1 = vpop.f32.mrf.mxu3 }
 0x209   :  { %v1008_v53 = vpop.permute.xlu2 %1007 }
 0x20a   :  { %1044 = vst.msk [vmem:[#allocation4 + $0x70] sm:$0xf] %vm756_vm0, %v1008_v53  ;;  %v1006_v47 = vpop.permute.xlu1 %1005  ;;  %v925_v48 = vpop.permute.xlu0 %924  ;;  %v5571_v33 = vld [vmem:[#allocation2 + $0xa8] sm:$0xff] }
 0x20b   :  { %1043 = vst.msk [vmem:[#allocation4 + $0x6c] sm:$0xf] %vm756_vm0, %v1006_v47  ;;  %5142 = vmatmul.msk.bf16.vlgmr.msra.gmra.mxu2 %vm1640_vm1, %v5566_v49 }
 0x20c   :  { %962 = vst.msk [vmem:[#allocation3 + $0x6c] sm:$0xf] %vm756_vm0, %v925_v48  ;;  %2374 = vmatpush.bf16.xpose.msra.mxu2 %v2365_v40  ;;  %v2592_v40 = vsel %vm2591_vm2, %v6781_v41, -inf }
 0x20f   :  { %1338 = vrot.lane.b32.xlu2 %v6559_v59, %s6163_s6 }
 0x210   :  { %1273 = vrot.lane.b32.xlu1 %v6570_v45, %s6163_s6  ;;  %1271 = vrot.lane.b32.xlu0 %v6548_v43, %s6163_s6  ;;  %v2155_v43 = vsel %vm1640_vm1, %v5599_v54, 0  ;;  %v6910_v7 = vpop.f32.mrf.mxu3  ;;  %v2595_v54 = vsel %vm2591_vm2, %v6794_v50, -inf }
 0x211   :  { %v1203_v56 = vpop.permute.xlu2 %1202 }
 0x212   :  { %1239 = vst.msk [vmem:[#allocation4 + $0xb0] sm:$0xf] %vm756_vm0, %v1203_v56  ;;  %v1201_v34 = vpop.permute.xlu1 %1200  ;;  %v1136_v23 = vpop.permute.xlu0 %1135 }
 0x213   :  { %1238 = vst.msk [vmem:[#allocation4 + $0xac] sm:$0xf] %vm756_vm0, %v1201_v34  ;;  %v5595_v57 = vld [vmem:[#allocation3 + $0x68] sm:$0xff]  ;;  %v5576_v34 = vld [vmem:[#allocation2 + $0xd0] sm:$0xff] }
 0x214   :  { %1173 = vst.msk [vmem:[#allocation3 + $0xac] sm:$0xf] %vm756_vm0, %v1136_v23  ;;  %v2035_v59 = vsel %vm1640_vm1, %v5595_v57, 0 }
 0x215   :  { %2044 = vmatpush.bf16.xpose.msra.mxu3 %v2035_v59 }
 0x217   :  { %1373 = vrot.lane.b32.xlu2 %v6292_v58, %s6163_s6 }
 0x218   :  { %1377 = vrot.lane.b32.xlu1 %v6326_v18, %s6163_s6  ;;  %1375 = vrot.lane.b32.xlu0 %v6305_v4, %s6163_s6 }
 0x219   :  { %v929_v45 = vpop.permute.xlu2 %928 }
 0x21a   :  { %964 = vst.msk [vmem:[#allocation3 + $0x74] sm:$0xf] %vm756_vm0, %v929_v45  ;;  %v927_v60 = vpop.permute.xlu1 %926  ;;  %v846_v31 = vpop.permute.xlu0 %845  ;;  %v2610_v45 = vsel %vm2591_vm2, %v6863_v37, -inf }
 0x21b   :  { %963 = vst.msk [vmem:[#allocation3 + $0x70] sm:$0xf] %vm756_vm0, %v927_v60  ;;  %v5603_v58 = vld [vmem:[#allocation3 + $0xa8] sm:$0xff]  ;;  %5178 = vmatmul.msk.bf16.vlgmr.msrb.gmra.mxu2 %vm1640_vm1, %v5570_v63  ;;  %v5601_v60 = vld [vmem:[#allocation3 + $0x98] sm:$0xff] }
 0x21c   :  { %882 = vst.msk [vmem:[#allocation2 + $0x70] sm:$0xf] %vm756_vm0, %v846_v31  ;;  %5115 = vmatmul.msk.bf16.vlgmr.msra.gmra.mxu3 %vm1640_vm1, %v5563_v6  ;;  %v2275_v18 = vsel %vm1640_vm1, %v5603_v58, 0 }
 0x21d   :  { %2164 = vmatpush.bf16.xpose.msrb.mxu3 %v2155_v43  ;;  %v2604_v43 = vsel %vm2591_vm2, %v6833_v15, -inf }
 0x21f   :  { %1379 = vrot.lane.b32.xlu2 %v6345_v29, %s6163_s6  ;;  %v6924_v29 = vpop.f32.mrf.mxu3 }
 0x220   :  { %1383 = vrot.lane.b32.xlu1 %v6425_v14, %s6163_s6  ;;  %1381 = vrot.lane.b32.xlu0 %v6403_v3, %s6163_s6  ;;  %v5608_v3 = vld [vmem:[#allocation3 + $0xd0] sm:$0xff] }
 0x221   :  { %v1140_v4 = vpop.permute.xlu2 %1139 }
 0x222   :  { %1175 = vst.msk [vmem:[#allocation3 + $0xb4] sm:$0xf] %vm756_vm0, %v1140_v4  ;;  %v1138_v10 = vpop.permute.xlu1 %1137  ;;  %v1073_v8 = vpop.permute.xlu0 %1072  ;;  %v5596_v11 = vld [vmem:[#allocation3 + $0x70] sm:$0xff]  ;;  %v2607_v4 = vsel %vm2591_vm2, %v6847_v27, -inf }
 0x223   :  { %1174 = vst.msk [vmem:[#allocation3 + $0xb0] sm:$0xf] %vm756_vm0, %v1138_v10  ;;  %v2065_v12 = vsel %vm1640_vm1, %v5596_v11, 0  ;;  %v2601_v11 = vsel %vm2591_vm2, %v6822_v52, -inf }
 0x224   :  { %1109 = vst.msk [vmem:[#allocation2 + $0xb0] sm:$0xf] %vm756_vm0, %v1073_v8  ;;  %2074 = vmatpush.bf16.xpose.msrb.mxu1 %v2065_v12  ;;  %v2598_v8 = vsel %vm2591_vm2, %v6810_v46, -inf }
 0x225   :  { %2284 = vmatpush.bf16.xpose.msra.mxu3 %v2275_v18  ;;  %v2215_v18 = vsel %vm1640_vm1, %v5601_v60, 0  ;;  %v2622_v60 = vsel %vm2591_vm2, %v6924_v29, -inf }
 0x227   :  { %1385 = vrot.lane.b32.xlu2 %v6522_v24, %s6163_s6  ;;  %v6936_v30 = vpop.f32.mrf.mxu3 }
 0x228   :  { %1387 = vrot.lane.b32.xlu0 %v6539_v39, %s6163_s6  ;;  %v2425_v39 = vsel %vm1640_vm1, %v5608_v3, 0 }
 0x229   :  { %v850_v14 = vpop.permute.xlu2 %849 }
 0x22a   :  { %884 = vst.msk [vmem:[#allocation2 + $0x78] sm:$0xf] %vm756_vm0, %v850_v14  ;;  %v848_v44 = vpop.permute.xlu1 %847  ;;  %v5604_v13 = vld [vmem:[#allocation3 + $0xb0] sm:$0xff]  ;;  %v1010_v16 = vpop.permute.xlu0 %1009 }
 0x22b   :  { %883 = vst.msk [vmem:[#allocation2 + $0x74] sm:$0xf] %vm756_vm0, %v848_v44  ;;  %5214 = vmatmul.msk.bf16.vlgmr.msra.gmra.mxu2 %vm1640_vm1, %v5574_v21  ;;  %v2305_v24 = vsel %vm1640_vm1, %v5604_v13, 0 }
 0x22c   :  { %1045 = vst.msk [vmem:[#allocation4 + $0x74] sm:$0xf] %vm756_vm0, %v1010_v16  ;;  %5151 = vmatmul.msk.bf16.vlgmr.msrb.gmra.mxu3 %vm1640_vm1, %v5567_v20  ;;  %2314 = vmatpush.bf16.xpose.msra.mxu0 %v2305_v24  ;;  %v2613_v16 = vsel %vm2591_vm2, %v6878_v2, -inf  ;;  %v2619_v24 = vsel %vm2591_vm2, %v6910_v7, -inf }
 0x22f   :  { %v6943_v38 = vpop.f32.mrf.mxu3 }
 0x231   :  { %v1077_v22 = vpop.permute.xlu2 %1076 }
 0x232   :  { %1111 = vst.msk [vmem:[#allocation2 + $0xb8] sm:$0xf] %vm756_vm0, %v1077_v22  ;;  %v1075_v19 = vpop.permute.xlu1 %1074  ;;  %v5564_v28 = vld [vmem:[#allocation2 + $0x70] sm:$0xff]  ;;  %v1205_v51 = vpop.permute.xlu0 %1204 }
 0x233   :  { %1110 = vst.msk [vmem:[#allocation2 + $0xb4] sm:$0xf] %vm756_vm0, %v1075_v19  ;;  %5124 = vmatmul.msk.bf16.vlgmr.msrb.gmra.mxu1 %vm1640_vm1, %v5564_v28 }
 0x234   :  { %2434 = vmatpush.bf16.xpose.msrb.mxu0 %v2425_v39  ;;  %1240 = vst.msk [vmem:[#allocation4 + $0xb4] sm:$0xf] %vm756_vm0, %v1205_v51  ;;  %v2628_v39 = vsel %vm2591_vm2, %v6943_v38, -inf }
 0x237   :  { %v6951_v48 = vpop.f32.mrf.mxu3 }
 0x239   :  { %v1327_v55 = vpop.permute.xlu2 %1326 }
 0x23a   :  { %1366 = vst.msk [vmem:[#allocation3 + $0xe4] sm:$0xf] %vm756_vm0, %v1327_v55  ;;  %v1012_v32 = vpop.permute.xlu1 %1011  ;;  %v5572_v62 = vld [vmem:[#allocation2 + $0xb0] sm:$0xff]  ;;  %v931_v17 = vpop.permute.xlu0 %930 }
 0x23b   :  { %1046 = vst.msk [vmem:[#allocation4 + $0x78] sm:$0xf] %vm756_vm0, %v1012_v32  ;;  %5196 = vmatmul.msk.bf16.vlgmr.msra.gmra.mxu0 %vm1640_vm1, %v5572_v62  ;;  %v5614_v62 = vld [vmem:[#allocation4] sm:$0xff] }
 0x23c   :  { %965 = vst.msk [vmem:[#allocation3 + $0x78] sm:$0xf] %vm756_vm0, %v931_v17  ;;  %5187 = vmatmul.msk.bf16.vlgmr.msra.gmra.mxu3 %vm1640_vm1, %v5571_v33  ;;  %v2616_v33 = vsel %vm2591_vm2, %v6893_v1, -inf }
 0x23f   :  { %v6961_v57 = vpop.f32.mrf.mxu3 }
 0x241   :  { %v1014_v53 = vpop.permute.xlu2 %1013 }
 0x242   :  { %1047 = vst.msk [vmem:[#allocation4 + $0x7c] sm:$0xf] %vm756_vm0, %v1014_v53  ;;  %v1207_v25 = vpop.permute.xlu1 %1206  ;;  %v1142_v47 = vpop.permute.xlu0 %1141 }
 0x243   :  { %1241 = vst.msk [vmem:[#allocation4 + $0xb8] sm:$0xf] %vm756_vm0, %v1207_v25  ;;  %v5609_v25 = vld [vmem:[#allocation3 + $0xd8] sm:$0xff] }
 0x244   :  { %1176 = vst.msk [vmem:[#allocation3 + $0xb8] sm:$0xf] %vm756_vm0, %v1142_v47  ;;  %v2625_v47 = vsel %vm2591_vm2, %v6936_v30, -inf }
 0x247   :  { %v6979_v12 = vpop.f32.mrf.mxu3 }
 0x249   :  { %v1209_v49 = vpop.permute.xlu2 %1208 }
 0x24a   :  { %1242 = vst.msk [vmem:[#allocation4 + $0xbc] sm:$0xf] %vm756_vm0, %v1209_v49  ;;  %v933_v56 = vpop.permute.xlu1 %932  ;;  %2593 = vmax.xlane.f32.xlu1 %v2592_v40  ;;  %v852_v23 = vpop.permute.xlu0 %851  ;;  %v2637_v49 = vsel %vm2591_vm2, %v6979_v12, -inf }
 0x24b   :  { %966 = vst.msk [vmem:[#allocation3 + $0x7c] sm:$0xf] %vm756_vm0, %v933_v56  ;;  %5232 = vmatmul.msk.bf16.vlgmr.msrb.gmra.mxu0 %vm1640_vm1, %v5576_v34  ;;  %v5569_v56 = vld [vmem:[#allocation2 + $0x98] sm:$0xff] }
 0x24c   :  { %885 = vst.msk [vmem:[#allocation2 + $0x7c] sm:$0xf] %vm756_vm0, %v852_v23  ;;  %v5575_v23 = vld [vmem:[#allocation2 + $0xc8] sm:$0xff] }
 0x24f   :  { %v6993_v55 = vpop.f32.mrf.mxu3 }
 0x250   :  { %2596 = vmax.xlane.f32.xlu2 %v2595_v54 }
 0x251   :  { %v1333_v59 = vpop.permute.xlu2 %1332 }
 0x252   :  { %1369 = vst.msk [vmem:[#allocation3 + $0xf0] sm:$0xf] %vm756_vm0, %v1333_v59  ;;  %v1144_v31 = vpop.permute.xlu1 %1143  ;;  %2605 = vmax.xlane.f32.xlu0 %v2604_v43  ;;  %2611 = vmax.xlane.f32.xlu1 %v2610_v45  ;;  %v5597_v63 = vld [vmem:[#allocation3 + $0x78] sm:$0xff]  ;;  %v1079_v6 = vpop.permute.xlu0 %1078  ;;  %v2455_v59 = vsel %vm1640_vm1, %v5609_v25, 0  ;;  %v5618_v43 = vld [vmem:[#allocation4 + $0x20] sm:$0xff] }
 0x253   :  { %1177 = vst.msk [vmem:[#allocation3 + $0xbc] sm:$0xf] %vm756_vm0, %v1144_v31  ;;  %v2095_v58 = vsel %vm1640_vm1, %v5597_v63, 0  ;;  %v5565_v3 = vld [vmem:[#allocation2 + $0x78] sm:$0xff]  ;;  %v2634_v63 = vsel %vm2591_vm2, %v6961_v57, -inf }
 0x254   :  { %1112 = vst.msk [vmem:[#allocation2 + $0xbc] sm:$0xf] %vm756_vm0, %v1079_v6  ;;  %2104 = vmatpush.bf16.xpose.msra.mxu1 %v2095_v58  ;;  %v2640_v6 = vsel %vm2591_vm2, %v6993_v55, -inf }
 0x257   :  { %v7010_v45 = vpop.f32.mrf.mxu3 }
 0x258   :  { %2608 = vmax.xlane.f32.xlu2 %v2607_v4 }
 0x259   :  { %v1331_v10 = vpop.permute.xlu2 %1330 }
 0x25a   :  { %1368 = vst.msk [vmem:[#allocation3 + $0xec] sm:$0xf] %vm756_vm0, %v1331_v10  ;;  %v1325_v14 = vpop.permute.xlu1 %1324  ;;  %2599 = vmax.xlane.f32.xlu0 %v2598_v8  ;;  %2602 = vmax.xlane.f32.xlu1 %v2601_v11  ;;  %v5605_v44 = vld [vmem:[#allocation3 + $0xb8] sm:$0xff]  ;;  %v1315_v21 = vpop.permute.xlu0 %1314  ;;  %v5615_v11 = vld [vmem:[#allocation4 + $0x8] sm:$0xff] }
 0x25b   :  { %1365 = vst.msk [vmem:[#allocation3 + $0xe0] sm:$0xf] %vm756_vm0, %v1325_v14  ;;  %5133 = vmatmul.msk.bf16.vlgmr.msra.gmra.mxu1 %vm1640_vm1, %v5565_v3  ;;  %v2335_v13 = vsel %vm1640_vm1, %v5605_v44, 0  ;;  %v5616_v3 = vld [vmem:[#allocation4 + $0x10] sm:$0xff] }
 0x25c   :  { %2224 = vmatpush.bf16.xpose.msrb.mxu1 %v2215_v18  ;;  %1360 = vst.msk [vmem:[#allocation3 + $0xcc] sm:$0xf] %vm756_vm0, %v1315_v21  ;;  %v2631_v21 = vsel %vm2591_vm2, %v6951_v48, -inf }
 0x25f   :  { %v7024_v44 = vpop.f32.mrf.mxu3 }
 0x260   :  { %2614 = vmax.xlane.f32.xlu2 %v2613_v16  ;;  %v2646_v16 = vsel %vm2591_vm2, %v7024_v44, -inf }
 0x261   :  { %v1264_v20 = vpop.permute.xlu2 %1263 }
 0x262   :  { %1302 = vst.msk [vmem:[#allocation2 + $0xe8] sm:$0xf] %vm756_vm0, %v1264_v20  ;;  %v1262_v22 = vpop.permute.xlu1 %1261  ;;  %2620 = vmax.xlane.f32.xlu0 %v2619_v24  ;;  %2629 = vmax.xlane.f32.xlu1 %v2628_v39  ;;  %v5610_v19 = vld [vmem:[#allocation3 + $0xe0] sm:$0xff]  ;;  %v1260_v28 = vpop.permute.xlu0 %1259  ;;  %v5573_v24 = vld [vmem:[#allocation2 + $0xb8] sm:$0xff] }
 0x263   :  { %1301 = vst.msk [vmem:[#allocation2 + $0xe4] sm:$0xf] %vm756_vm0, %v1262_v22  ;;  %v5607_v51 = vld [vmem:[#allocation3 + $0xc8] sm:$0xff]  ;;  %v2485_v32 = vsel %vm1640_vm1, %v5610_v19, 0  ;;  %v5620_v19 = vld [vmem:[#allocation4 + $0x30] sm:$0xff] }
 0x264   :  { %2344 = vmatpush.bf16.xpose.msra.mxu1 %v2335_v13  ;;  %1300 = vst.msk [vmem:[#allocation2 + $0xe0] sm:$0xf] %vm756_vm0, %v1260_v28  ;;  %v2395_v17 = vsel %vm1640_vm1, %v5607_v51, 0  ;;  %2494 = vmatpush.bf16.xpose.msrb.mxu2 %v2485_v32 }
 0x265   :  { %2404 = vmatpush.bf16.xpose.msrb.mxu3 %v2395_v17 }
 0x268   :  { %2617 = vmax.xlane.f32.xlu2 %v2616_v33  ;;  %v5619_v33 = vld [vmem:[#allocation4 + $0x28] sm:$0xff] }
 0x269   :  { %v1339_v53 = vpop.permute.xlu2 %1338 }
 0x26a   :  { %1372 = vst.msk [vmem:[#allocation3 + $0xfc] sm:$0xf] %vm756_vm0, %v1339_v53  ;;  %v1329_v40 = vpop.permute.xlu1 %1328  ;;  %2626 = vmax.xlane.f32.xlu0 %v2625_v47  ;;  %2638 = vmax.xlane.f32.xlu1 %v2637_v49  ;;  %v1335_v34 = vpop.permute.xlu0 %1334  ;;  %v5577_v47 = vld [vmem:[#allocation2 + $0xd8] sm:$0xff] }
 0x26b   :  { %1367 = vst.msk [vmem:[#allocation3 + $0xe8] sm:$0xf] %vm756_vm0, %v1329_v40  ;;  %v5578_v54 = vld [vmem:[#allocation2 + $0xe0] sm:$0xff]  ;;  %5169 = vmatmul.msk.bf16.vlgmr.msrb.gmra.mxu1 %vm1640_vm1, %v5569_v56  ;;  %v5617_v40 = vld [vmem:[#allocation4 + $0x18] sm:$0xff] }
 0x26c   :  { %3381 = vmatpush.bf16.msra.mxu2 %v5614_v62  ;;  %1370 = vst.msk [vmem:[#allocation3 + $0xf4] sm:$0xf] %vm756_vm0, %v1335_v34  ;;  %5223 = vmatmul.msk.bf16.vlgmr.msrb.gmra.mxu3 %vm1640_vm1, %v5575_v23 }
 0x26d   :  { %2464 = vmatpush.bf16.xpose.msrb.mxu1 %v2455_v59  ;;  %5250 = vmatmul.msk.bf16.vlgmr.msrb.gmra.mxu2 %vm1640_vm1, %v5578_v54  ;;  %v5621_v59 = vld [vmem:[#allocation4 + $0x38] sm:$0xff] }
 0x270   :  { %3493 = vmatpush.bf16.msrb.mxu2 %v5618_v43  ;;  %2623 = vmax.xlane.f32.xlu2 %v2622_v60 }
 0x271   :  { %v1374_v31 = vpop.permute.xlu2 %1373 }
 0x272   :  { %1422 = vst.msk [vmem:[#allocation4 + $0xc0] sm:$0xf] %vm756_vm0, %v1374_v31  ;;  %v1270_v58 = vpop.permute.xlu1 %1269  ;;  %2635 = vmax.xlane.f32.xlu0 %v2634_v63  ;;  %2641 = vmax.xlane.f32.xlu1 %v2640_v6  ;;  %v5611_v18 = vld [vmem:[#allocation3 + $0xe8] sm:$0xff]  ;;  %v1268_v4 = vpop.permute.xlu0 %1267 }
 0x273   :  { %1305 = vst.msk [vmem:[#allocation2 + $0xf4] sm:$0xf] %vm756_vm0, %v1270_v58  ;;  %v5612_v10 = vld [vmem:[#allocation3 + $0xf0] sm:$0xff]  ;;  %v2515_v8 = vsel %vm1640_vm1, %v5611_v18, 0 }
 0x274   :  { %1304 = vst.msk [vmem:[#allocation2 + $0xf0] sm:$0xf] %vm756_vm0, %v1268_v4  ;;  %2524 = vmatpush.bf16.xpose.msra.mxu3 %v2515_v8  ;;  %v2545_v14 = vsel %vm1640_vm1, %v5612_v10, 0  ;;  %v7049_v4 = vpop.f32.mrf.mxu1 }
 0x275   :  { %2554 = vmatpush.bf16.xpose.msra.mxu0 %v2545_v14 }
 0x278   :  { %2632 = vmax.xlane.f32.xlu2 %v2631_v21 }
 0x279   :  { %v1380_v13 = vpop.permute.xlu2 %1379 }
 0x27a   :  { %1425 = vst.msk [vmem:[#allocation4 + $0xcc] sm:$0xf] %vm756_vm0, %v1380_v13  ;;  %v1337_v20 = vpop.permute.xlu1 %1336  ;;  %2647 = vmax.xlane.f32.xlu1 %v2646_v16  ;;  %v1266_v39 = vpop.permute.xlu0 %1265 }
 0x27b   :  { %1371 = vst.msk [vmem:[#allocation3 + $0xf8] sm:$0xf] %vm756_vm0, %v1337_v20  ;;  %v5580_v22 = vld [vmem:[#allocation2 + $0xf0] sm:$0xff]  ;;  %5205 = vmatmul.msk.bf16.vlgmr.msra.gmra.mxu1 %vm1640_vm1, %v5573_v24  ;;  %v7062_v16 = vpop.f32.mrf.mxu0  ;;  %v2643_v20 = vsel %vm2591_vm2, %v7010_v45, -inf }
 0x27c   :  { %3409 = vmatpush.bf16.msrb.mxu3 %v5615_v11  ;;  %1303 = vst.msk [vmem:[#allocation2 + $0xec] sm:$0xf] %vm756_vm0, %v1266_v39  ;;  %5268 = vmatmul.msk.bf16.vlgmr.msra.gmra.mxu0 %vm1640_vm1, %v5580_v22  ;;  %v7060_v13 = vpop.f32.mrf.mxu1  ;;  %v2652_v22 = vsel %vm2591_vm2, %v7049_v4, -inf }
 0x27d   :  { %3437 = vmatpush.bf16.msrb.mxu0 %v5616_v3 }
 0x281   :  { %3549 = vmatpush.bf16.msra.mxu0 %v5620_v19  ;;  %v1386_v28 = vpop.permute.xlu2 %1385 }
 0x282   :  { %1428 = vst.msk [vmem:[#allocation4 + $0xd8] sm:$0xf] %vm756_vm0, %v1386_v28  ;;  %v1274_v51 = vpop.permute.xlu1 %1273  ;;  %v5613_v32 = vld [vmem:[#allocation3 + $0xf8] sm:$0xff]  ;;  %v1272_v62 = vpop.permute.xlu0 %1271 }
 0x283   :  { %1307 = vst.msk [vmem:[#allocation2 + $0xfc] sm:$0xf] %vm756_vm0, %v1274_v51  ;;  %v5579_v17 = vld [vmem:[#allocation2 + $0xe8] sm:$0xff]  ;;  %v2575_v53 = vsel %vm1640_vm1, %v5613_v32, 0  ;;  %v2700_v32 = vsel %vm2591_vm2, %v7062_v16, -inf }
 0x284   :  { %1306 = vst.msk [vmem:[#allocation2 + $0xf8] sm:$0xf] %vm756_vm0, %v1272_v62  ;;  %5259 = vmatmul.msk.bf16.vlgmr.msra.gmra.mxu3 %vm1640_vm1, %v5579_v17  ;;  %2584 = vmatpush.bf16.xpose.msra.mxu1 %v2575_v53  ;;  %v7072_v51 = vpop.f32.mrf.mxu1  ;;  %v7078_v17 = vpop.f32.mrf.mxu0 }
 0x285   :  { %3521 = vmatpush.bf16.msra.mxu3 %v5619_v33 }
 0x28a   :  { %v1378_v25 = vpop.permute.xlu1 %1377  ;;  %v1376_v49 = vpop.permute.xlu0 %1375 }
 0x28b   :  { %1424 = vst.msk [vmem:[#allocation4 + $0xc8] sm:$0xf] %vm756_vm0, %v1378_v25  ;;  %5241 = vmatmul.msk.bf16.vlgmr.msrb.gmra.mxu1 %vm1640_vm1, %v5577_v47  ;;  %v5581_v23 = vld [vmem:[#allocation2 + $0xf8] sm:$0xff]  ;;  %v7081_v25 = vpop.f32.mrf.mxu3 }
 0x28c   :  { %1423 = vst.msk [vmem:[#allocation4 + $0xc4] sm:$0xf] %vm756_vm0, %v1376_v49  ;;  %3465 = vmatpush.bf16.msrb.mxu1 %v5617_v40  ;;  %v2655_v40 = vsel %vm2591_vm2, %v7060_v13, -inf }
 0x292   :  { %v1384_v56 = vpop.permute.xlu1 %1383  ;;  %v1382_v34 = vpop.permute.xlu0 %1381 }
 0x293   :  { %1427 = vst.msk [vmem:[#allocation4 + $0xd4] sm:$0xf] %vm756_vm0, %v1384_v56  ;;  %v2649_v56 = vsel %vm2591_vm2, %v7081_v25, -inf }
 0x294   :  { %1426 = vst.msk [vmem:[#allocation4 + $0xd0] sm:$0xf] %vm756_vm0, %v1382_v34  ;;  %v7089_v34 = vpop.f32.mrf.mxu1 }
 0x29a   :  { %v1388_v54 = vpop.permute.xlu0 %1387 }
 0x29b   :  { %1429 = vst.msk [vmem:[#allocation4 + $0xdc] sm:$0xf] %vm756_vm0, %v1388_v54  ;;  %5277 = vmatmul.msk.bf16.vlgmr.msra.gmra.mxu1 %vm1640_vm1, %v5581_v23 }
 0x29c   :  { %3577 = vmatpush.bf16.msra.mxu1 %v5621_v59 }
 0x2bd   :  { %v2594_v43 = vpop.xlane.xlu1 %2593 }
 0x2be   :  { %v2784_v60 = vsub.f32 %v6781_v41, %v2594_v43  ;;  %v2661_v43 = vsel %vm2591_vm2, %v7089_v34, -inf }
 0x2c0   :  { %v2848_v31 = vmul.f32 1.442695, %v2784_v60 }
 0x2c2   :  { %5696 = vpow2.f32 %v2848_v31 }
 0x2c3   :  { %v2597_v63 = vpop.xlane.xlu2 %2596 }
 0x2c4   :  { %v2785_v6 = vsub.f32 %v6794_v50, %v2597_v63 }
 0x2c5   :  { %v2606_v18 = vpop.xlane.xlu0 %2605  ;;  %v2612_v11 = vpop.xlane.xlu1 %2611 }
 0x2c6   :  { %v2850_v58 = vmul.f32 1.442695, %v2785_v6  ;;  %v2788_v60 = vsub.f32 %v6833_v15, %v2606_v18 }
 0x2c8   :  { %5698 = vpow2.f32 %v2850_v58  ;;  %v7051_v10 = vpop.eup %5696 }
 0x2c9   :  { %v2976_v8 = vsel %vm2591_vm2, %v7051_v10, 0.0 }
 0x2ca   :  { %2977 = vadd.xlane.f32.xlu2 %v2976_v8 }
 0x2cb   :  { %v2609_v39 = vpop.xlane.xlu2 %2608 }
 0x2cd   :  { %v2600_v41 = vpop.xlane.xlu0 %2599  ;;  %v2603_v24 = vpop.xlane.xlu1 %2602 }
 0x2ce   :  { %v7055_v14 = vpop.eup %5698  ;;  %v2786_v3 = vsub.f32 %v6810_v46, %v2600_v41  ;;  %v2790_v46 = vsub.f32 %v6863_v37, %v2612_v11  ;;  %v2787_v28 = vsub.f32 %v6822_v52, %v2603_v24  ;;  %v2789_v37 = vsub.f32 %v6847_v27, %v2609_v39  ;;  %v7091_v27 = vpop.f32.mrf.mxu2 }
 0x2cf   :  { %v2979_v50 = vsel %vm2591_vm2, %v7055_v14, 0.0  ;;  %v2703_v52 = vsel %vm2591_vm2, %v7078_v17, -inf  ;;  %v2856_v11 = vmul.f32 1.442695, %v2788_v60 }
 0x2d0   :  { %2980 = vadd.xlane.f32.xlu0 %v2979_v50  ;;  %v2852_v21 = vmul.f32 1.442695, %v2786_v3  ;;  %v2860_v33 = vmul.f32 1.442695, %v2790_v46  ;;  %v2854_v53 = vmul.f32 1.442695, %v2787_v28 }
 0x2d1   :  { %v2858_v49 = vmul.f32 1.442695, %v2789_v37 }
 0x2d2   :  { %5700 = vpow2.f32 %v2852_v21  ;;  %2644 = vmax.xlane.f32.xlu2 %v2643_v20  ;;  %v2658_v20 = vsel %vm2591_vm2, %v7072_v51, -inf }
 0x2d3   :  { %5702 = vpow2.f32 %v2860_v33  ;;  %v2615_v47 = vpop.xlane.xlu2 %2614 }
 0x2d4   :  { %5704 = vpow2.f32 %v2854_v53 }
 0x2d5   :  { %5706 = vpow2.f32 %v2858_v49  ;;  %v2621_v54 = vpop.xlane.xlu0 %2620 }
 0x2d6   :  { %v2793_v31 = vsub.f32 %v6910_v7, %v2621_v54  ;;  %v7108_v50 = vpop.f32.mrf.mxu2  ;;  %5708 = vpow2.f32 %v2856_v11  ;;  %v2791_v7 = vsub.f32 %v6878_v2, %v2615_v47  ;;  %v2664_v2 = vsel %vm2591_vm2, %v7091_v27, -inf  ;;  %v7144_v54 = vpop.f32.mrf.mxu1 }
 0x2d7   :  { %v2667_v21 = vsel %vm2591_vm2, %v7108_v50, -inf }
 0x2d8   :  { %2653 = vmax.xlane.f32.xlu0 %v2652_v22  ;;  %v7069_v19 = vpop.eup %5700  ;;  %v2866_v41 = vmul.f32 1.442695, %v2793_v31  ;;  %v2862_v24 = vmul.f32 1.442695, %v2791_v7 }
 0x2d9   :  { %v2982_v62 = vsel %vm2591_vm2, %v7069_v19, 0.0  ;;  %v7093_v23 = vpop.eup %5702 }
 0x2da   :  { %2701 = vmax.xlane.f32.xlu2 %v2700_v32  ;;  %2983 = vadd.xlane.f32.xlu1 %v2982_v62  ;;  %v7095_v59 = vpop.eup %5704  ;;  %v2994_v63 = vsel %vm2591_vm2, %v7093_v23, 0.0  ;;  %5710 = vpow2.f32 %v2866_v41 }
 0x2db   :  { %v2985_v6 = vsel %vm2591_vm2, %v7095_v59, 0.0  ;;  %v2618_v58 = vpop.xlane.xlu2 %2617  ;;  %v7105_v8 = vpop.eup %5706 }
 0x2dc   :  { %v2792_v3 = vsub.f32 %v6893_v1, %v2618_v58  ;;  %v2991_v15 = vsel %vm2591_vm2, %v7105_v8, 0.0  ;;  %v7117_v1 = vpop.f32.mrf.mxu3  ;;  %v7119_v39 = vpop.eup %5708 }
 0x2dd   :  { %v2988_v28 = vsel %vm2591_vm2, %v7119_v39, 0.0 }
 0x2de   :  { %v2864_v18 = vmul.f32 1.442695, %v2792_v3 }
 0x2e0   :  { %2704 = vmax.xlane.f32.xlu0 %v2703_v52  ;;  %5712 = vpow2.f32 %v2864_v18  ;;  %v7121_v22 = vpop.eup %5710  ;;  %v7137_v52 = vpop.f32.mrf.mxu2 }
 0x2e1   :  { %5714 = vpow2.f32 %v2862_v24  ;;  %v3003_v46 = vsel %vm2591_vm2, %v7121_v22, 0.0  ;;  %v2688_v60 = vsel %vm2591_vm2, %v7137_v52, -inf }
 0x2e2   :  { %2656 = vmax.xlane.f32.xlu1 %v2655_v40  ;;  %2650 = vmax.xlane.f32.xlu2 %v2649_v56 }
 0x2e3   :  { %v2624_v62 = vpop.xlane.xlu2 %2623 }
 0x2e4   :  { %v7133_v53 = vpop.f32.mrf.mxu3  ;;  %v2794_v47 = vsub.f32 %v6924_v29, %v2624_v62  ;;  %v2676_v29 = vsel %vm2591_vm2, %v7144_v54, -inf }
 0x2e5   :  { %v2673_v40 = vsel %vm2591_vm2, %v7133_v53, -inf }
 0x2e6   :  { %v7129_v32 = vpop.eup %5712  ;;  %v2868_v56 = vmul.f32 1.442695, %v2794_v47 }
 0x2e7   :  { %v7131_v33 = vpop.eup %5714  ;;  %v3000_v37 = vsel %vm2591_vm2, %v7129_v32, 0.0 }
 0x2e8   :  { %2662 = vmax.xlane.f32.xlu0 %v2661_v43  ;;  %v2997_v49 = vsel %vm2591_vm2, %v7131_v33, 0.0  ;;  %v2670_v43 = vsel %vm2591_vm2, %v7117_v1, -inf  ;;  %5716 = vpow2.f32 %v2868_v56  ;;  %v7152_v31 = vpop.f32.mrf.mxu2  ;;  %v2630_v56 = vpop.xlane.xlu1 %2629 }
 0x2e9   :  { %v2691_v11 = vsel %vm2591_vm2, %v7152_v31, -inf }
 0x2ea   :  { %2995 = vadd.xlane.f32.xlu1 %v2994_v63  ;;  %2986 = vadd.xlane.f32.xlu2 %v2985_v6  ;;  %v7154_v63 = vpop.f32.mrf.mxu0 }
 0x2eb   :  { %v2724_v24 = vsel %vm2591_vm2, %v7154_v63, -inf }
 0x2ec   :  { %v7158_v58 = vpop.f32.mrf.mxu3 }
 0x2ed   :  { %v2694_v3 = vsel %vm2591_vm2, %v7158_v58, -inf }
 0x2ee   :  { %v7156_v6 = vpop.eup %5716 }
 0x2ef   :  { %v3006_v41 = vsel %vm2591_vm2, %v7156_v6, 0.0 }
 0x2f0   :  { %2992 = vadd.xlane.f32.xlu0 %v2991_v15  ;;  %v2627_v15 = vpop.xlane.xlu0 %2626  ;;  %v7166_v7 = vpop.f32.mrf.mxu2 }
 0x2f1   :  { %v2795_v18 = vsub.f32 %v6936_v30, %v2627_v15 }
 0x2f2   :  { %2668 = vmax.xlane.f32.xlu1 %v2667_v21  ;;  %2659 = vmax.xlane.f32.xlu2 %v2658_v20  ;;  %v7169_v21 = vpop.f32.mrf.mxu1  ;;  %v7171_v20 = vpop.f32.mrf.mxu0 }
 0x2f4   :  { %v7179_v62 = vpop.f32.mrf.mxu3 }
 0x2f8   :  { %2665 = vmax.xlane.f32.xlu0 %v2664_v2  ;;  %v2870_v2 = vmul.f32 1.442695, %v2795_v18  ;;  %v7181_v30 = vpop.f32.mrf.mxu2 }
 0x2fa   :  { %3004 = vadd.xlane.f32.xlu1 %v3003_v46  ;;  %2989 = vadd.xlane.f32.xlu2 %v2988_v28  ;;  %v2679_v46 = vsel %vm2591_vm2, %v7169_v21, -inf  ;;  %v2727_v28 = vsel %vm2591_vm2, %v7171_v20, -inf  ;;  %5718 = vpow2.f32 %v2870_v2  ;;  %v7185_v47 = vpop.f32.mrf.mxu1 }
 0x300   :  { %3001 = vadd.xlane.f32.xlu0 %v3000_v37  ;;  %v2712_v37 = vsel %vm2591_vm2, %v7166_v7, -inf  ;;  %v7206_v2 = vpop.f32.mrf.mxu2 }
 0x302   :  { %2998 = vadd.xlane.f32.xlu2 %v2997_v49  ;;  %2674 = vmax.xlane.f32.xlu1 %v2673_v40  ;;  %v2715_v49 = vsel %vm2591_vm2, %v7181_v30, -inf  ;;  %v2697_v40 = vsel %vm2591_vm2, %v7179_v62, -inf }
 0x308   :  { %2671 = vmax.xlane.f32.xlu0 %v2670_v43  ;;  %v7191_v43 = vpop.eup %5718  ;;  %v7222_v0 = vpop.f32.mrf.mxu2 }
 0x309   :  { %7952 = vst [vmem:[#allocation33_spill] sm:$0xff] %v7222_v0 }
 0x30a   :  { %2689 = vmax.xlane.f32.xlu2 %v2688_v60  ;;  %2677 = vmax.xlane.f32.xlu1 %v2676_v29  ;;  %v7193_v60 = vpop.f32.mrf.mxu0  ;;  %v2796_v29 = vsub.f32 %v6943_v38, %v2630_v56  ;;  %v2636_v38 = vpop.xlane.xlu0 %2635 }
 0x30b   :  { %v2748_v15 = vsel %vm2591_vm2, %v7193_v60, -inf  ;;  %v2639_v56 = vpop.xlane.xlu1 %2638 }
 0x310   :  { %2692 = vmax.xlane.f32.xlu0 %v2691_v11  ;;  %v7196_v11 = vpop.f32.mrf.mxu3 }
 0x311   :  { %v2718_v18 = vsel %vm2591_vm2, %v7196_v11, -inf }
 0x312   :  { %3007 = vadd.xlane.f32.xlu2 %v3006_v41  ;;  %2695 = vmax.xlane.f32.xlu1 %v2694_v3  ;;  %v3009_v41 = vsel %vm2591_vm2, %v7191_v43, 0.0  ;;  %v2872_v3 = vmul.f32 1.442695, %v2796_v29  ;;  %v2736_v29 = vsel %vm2591_vm2, %v7206_v2, -inf }
 0x314   :  { %5720 = vpow2.f32 %v2872_v3 }
 0x318   :  { %2725 = vmax.xlane.f32.xlu0 %v2724_v24  ;;  %v7204_v24 = vpop.f32.mrf.mxu1 }
 0x31a   :  { %2680 = vmax.xlane.f32.xlu2 %v2679_v46  ;;  %2728 = vmax.xlane.f32.xlu1 %v2727_v28  ;;  %v2633_v46 = vpop.xlane.xlu2 %2632  ;;  %v7208_v28 = vpop.f32.mrf.mxu0 }
 0x31b   :  { %v7218_v3 = vpop.eup %5720 }
 0x320   :  { %2713 = vmax.xlane.f32.xlu0 %v2712_v37  ;;  %v2682_v37 = vsel %vm2591_vm2, %v7185_v47, -inf }
 0x322   :  { %2716 = vmax.xlane.f32.xlu1 %v2715_v49  ;;  %2698 = vmax.xlane.f32.xlu2 %v2697_v40  ;;  %v2798_v49 = vsub.f32 %v6961_v57, %v2636_v38  ;;  %v2797_v40 = vsub.f32 %v6951_v48, %v2633_v46  ;;  %v3012_v48 = vsel %vm2591_vm2, %v7218_v3, 0.0  ;;  %v2685_v57 = vsel %vm2591_vm2, %v7204_v24, -inf  ;;  %v7230_v46 = vpop.f32.mrf.mxu3 }
 0x323   :  { %v2739_v38 = vsel %vm2591_vm2, %v7222_v0, -inf }
 0x324   :  { %v2874_v42 = vmul.f32 1.442695, %v2797_v40  ;;  %v2799_v40 = vsub.f32 %v6979_v12, %v2639_v56 }
 0x328   :  { %3010 = vadd.xlane.f32.xlu0 %v3009_v41  ;;  %v2751_v41 = vsel %vm2591_vm2, %v7208_v28, -inf }
 0x32a   :  { %2749 = vmax.xlane.f32.xlu1 %v2748_v15  ;;  %2719 = vmax.xlane.f32.xlu2 %v2718_v18  ;;  %v2876_v15 = vmul.f32 1.442695, %v2798_v49  ;;  %v7220_v18 = vpop.f32.mrf.mxu1  ;;  %v7245_v12 = vpop.f32.mrf.mxu3 }
 0x32b   :  { %7951 = vst [vmem:[#allocation32_spill] sm:$0xff] %v7220_v18 }
 0x32c   :  { %5722 = vpow2.f32 %v2876_v15  ;;  %7955 = vst [vmem:[#allocation36_spill] sm:$0xff] %v7245_v12 }
 0x32d   :  { %5724 = vpow2.f32 %v2874_v42  ;;  %v2721_v42 = vsel %vm2591_vm2, %v7230_v46, -inf }
 0x330   :  { %2683 = vmax.xlane.f32.xlu0 %v2682_v37  ;;  %v2642_v37 = vpop.xlane.xlu1 %2641 }
 0x332   :  { %2737 = vmax.xlane.f32.xlu1 %v2736_v29  ;;  %2752 = vmax.xlane.f32.xlu2 %v2751_v41  ;;  %v7232_v49 = vpop.eup %5722  ;;  %v7237_v15 = vpop.f32.mrf.mxu1 }
 0x333   :  { %7953 = vst [vmem:[#allocation34_spill] sm:$0xff] %v7232_v49  ;;  %v7235_v41 = vpop.eup %5724  ;;  %v7268_v0 = vpop.f32.mrf.mxu3 }
 0x334   :  { %7954 = vst [vmem:[#allocation35_spill] sm:$0xff] %v7235_v41 }
 0x338   :  { %3013 = vadd.xlane.f32.xlu0 %v3012_v48  ;;  %v2878_v48 = vmul.f32 1.442695, %v2799_v40  ;;  %v2742_v40 = vsel %vm2591_vm2, %v7245_v12, -inf }
 0x33a   :  { %2686 = vmax.xlane.f32.xlu1 %v2685_v57  ;;  %2740 = vmax.xlane.f32.xlu2 %v2739_v38  ;;  %v3015_v57 = vsel %vm2591_vm2, %v7235_v41, 0.0  ;;  %v3018_v38 = vsel %vm2591_vm2, %v7232_v49, 0.0  ;;  %v7252_v5 = vpop.f32.mrf.mxu1 }
 0x33d   :  { %v2978_v29 = vpop.xlane.xlu2 %2977 }
 0x33e   :  { %5726 = vrcp.f32 %v2978_v29  ;;  %v7247_v29 = vpop.xlane.xlu1 %2647 }
 0x340   :  { %2722 = vmax.xlane.f32.xlu0 %v2721_v42 }
 0x342   :  { %3016 = vadd.xlane.f32.xlu1 %v3015_v57  ;;  %3019 = vadd.xlane.f32.xlu2 %v3018_v38  ;;  %v2800_v57 = vsub.f32 %v6993_v55, %v2642_v37  ;;  %v7255_v38 = vpop.f32.mrf.mxu2 }
 0x343   :  { %v2981_v35 = vpop.xlane.xlu0 %2980 }
 0x344   :  { %5728 = vrcp.f32 %v2981_v35  ;;  %v5727_v56 = vpop.eup %5726  ;;  %v2706_v35 = vsel %vm2591_vm2, %v7220_v18, -inf  ;;  %v2880_v49 = vmul.f32 1.442695, %v2800_v57  ;;  %v2730_v57 = vsel %vm2591_vm2, %v7252_v5, -inf }
 0x345   :  { %5730 = vpow2.f32 %v2878_v48  ;;  %v2645_v61 = vpop.xlane.xlu2 %2644  ;;  %v3232_v42 = vmul.f32 %v5727_v56, %v7051_v10  ;;  %v2709_v48 = vsel %vm2591_vm2, %v7237_v15, -inf }
 0x346   :  { %5732 = vpow2.f32 %v2880_v49 }
 0x347   :  { %v3296_v9 = vpack.c.bf16 %v3232_v42, %v3232_v42 }
 0x348   :  { %2743 = vmax.xlane.f32.xlu0 %v2742_v40 }
 0x349   :  { %v3362_v37 = vunpack.c.l.b16 %v3296_v9 }
 0x34a   :  { %v5729_v36 = vpop.eup %5728  ;;  %2707 = vmax.xlane.f32.xlu1 %v2706_v35  ;;  %2710 = vmax.xlane.f32.xlu2 %v2709_v48  ;;  %v5622_v35 = vld [vmem:[#allocation4 + $0x40] sm:$0xff]  ;;  %v7274_v48 = vpop.f32.mrf.mxu1 }
 0x34b   :  { %v3233_v10 = vmul.f32 %v5729_v36, %v7055_v14  ;;  %v2654_v56 = vpop.xlane.xlu0 %2653  ;;  %v7262_v40 = vpop.eup %5730  ;;  %v2801_v36 = vsub.f32 %v7010_v45, %v2645_v61 }
 0x34c   :  { %v3021_v18 = vsel %vm2591_vm2, %v7262_v40, 0.0  ;;  %v2804_v14 = vsub.f32 %v7049_v4, %v2654_v56 }
 0x34d   :  { %v3297_v26 = vpack.c.bf16 %v3233_v10, %v3233_v10  ;;  %v7264_v41 = vpop.xlane.xlu2 %2701  ;;  %v2984_v55 = vpop.xlane.xlu1 %2983  ;;  %v2882_v61 = vmul.f32 1.442695, %v2801_v36 }
 0x34e   :  { %v2888_v45 = vmul.f32 1.442695, %v2804_v14  ;;  %v7283_v10 = vpop.eup %5732 }
 0x34f   :  { %v3363_v12 = vunpack.c.l.b16 %v3297_v26  ;;  %v2745_v26 = vsel %vm2591_vm2, %v7268_v0, -inf  ;;  %7956 = vst [vmem:[#allocation37_spill] sm:$0xff] %v7283_v10  ;;  %5734 = vpow2.f32 %v2882_v61  ;;  %v3024_v36 = vsel %vm2591_vm2, %v7283_v10, 0.0 }
 0x350   :  { %3022 = vadd.xlane.f32.xlu0 %v3021_v18  ;;  %v7279_v18 = vpop.f32.mrf.mxu2  ;;  %5736 = vpow2.f32 %v2888_v45 }
 0x351   :  { %v3364_v42 = vpack.c.b16 %v3363_v12, %v3362_v37  ;;  %v2763_v12 = vsel %vm2591_vm2, %v7279_v18, -inf  ;;  %v2760_v37 = vsel %vm2591_vm2, %v7255_v38, -inf  ;;  %5738 = vrcp.f32 %v2984_v55 }
 0x352   :  { %2731 = vmax.xlane.f32.xlu2 %v2730_v57  ;;  %2746 = vmax.xlane.f32.xlu1 %v2745_v26  ;;  %v2733_v55 = vsel %vm2591_vm2, %v7274_v48, -inf }
 0x353   :  { %5282 = vmatmul.msk.bf16.vlgmr.msra.gmra.mxu2 %vm2591_vm2, %v3364_v42  ;;  %v2705_v9 = vpop.xlane.xlu0 %2704 }
 0x354   :  { %3605 = vmatpush.bf16.msra.mxu2 %v5622_v35  ;;  %v7292_v35 = vpop.f32.mrf.mxu1  ;;  %v2821_v10 = vsub.f32 %v7078_v17, %v2705_v9  ;;  %v2820_v17 = vsub.f32 %v7062_v16, %v7264_v41 }
 0x355   :  { %v2657_v4 = vpop.xlane.xlu1 %2656  ;;  %v2651_v49 = vpop.xlane.xlu2 %2650 }
 0x356   :  { %v2805_v56 = vsub.f32 %v7060_v13, %v2657_v4  ;;  %v2802_v13 = vsub.f32 %v7024_v44, %v7247_v29  ;;  %v7296_v61 = vpop.eup %5734  ;;  %v2922_v9 = vmul.f32 1.442695, %v2821_v10  ;;  %v2920_v16 = vmul.f32 1.442695, %v2820_v17 }
 0x357   :  { %7957 = vst [vmem:[#allocation38_spill] sm:$0xff] %v7296_v61  ;;  %v7300_v45 = vpop.eup %5736 }
 0x358   :  { %2764 = vmax.xlane.f32.xlu0 %v2763_v12  ;;  %v2890_v14 = vmul.f32 1.442695, %v2805_v56  ;;  %7958 = vst [vmem:[#allocation39_spill] sm:$0xff] %v7300_v45  ;;  %v5739_v4 = vpop.eup %5738  ;;  %v2884_v12 = vmul.f32 1.442695, %v2802_v13  ;;  %v2803_v56 = vsub.f32 %v7081_v25, %v2651_v49  ;;  %v3036_v29 = vsel %vm2591_vm2, %v7300_v45, 0.0 }
 0x35a   :  { %2761 = vmax.xlane.f32.xlu2 %v2760_v37  ;;  %3025 = vadd.xlane.f32.xlu1 %v3024_v36  ;;  %5740 = vpow2.f32 %v2890_v14  ;;  %v3027_v37 = vsel %vm2591_vm2, %v7296_v61, 0.0  ;;  %v3234_v36 = vmul.f32 %v5739_v4, %v7069_v19 }
 0x35b   :  { %v7288_v42 = vpop.xlane.xlu0 %2662 }
 0x35c   :  { %v7316_v61 = vpop.f32.mrf.mxu1  ;;  %v3298_v45 = vpack.c.bf16 %v3234_v36, %v3234_v36 }
 0x35d   :  { %v2996_v57 = vpop.xlane.xlu1 %2995  ;;  %v2987_v26 = vpop.xlane.xlu2 %2986  ;;  %7959 = vst [vmem:[#allocation40_spill] sm:$0xff] %v7316_v61 }
 0x35e   :  { %5742 = vrcp.f32 %v2987_v26  ;;  %v2886_v26 = vmul.f32 1.442695, %v2803_v56 }
 0x35f   :  { %5744 = vpow2.f32 %v2884_v12 }
 0x360   :  { %2734 = vmax.xlane.f32.xlu0 %v2733_v55  ;;  %v7309_v14 = vpop.eup %5740  ;;  %5746 = vpow2.f32 %v2886_v26 }
 0x361   :  { %v3039_v56 = vsel %vm2591_vm2, %v7309_v14, 0.0 }
 0x362   :  { %3028 = vadd.xlane.f32.xlu2 %v3027_v37  ;;  %3037 = vadd.xlane.f32.xlu1 %v3036_v29  ;;  %v2754_v37 = vsel %vm2591_vm2, %v7292_v35, -inf  ;;  %v2757_v29 = vsel %vm2591_vm2, %v7316_v61, -inf }
 0x363   :  { %v2993_v44 = vpop.xlane.xlu0 %2992 }
 0x364   :  { %v5743_v49 = vpop.eup %5742  ;;  %5748 = vrcp.f32 %v2993_v44  ;;  %v5623_v44 = vld [vmem:[#allocation4 + $0x48] sm:$0xff] }
 0x365   :  { %v7311_v13 = vpop.xlane.xlu1 %2668  ;;  %v2660_v25 = vpop.xlane.xlu2 %2659  ;;  %v3235_v19 = vmul.f32 %v5743_v49, %v7095_v59  ;;  %v3390_v59 = vunpack.c.l.b16 %v3298_v45  ;;  %5750 = vpow2.f32 %v2922_v9 }
 0x366   :  { %v2806_v55 = vsub.f32 %v7072_v51, %v2660_v25  ;;  %v7327_v36 = vpop.eup %5744  ;;  %v7329_v49 = vpop.f32.mrf.mxu0 }
 0x367   :  { %v3299_v4 = vpack.c.bf16 %v3235_v19, %v3235_v19  ;;  %v2807_v19 = vsub.f32 %v7089_v34, %v7288_v42  ;;  %v2772_v17 = vsel %vm2591_vm2, %v7329_v49, -inf }
 0x368   :  { %2755 = vmax.xlane.f32.xlu0 %v2754_v37  ;;  %v2892_v12 = vmul.f32 1.442695, %v2806_v55  ;;  %v3030_v55 = vsel %vm2591_vm2, %v7327_v36, 0.0  ;;  %v7333_v37 = vpop.eup %5746 }
 0x369   :  { %v3391_v25 = vunpack.c.l.b16 %v3299_v4 }
 0x36a   :  { %3040 = vadd.xlane.f32.xlu2 %v3039_v56  ;;  %2758 = vmax.xlane.f32.xlu1 %v2757_v29  ;;  %5752 = vpow2.f32 %v2892_v12  ;;  %v5749_v45 = vpop.eup %5748 }
 0x36b   :  { %v7323_v51 = vpop.xlane.xlu0 %2665  ;;  %v3392_v41 = vpack.c.b16 %v3391_v25, %v3390_v59  ;;  %v7340_v9 = vpop.eup %5750  ;;  %v3237_v56 = vmul.f32 %v5749_v45, %v7105_v8  ;;  %v2894_v25 = vmul.f32 1.442695, %v2807_v19 }
 0x36c   :  { %v7357_v19 = vpop.f32.mrf.mxu3 }
 0x36d   :  { %v3005_v10 = vpop.xlane.xlu1 %3004  ;;  %v2990_v26 = vpop.xlane.xlu2 %2989  ;;  %5287 = vmatmul.msk.bf16.vlgmr.msrb.gmra.mxu3 %vm2591_vm2, %v3392_v41 }
 0x36e   :  { %5754 = vrcp.f32 %v3005_v10  ;;  %3633 = vmatpush.bf16.msrb.mxu3 %v5623_v44  ;;  %v3301_v44 = vpack.c.bf16 %v3237_v56, %v3237_v56 }
 0x36f   :  { %5756 = vrcp.f32 %v2996_v57  ;;  %v3033_v57 = vsel %vm2591_vm2, %v7333_v37, 0.0 }
 0x370   :  { %3031 = vadd.xlane.f32.xlu0 %v3030_v55  ;;  %5758 = vrcp.f32 %v2990_v26  ;;  %v7344_v12 = vpop.eup %5752  ;;  %v2808_v55 = vsub.f32 %v7091_v27, %v7323_v51  ;;  %v3419_v27 = vunpack.c.l.b16 %v3301_v44 }
 0x371   :  { %5760 = vpow2.f32 %v2920_v16  ;;  %7960 = vst [vmem:[#allocation41_spill] sm:$0xff] %v7344_v12  ;;  %v3042_v10 = vsel %vm2591_vm2, %v7344_v12, 0.0 }
 0x372   :  { %2773 = vmax.xlane.f32.xlu2 %v2772_v17  ;;  %3034 = vadd.xlane.f32.xlu1 %v3033_v57 }
 0x373   :  { %v3002_v4 = vpop.xlane.xlu0 %3001 }
 0x374   :  { %5762 = vrcp.f32 %v3002_v4  ;;  %v5755_v29 = vpop.eup %5754  ;;  %v3087_v4 = vsel %vm2591_vm2, %v7340_v9, 0.0 }
 0x375   :  { %v5757_v59 = vpop.eup %5756  ;;  %v2999_v34 = vpop.xlane.xlu2 %2998  ;;  %v3241_v41 = vmul.f32 %v5755_v29, %v7121_v22 }
 0x376   :  { %v7347_v42 = vpop.xlane.xlu1 %2674  ;;  %v5759_v16 = vpop.eup %5758  ;;  %5764 = vrcp.f32 %v2999_v34  ;;  %v3238_v17 = vmul.f32 %v5757_v59, %v7093_v23  ;;  %v2896_v59 = vmul.f32 1.442695, %v2808_v55 }
 0x377   :  { %v7352_v26 = vpop.eup %5760  ;;  %v3236_v8 = vmul.f32 %v5759_v16, %v7119_v39  ;;  %5766 = vpow2.f32 %v2894_v25  ;;  %v3305_v57 = vpack.c.bf16 %v3241_v41, %v3241_v41  ;;  %v7365_v34 = vpop.f32.mrf.mxu0 }
 0x378   :  { %7961 = vst [vmem:[#allocation42_spill] sm:$0xff] %v7352_v26  ;;  %3043 = vadd.xlane.f32.xlu0 %v3042_v10  ;;  %v3084_v39 = vsel %vm2591_vm2, %v7352_v26, 0.0  ;;  %v3302_v10 = vpack.c.bf16 %v3238_v17, %v3238_v17  ;;  %v5624_v26 = vld [vmem:[#allocation4 + $0x50] sm:$0xff]  ;;  %v2775_v44 = vsel %vm2591_vm2, %v7365_v34, -inf  ;;  %5768 = vpow2.f32 %v2896_v59 }
 0x379   :  { %v3300_v22 = vpack.c.bf16 %v3236_v8, %v3236_v8  ;;  %v3475_v61 = vunpack.c.l.b16 %v3305_v57  ;;  %v5626_v57 = vld [vmem:[#allocation4 + $0x60] sm:$0xff] }
 0x37a   :  { %v5763_v45 = vpop.eup %5762  ;;  %3088 = vadd.xlane.f32.xlu2 %v3087_v4  ;;  %3085 = vadd.xlane.f32.xlu1 %v3084_v39  ;;  %v3446_v17 = vunpack.c.l.b16 %v3302_v10 }
 0x37b   :  { %v3240_v29 = vmul.f32 %v5763_v45, %v7129_v32  ;;  %v2672_v56 = vpop.xlane.xlu0 %2671  ;;  %v3418_v51 = vunpack.c.l.b16 %v3300_v22 }
 0x37c   :  { %v2810_v25 = vsub.f32 %v7117_v1, %v2672_v56  ;;  %v5765_v23 = vpop.eup %5764  ;;  %v2766_v56 = vsel %vm2591_vm2, %v7357_v19, -inf }
 0x37d   :  { %v3304_v16 = vpack.c.bf16 %v3240_v29, %v3240_v29  ;;  %v3420_v8 = vpack.c.b16 %v3419_v27, %v3418_v51  ;;  %v3239_v41 = vmul.f32 %v5765_v23, %v7131_v33  ;;  %v2690_v45 = vpop.xlane.xlu2 %2689  ;;  %v7373_v22 = vpop.eup %5766 }
 0x37e   :  { %v2900_v32 = vmul.f32 1.442695, %v2810_v25  ;;  %v7369_v4 = vpop.xlane.xlu1 %2677  ;;  %v7376_v33 = vpop.f32.mrf.mxu1  ;;  %v3045_v27 = vsel %vm2591_vm2, %v7373_v22, 0.0  ;;  %v2809_v25 = vsub.f32 %v7108_v50, %v7311_v13 }
 0x37f   :  { %v3474_v12 = vunpack.c.l.b16 %v3304_v16  ;;  %v3303_v1 = vpack.c.bf16 %v3239_v41, %v3239_v41  ;;  %5292 = vmatmul.msk.bf16.vlgmr.msrb.gmra.mxu0 %vm2591_vm2, %v3420_v8  ;;  %v7383_v51 = vpop.f32.mrf.mxu3  ;;  %v7389_v10 = vpop.eup %5768 }
 0x380   :  { %2776 = vmax.xlane.f32.xlu0 %v2775_v44  ;;  %3661 = vmatpush.bf16.msrb.mxu0 %v5624_v26  ;;  %5770 = vpow2.f32 %v2900_v32  ;;  %v5625_v26 = vld [vmem:[#allocation4 + $0x58] sm:$0xff]  ;;  %v2769_v8 = vsel %vm2591_vm2, %v7383_v51, -inf  ;;  %v2898_v32 = vmul.f32 1.442695, %v2809_v25  ;;  %v3048_v50 = vsel %vm2591_vm2, %v7389_v10, 0.0 }
 0x381   :  { %v3476_v55 = vpack.c.b16 %v3475_v61, %v3474_v12  ;;  %v3447_v29 = vunpack.c.l.b16 %v3303_v1 }
 0x382   :  { %2767 = vmax.xlane.f32.xlu2 %v2766_v56  ;;  %3046 = vadd.xlane.f32.xlu1 %v3045_v27  ;;  %v2812_v27 = vsub.f32 %v7144_v54, %v7369_v4 }
 0x383   :  { %5302 = vmatmul.msk.bf16.vlgmr.msrb.gmra.mxu2 %vm2591_vm2, %v3476_v55  ;;  %v2693_v39 = vpop.xlane.xlu0 %2692  ;;  %v3448_v61 = vpack.c.b16 %v3447_v29, %v3446_v17  ;;  %v2816_v29 = vsub.f32 %v7137_v52, %v2690_v45  ;;  %v2778_v52 = vsel %vm2591_vm2, %v7376_v33, -inf }
 0x384   :  { %3717 = vmatpush.bf16.msrb.mxu2 %v5626_v57  ;;  %v2817_v12 = vsub.f32 %v7152_v31, %v2693_v39  ;;  %v2811_v31 = vsub.f32 %v7133_v53, %v7347_v42  ;;  %v2904_v25 = vmul.f32 1.442695, %v2812_v27 }
 0x385   :  { %5297 = vmatmul.msk.bf16.vlgmr.msrb.gmra.mxu1 %vm2591_vm2, %v3448_v61  ;;  %v3008_v59 = vpop.xlane.xlu2 %3007  ;;  %v2912_v61 = vmul.f32 1.442695, %v2816_v29 }
 0x386   :  { %v2914_v23 = vmul.f32 1.442695, %v2817_v12  ;;  %v2696_v16 = vpop.xlane.xlu1 %2695  ;;  %3689 = vmatpush.bf16.msrb.mxu1 %v5625_v26  ;;  %v7393_v41 = vpop.eup %5770  ;;  %v2902_v17 = vmul.f32 1.442695, %v2811_v31 }
 0x387   :  { %v3054_v44 = vsel %vm2591_vm2, %v7393_v41, 0.0  ;;  %v7401_v1 = vpop.f32.mrf.mxu1 }
 0x388   :  { %2770 = vmax.xlane.f32.xlu0 %v2769_v8  ;;  %5772 = vpow2.f32 %v2914_v23  ;;  %v2781_v56 = vsel %vm2591_vm2, %v7401_v1, -inf }
 0x389   :  { %5774 = vpow2.f32 %v2898_v32 }
 0x38a   :  { %3049 = vadd.xlane.f32.xlu2 %v3048_v50  ;;  %3055 = vadd.xlane.f32.xlu1 %v3054_v44  ;;  %5776 = vpow2.f32 %v2902_v17 }
 0x38b   :  { %v2726_v13 = vpop.xlane.xlu0 %2725 }
 0x38c   :  { %v2828_v55 = vsub.f32 %v7154_v63, %v2726_v13  ;;  %v2818_v63 = vsub.f32 %v7158_v58, %v2696_v16 }
 0x38d   :  { %v2681_v42 = vpop.xlane.xlu2 %2680 }
 0x38e   :  { %v2936_v53 = vmul.f32 1.442695, %v2828_v55  ;;  %v2729_v57 = vpop.xlane.xlu1 %2728  ;;  %v7407_v39 = vpop.eup %5772  ;;  %v2916_v23 = vmul.f32 1.442695, %v2818_v63 }
 0x38f   :  { %v3075_v12 = vsel %vm2591_vm2, %v7407_v39, 0.0  ;;  %v7416_v26 = vpop.eup %5774  ;;  %v2829_v32 = vsub.f32 %v7171_v20, %v2729_v57  ;;  %v2813_v20 = vsub.f32 %v7169_v21, %v2681_v42 }
 0x390   :  { %2782 = vmax.xlane.f32.xlu0 %v2781_v56  ;;  %5778 = vpow2.f32 %v2936_v53  ;;  %v7419_v58 = vpop.eup %5776  ;;  %v3051_v16 = vsel %vm2591_vm2, %v7416_v26, 0.0 }
 0x391   :  { %5780 = vpow2.f32 %v2912_v61  ;;  %v2938_v29 = vmul.f32 1.442695, %v2829_v32 }
 0x392   :  { %2779 = vmax.xlane.f32.xlu2 %v2778_v52  ;;  %3076 = vadd.xlane.f32.xlu1 %v3075_v12  ;;  %5782 = vrcp.f32 %v3008_v59 }
 0x393   :  { %v2714_v45 = vpop.xlane.xlu0 %2713  ;;  %5784 = vpow2.f32 %v2904_v25 }
 0x394   :  { %v2824_v54 = vsub.f32 %v7166_v7, %v2714_v45  ;;  %5786 = vpow2.f32 %v2916_v23  ;;  %v3057_v7 = vsel %vm2591_vm2, %v7419_v58, 0.0  ;;  %v2906_v45 = vmul.f32 1.442695, %v2813_v20  ;;  %v5627_v20 = vld [vmem:[#allocation4 + $0x68] sm:$0xff] }
 0x395   :  { %v2699_v8 = vpop.xlane.xlu2 %2698 }
 0x396   :  { %v2717_v4 = vpop.xlane.xlu1 %2716  ;;  %v7423_v31 = vpop.eup %5778  ;;  %v2928_v50 = vmul.f32 1.442695, %v2824_v54  ;;  %v2819_v52 = vsub.f32 %v7179_v62, %v2699_v8 }
 0x397   :  { %v2825_v13 = vsub.f32 %v7181_v30, %v2717_v4  ;;  %v3108_v59 = vsel %vm2591_vm2, %v7423_v31, 0.0  ;;  %v7431_v55 = vpop.eup %5780 }
 0x398   :  { %3052 = vadd.xlane.f32.xlu0 %v3051_v16  ;;  %v5783_v17 = vpop.eup %5782  ;;  %v3072_v27 = vsel %vm2591_vm2, %v7431_v55, 0.0  ;;  %v2918_v62 = vmul.f32 1.442695, %v2819_v52 }
 0x399   :  { %v2930_v53 = vmul.f32 1.442695, %v2825_v13  ;;  %v7436_v56 = vpop.eup %5784  ;;  %v3242_v63 = vmul.f32 %v5783_v17, %v7156_v6 }
 0x39a   :  { %3058 = vadd.xlane.f32.xlu2 %v3057_v7  ;;  %3109 = vadd.xlane.f32.xlu1 %v3108_v59  ;;  %v7440_v61 = vpop.eup %5786  ;;  %v3060_v21 = vsel %vm2591_vm2, %v7436_v56, 0.0 }
 0x39b   :  { %v3011_v44 = vpop.xlane.xlu0 %3010  ;;  %v3078_v25 = vsel %vm2591_vm2, %v7440_v61, 0.0  ;;  %v3306_v54 = vpack.c.bf16 %v3242_v63, %v3242_v63 }
 0x39c   :  { %5788 = vrcp.f32 %v3011_v44 }
 0x39d   :  { %5790 = vpow2.f32 %v2928_v50  ;;  %v2720_v30 = vpop.xlane.xlu2 %2719  ;;  %v3502_v59 = vunpack.c.l.b16 %v3306_v54 }
 0x39e   :  { %v7434_v57 = vpop.xlane.xlu1 %2749  ;;  %5792 = vpow2.f32 %v2938_v29  ;;  %v2826_v52 = vsub.f32 %v7196_v11, %v2720_v30 }
 0x39f   :  { %5794 = vpow2.f32 %v2930_v53 }
 0x3a0   :  { %3073 = vadd.xlane.f32.xlu0 %v3072_v27  ;;  %5796 = vpow2.f32 %v2906_v45 }
 0x3a1   :  { %5798 = vpow2.f32 %v2918_v62 }
 0x3a2   :  { %v5789_v42 = vpop.eup %5788  ;;  %3061 = vadd.xlane.f32.xlu2 %v3060_v21  ;;  %3079 = vadd.xlane.f32.xlu1 %v3078_v25 }
 0x3a3   :  { %v2684_v12 = vpop.xlane.xlu0 %2683  ;;  %v7448_v23 = vpop.eup %5790  ;;  %v3243_v6 = vmul.f32 %v5789_v42, %v7191_v43 }
 0x3a4   :  { %v2814_v4 = vsub.f32 %v7185_v47, %v2684_v12  ;;  %v7452_v13 = vpop.eup %5792  ;;  %v3096_v7 = vsel %vm2591_vm2, %v7448_v23, 0.0 }
 0x3a5   :  { %v3307_v8 = vpack.c.bf16 %v3243_v6, %v3243_v6  ;;  %v2753_v50 = vpop.xlane.xlu2 %2752  ;;  %v7456_v44 = vpop.eup %5794  ;;  %v3111_v29 = vsel %vm2591_vm2, %v7452_v13, 0.0 }
 0x3a6   :  { %v2908_v16 = vmul.f32 1.442695, %v2814_v4  ;;  %v2738_v32 = vpop.xlane.xlu1 %2737  ;;  %v3099_v27 = vsel %vm2591_vm2, %v7456_v44, 0.0  ;;  %v7463_v63 = vpop.eup %5796  ;;  %v2932_v4 = vmul.f32 1.442695, %v2826_v52  ;;  %v2837_v62 = vsub.f32 %v7208_v28, %v2753_v50  ;;  %v7963_v52 = vld [vmem:[#allocation36_spill] sm:$0xff] }
 0x3a7   :  { %v3503_v17 = vunpack.c.l.b16 %v3307_v8  ;;  %v2832_v47 = vsub.f32 %v7206_v2, %v2738_v32  ;;  %v7467_v42 = vpop.eup %5798  ;;  %v3063_v25 = vsel %vm2591_vm2, %v7463_v63, 0.0  ;;  %v2836_v32 = vsub.f32 %v7193_v60, %v7434_v57 }
 0x3a8   :  { %3097 = vadd.xlane.f32.xlu0 %v3096_v7  ;;  %5800 = vpow2.f32 %v2908_v16  ;;  %v3081_v11 = vsel %vm2591_vm2, %v7467_v42, 0.0  ;;  %v2954_v7 = vmul.f32 1.442695, %v2837_v62 }
 0x3a9   :  { %v3504_v43 = vpack.c.b16 %v3503_v17, %v3502_v59  ;;  %v2944_v45 = vmul.f32 1.442695, %v2832_v47 }
 0x3aa   :  { %3112 = vadd.xlane.f32.xlu2 %v3111_v29  ;;  %3100 = vadd.xlane.f32.xlu1 %v3099_v27  ;;  %v7962_v29 = vld [vmem:[#allocation33_spill] sm:$0xff] }
 0x3ab   :  { %v3014_v53 = vpop.xlane.xlu0 %3013  ;;  %5307 = vmatmul.msk.bf16.vlgmr.msra.gmra.mxu3 %vm2591_vm2, %v3504_v43 }
 0x3ac   :  { %3745 = vmatpush.bf16.msra.mxu3 %v5627_v20  ;;  %5802 = vrcp.f32 %v3014_v53  ;;  %v2952_v20 = vmul.f32 1.442695, %v2836_v32 }
 0x3ad   :  { %v2741_v2 = vpop.xlane.xlu2 %2740  ;;  %5804 = vpow2.f32 %v2944_v45 }
 0x3ae   :  { %v2687_v21 = vpop.xlane.xlu1 %2686  ;;  %v7472_v54 = vpop.eup %5800 }
 0x3af   :  { %v2815_v12 = vsub.f32 %v7204_v24, %v2687_v21  ;;  %v3066_v24 = vsel %vm2591_vm2, %v7472_v54, 0.0 }
 0x3b0   :  { %3064 = vadd.xlane.f32.xlu0 %v3063_v25 }
 0x3b1   :  { %v2910_v6 = vmul.f32 1.442695, %v2815_v12 }
 0x3b2   :  { %3082 = vadd.xlane.f32.xlu2 %v3081_v11  ;;  %3067 = vadd.xlane.f32.xlu1 %v3066_v24  ;;  %v5803_v16 = vpop.eup %5802 }
 0x3b3   :  { %5806 = vpow2.f32 %v2910_v6  ;;  %v2723_v30 = vpop.xlane.xlu0 %2722  ;;  %v7482_v17 = vpop.eup %5804  ;;  %v3244_v47 = vmul.f32 %v5803_v16, %v7218_v3 }
 0x3b4   :  { %v2827_v8 = vsub.f32 %v7230_v46, %v2723_v30  ;;  %5808 = vpow2.f32 %v2932_v4  ;;  %v2833_v46 = vsub.f32 %v7962_v29, %v2741_v2  ;;  %v3120_v53 = vsel %vm2591_vm2, %v7482_v17, 0.0  ;;  %v7964_v2 = vld [vmem:[#allocation35_spill] sm:$0xff]  ;;  %v7965_v30 = vld [vmem:[#allocation32_spill] sm:$0xff] }
 0x3b5   :  { %v3020_v50 = vpop.xlane.xlu2 %3019  ;;  %v3308_v12 = vpack.c.bf16 %v3244_v47, %v3244_v47 }
 0x3b6   :  { %v2934_v59 = vmul.f32 1.442695, %v2827_v8  ;;  %v3017_v28 = vpop.xlane.xlu1 %3016  ;;  %v2946_v3 = vmul.f32 1.442695, %v2833_v46 }
 0x3b7   :  { %5810 = vrcp.f32 %v3017_v28 }
 0x3b8   :  { %5812 = vpow2.f32 %v2934_v59 }
 0x3b9   :  { %v7484_v43 = vpop.eup %5806  ;;  %5814 = vpow2.f32 %v2954_v7  ;;  %v3530_v7 = vunpack.c.l.b16 %v3308_v12 }
 0x3ba   :  { %v3069_v60 = vsel %vm2591_vm2, %v7484_v43, 0.0  ;;  %v7492_v27 = vpop.eup %5808  ;;  %3121 = vadd.xlane.f32.xlu1 %v3120_v53  ;;  %5816 = vpow2.f32 %v2952_v20  ;;  %v5628_v53 = vld [vmem:[#allocation4 + $0x70] sm:$0xff] }
 0x3bb   :  { %v2744_v57 = vpop.xlane.xlu0 %2743  ;;  %3070 = vadd.xlane.f32.xlu2 %v3069_v60  ;;  %5818 = vrcp.f32 %v3020_v50  ;;  %v3102_v59 = vsel %vm2591_vm2, %v7492_v27, 0.0 }
 0x3bc   :  { %v2834_v45 = vsub.f32 %v7963_v52, %v2744_v57  ;;  %5820 = vpow2.f32 %v2946_v3 }
 0x3bd   :  { %v5811_v21 = vpop.eup %5810  ;;  %v2711_v11 = vpop.xlane.xlu2 %2710 }
 0x3be   :  { %v7495_v25 = vpop.eup %5812  ;;  %v3245_v6 = vmul.f32 %v5811_v21, %v7964_v2  ;;  %v2948_v4 = vmul.f32 1.442695, %v2834_v45  ;;  %v2708_v62 = vpop.xlane.xlu1 %2707  ;;  %v2823_v29 = vsub.f32 %v7237_v15, %v2711_v11  ;;  %v7966_v2 = vld [vmem:[#allocation34_spill] sm:$0xff] }
 0x3bf   :  { %v2822_v24 = vsub.f32 %v7965_v30, %v2708_v62  ;;  %v3105_v8 = vsel %vm2591_vm2, %v7495_v25, 0.0  ;;  %v7501_v16 = vpop.eup %5814 }
 0x3c0   :  { %v3309_v32 = vpack.c.bf16 %v3245_v6, %v3245_v6  ;;  %3106 = vadd.xlane.f32.xlu0 %v3105_v8  ;;  %5822 = vpow2.f32 %v2948_v4  ;;  %v3135_v46 = vsel %vm2591_vm2, %v7501_v16, 0.0  ;;  %v7508_v20 = vpop.eup %5816  ;;  %v2926_v52 = vmul.f32 1.442695, %v2823_v29 }
 0x3c1   :  { %v2924_v47 = vmul.f32 1.442695, %v2822_v24  ;;  %v5819_v57 = vpop.eup %5818  ;;  %v3132_v12 = vsel %vm2591_vm2, %v7508_v20, 0.0 }
 0x3c2   :  { %v3531_v28 = vunpack.c.l.b16 %v3309_v32  ;;  %3136 = vadd.xlane.f32.xlu1 %v3135_v46  ;;  %v7511_v21 = vpop.eup %5820  ;;  %v3246_v6 = vmul.f32 %v5819_v57, %v7966_v2  ;;  %v5629_v2 = vld [vmem:[#allocation4 + $0x78] sm:$0xff] }
 0x3c3   :  { %v3023_v50 = vpop.xlane.xlu0 %3022  ;;  %3103 = vadd.xlane.f32.xlu2 %v3102_v59  ;;  %v3123_v11 = vsel %vm2591_vm2, %v7511_v21, 0.0 }
 0x3c4   :  { %v3532_v60 = vpack.c.b16 %v3531_v28, %v3530_v7  ;;  %5824 = vrcp.f32 %v3023_v50  ;;  %v3310_v7 = vpack.c.bf16 %v3246_v6, %v3246_v6 }
 0x3c5   :  { %5826 = vpow2.f32 %v2924_v47  ;;  %v2732_v45 = vpop.xlane.xlu2 %2731 }
 0x3c6   :  { %5312 = vmatmul.msk.bf16.vlgmr.msra.gmra.mxu0 %vm2591_vm2, %v3532_v60  ;;  %v2747_v15 = vpop.xlane.xlu1 %2746  ;;  %v7515_v3 = vpop.eup %5822  ;;  %5828 = vpow2.f32 %v2926_v52 }
 0x3c7   :  { %3773 = vmatpush.bf16.msra.mxu0 %v5628_v53  ;;  %v2835_v4 = vsub.f32 %v7268_v0, %v2747_v15  ;;  %v3126_v8 = vsel %vm2591_vm2, %v7515_v3, 0.0  ;;  %v3558_v53 = vunpack.c.l.b16 %v3310_v7  ;;  %v2830_v15 = vsub.f32 %v7252_v5, %v2732_v45 }
 0x3c8   :  { %3133 = vadd.xlane.f32.xlu0 %v3132_v12 }
 0x3c9   :  { %v2950_v62 = vmul.f32 1.442695, %v2835_v4 }
 0x3ca   :  { %v5825_v30 = vpop.eup %5824  ;;  %3127 = vadd.xlane.f32.xlu1 %v3126_v8 }
 0x3cb   :  { %v2765_v24 = vpop.xlane.xlu0 %2764  ;;  %3124 = vadd.xlane.f32.xlu2 %v3123_v11  ;;  %v7523_v32 = vpop.eup %5826  ;;  %v3247_v59 = vmul.f32 %v5825_v30, %v7262_v40  ;;  %5830 = vpow2.f32 %v2950_v62  ;;  %v2940_v62 = vmul.f32 1.442695, %v2830_v15  ;;  %v7968_v15 = vld [vmem:[#allocation38_spill] sm:$0xff] }
 0x3cc   :  { %v2841_v0 = vsub.f32 %v7279_v18, %v2765_v24  ;;  %v3090_v60 = vsel %vm2591_vm2, %v7523_v32, 0.0  ;;  %v7530_v57 = vpop.eup %5828 }
 0x3cd   :  { %v3311_v28 = vpack.c.bf16 %v3247_v59, %v3247_v59  ;;  %v2762_v29 = vpop.xlane.xlu2 %2761  ;;  %v3093_v6 = vsel %vm2591_vm2, %v7530_v57, 0.0 }
 0x3ce   :  { %v2962_v47 = vmul.f32 1.442695, %v2841_v0  ;;  %v2840_v50 = vsub.f32 %v7255_v38, %v2762_v29  ;;  %v3026_v46 = vpop.xlane.xlu1 %3025 }
 0x3cf   :  { %v3559_v52 = vunpack.c.l.b16 %v3311_v28  ;;  %5832 = vrcp.f32 %v3026_v46  ;;  %v7967_v28 = vld [vmem:[#allocation37_spill] sm:$0xff] }
 0x3d0   :  { %3091 = vadd.xlane.f32.xlu0 %v3090_v60  ;;  %v2960_v40 = vmul.f32 1.442695, %v2840_v50  ;;  %5834 = vpow2.f32 %v2962_v47 }
 0x3d1   :  { %v7533_v18 = vpop.eup %5830  ;;  %v3560_v12 = vpack.c.b16 %v3559_v52, %v3558_v53 }
 0x3d2   :  { %5836 = vpow2.f32 %v2960_v40  ;;  %v3129_v4 = vsel %vm2591_vm2, %v7533_v18, 0.0  ;;  %3094 = vadd.xlane.f32.xlu1 %v3093_v6 }
 0x3d3   :  { %v2735_v38 = vpop.xlane.xlu0 %2734  ;;  %5317 = vmatmul.msk.bf16.vlgmr.msra.gmra.mxu1 %vm2591_vm2, %v3560_v12  ;;  %3130 = vadd.xlane.f32.xlu2 %v3129_v4 }
 0x3d4   :  { %v2831_v5 = vsub.f32 %v7274_v48, %v2735_v38  ;;  %3801 = vmatpush.bf16.msra.mxu1 %v5629_v2 }
 0x3d5   :  { %v3029_v30 = vpop.xlane.xlu2 %3028  ;;  %v5833_v24 = vpop.eup %5832 }
 0x3d6   :  { %v2942_v45 = vmul.f32 1.442695, %v2831_v5  ;;  %v3383_v11 = vpop.f32.mrf.mxu2  ;;  %5838 = vrcp.f32 %v3029_v30  ;;  %v3038_v7 = vpop.xlane.xlu1 %3037  ;;  %v3248_v48 = vmul.f32 %v5833_v24, %v7967_v28  ;;  %v7969_v30 = vld [vmem:[#allocation39_spill] sm:$0xff] }
 0x3d7   :  { %v4256_v8 = vpack.c.bf16 %v3383_v11, %v3383_v11  ;;  %v7541_v59 = vpop.eup %5834  ;;  %5840 = vpow2.f32 %v2940_v62 }
 0x3d8   :  { %v7543_v0 = vpop.eup %5836  ;;  %5842 = vrcp.f32 %v3038_v7  ;;  %v3147_v50 = vsel %vm2591_vm2, %v7541_v59, 0.0  ;;  %v3312_v52 = vpack.c.bf16 %v3248_v48, %v3248_v48 }
 0x3d9   :  { %4320 = vst.msk [vmem:[#allocation5] sm:$0xf] %vm756_vm0, %v4256_v8  ;;  %5844 = vpow2.f32 %v2942_v45  ;;  %v3144_v47 = vsel %vm2591_vm2, %v7543_v0, 0.0 }
 0x3da   :  { %3145 = vadd.xlane.f32.xlu0 %v3144_v47  ;;  %3148 = vadd.xlane.f32.xlu1 %v3147_v50 }
 0x3db   :  { %v2756_v29 = vpop.xlane.xlu0 %2755 }
 0x3dc   :  { %v2838_v46 = vsub.f32 %v7292_v35, %v2756_v29  ;;  %v5839_v60 = vpop.eup %5838  ;;  %v3586_v35 = vunpack.c.l.b16 %v3312_v52  ;;  %v5630_v29 = vld [vmem:[#allocation4 + $0x80] sm:$0xff] }
 0x3dd   :  { %v7552_v53 = vpop.eup %5840  ;;  %v3249_v40 = vmul.f32 %v5839_v60, %v7968_v15  ;;  %v3041_v38 = vpop.xlane.xlu2 %3040 }
 0x3de   :  { %v2956_v12 = vmul.f32 1.442695, %v2838_v46  ;;  %v3385_v2 = vpop.f32.mrf.mxu2  ;;  %v5843_v6 = vpop.eup %5842  ;;  %5846 = vrcp.f32 %v3041_v38  ;;  %v3114_v8 = vsel %vm2591_vm2, %v7552_v53, 0.0 }
 0x3df   :  { %v4257_v4 = vpack.c.bf16 %v3385_v2, %v3385_v2  ;;  %v7555_v62 = vpop.xlane.xlu1 %2758  ;;  %v7557_v5 = vpop.eup %5844  ;;  %v3313_v45 = vpack.c.bf16 %v3249_v40, %v3249_v40  ;;  %v3252_v24 = vmul.f32 %v5843_v6, %v7969_v30  ;;  %v5632_v30 = vld [vmem:[#allocation4 + $0x90] sm:$0xff] }
 0x3e0   :  { %5848 = vpow2.f32 %v2956_v12  ;;  %v3117_v28 = vsel %vm2591_vm2, %v7557_v5, 0.0 }
 0x3e1   :  { %4321 = vst.msk [vmem:[#allocation5 + $0x4] sm:$0xf] %vm756_vm0, %v4257_v4  ;;  %v3587_v11 = vunpack.c.l.b16 %v3313_v45  ;;  %v3316_v46 = vpack.c.bf16 %v3252_v24, %v3252_v24 }
 0x3e2   :  { %3115 = vadd.xlane.f32.xlu0 %v3114_v8  ;;  %3118 = vadd.xlane.f32.xlu1 %v3117_v28 }
 0x3e3   :  { %v3032_v7 = vpop.xlane.xlu0 %3031  ;;  %v3588_v48 = vpack.c.b16 %v3587_v11, %v3586_v35  ;;  %v3642_v6 = vunpack.c.l.b16 %v3316_v46 }
 0x3e4   :  { %v5847_v47 = vpop.eup %5846  ;;  %5850 = vrcp.f32 %v3032_v7 }
 0x3e5   :  { %v3253_v60 = vmul.f32 %v5847_v47, %v7309_v14  ;;  %v2774_v52 = vpop.xlane.xlu2 %2773  ;;  %5322 = vmatmul.msk.bf16.vlgmr.msra.gmra.mxu2 %vm2591_vm2, %v3588_v48 }
 0x3e6   :  { %v7565_v50 = vpop.eup %5848  ;;  %v2844_v15 = vsub.f32 %v7329_v49, %v2774_v52  ;;  %3829 = vmatpush.bf16.msra.mxu2 %v5630_v29 }
 0x3e7   :  { %v3035_v40 = vpop.xlane.xlu1 %3034  ;;  %v3138_v12 = vsel %vm2591_vm2, %v7565_v50, 0.0  ;;  %v3317_v2 = vpack.c.bf16 %v3253_v60, %v3253_v60 }
 0x3e8   :  { %5852 = vrcp.f32 %v3035_v40  ;;  %3139 = vadd.xlane.f32.xlu2 %v3138_v12  ;;  %v2968_v38 = vmul.f32 1.442695, %v2844_v15 }
 0x3e9   :  { %v3643_v4 = vunpack.c.l.b16 %v3317_v2 }
 0x3ea   :  { %v5851_v45 = vpop.eup %5850  ;;  %5854 = vpow2.f32 %v2968_v38 }
 0x3eb   :  { %v3044_v35 = vpop.xlane.xlu0 %3043  ;;  %v3644_v14 = vpack.c.b16 %v3643_v4, %v3642_v6  ;;  %v3250_v11 = vmul.f32 %v5851_v45, %v7327_v36  ;;  %v5631_v4 = vld [vmem:[#allocation4 + $0x88] sm:$0xff] }
 0x3ed   :  { %v3089_v49 = vpop.xlane.xlu2 %3088  ;;  %5332 = vmatmul.msk.bf16.vlgmr.msrb.gmra.mxu0 %vm2591_vm2, %v3644_v14  ;;  %v3314_v8 = vpack.c.bf16 %v3250_v11, %v3250_v11  ;;  %v7970_v14 = vld [vmem:[#allocation42_spill] sm:$0xff] }
 0x3ee   :  { %v5853_v24 = vpop.eup %5852  ;;  %5856 = vrcp.f32 %v3089_v49  ;;  %3885 = vmatpush.bf16.msrb.mxu0 %v5632_v30  ;;  %v7971_v30 = vld [vmem:[#allocation25_spill] sm:$0xff] }
 0x3ef   :  { %v3251_v7 = vmul.f32 %v5853_v24, %v7333_v37  ;;  %v3086_v28 = vpop.xlane.xlu1 %3085  ;;  %v3614_v46 = vunpack.c.l.b16 %v3314_v8 }
 0x3f0   :  { %5858 = vrcp.f32 %v3086_v28  ;;  %v7575_v48 = vpop.eup %5854  ;;  %v3411_v60 = vpop.f32.mrf.mxu3 }
 0x3f1   :  { %v3315_v47 = vpack.c.bf16 %v3251_v7, %v3251_v7  ;;  %v3156_v29 = vsel %vm2591_vm2, %v7575_v48, 0.0  ;;  %5860 = vrcp.f32 %v3044_v35  ;;  %v4258_v15 = vpack.c.bf16 %v3411_v60, %v3411_v60 }
 0x3f2   :  { %3157 = vadd.xlane.f32.xlu1 %v3156_v29 }
 0x3f3   :  { %v3615_v36 = vunpack.c.l.b16 %v3315_v47  ;;  %v2777_v52 = vpop.xlane.xlu0 %2776  ;;  %4322 = vst.msk [vmem:[#allocation5 + $0x8] sm:$0xf] %vm756_vm0, %v4258_v15  ;;  %v7972_v47 = vld [vmem:[#allocation41_spill] sm:$0xff] }
 0x3f4   :  { %v2845_v40 = vsub.f32 %v7365_v34, %v2777_v52  ;;  %v5857_v37 = vpop.eup %5856 }
 0x3f5   :  { %v3616_v12 = vpack.c.b16 %v3615_v36, %v3614_v46  ;;  %v3269_v38 = vmul.f32 %v5857_v37, %v7340_v9  ;;  %v7582_v45 = vpop.xlane.xlu2 %2767 }
 0x3f6   :  { %v5859_v2 = vpop.eup %5858  ;;  %v2970_v6 = vmul.f32 1.442695, %v2845_v40  ;;  %1391 = vrot.lane.b32.xlu0 %v7971_v30, %s6163_s6 }
 0x3f7   :  { %v3268_v11 = vmul.f32 %v5859_v2, %v7970_v14  ;;  %5327 = vmatmul.msk.bf16.vlgmr.msrb.gmra.mxu3 %vm2591_vm2, %v3616_v12  ;;  %v3047_v35 = vpop.xlane.xlu1 %3046  ;;  %v3333_v34 = vpack.c.bf16 %v3269_v38, %v3269_v38  ;;  %v5861_v24 = vpop.eup %5860 }
 0x3f8   :  { %5862 = vpow2.f32 %v2970_v6  ;;  %3857 = vmatpush.bf16.msrb.mxu3 %v5631_v4  ;;  %v3413_v7 = vpop.f32.mrf.mxu3  ;;  %v3254_v29 = vmul.f32 %v5861_v24, %v7972_v47  ;;  %v7973_v4 = vld [vmem:[#allocation24_spill] sm:$0xff] }
 0x3f9   :  { %v3332_v49 = vpack.c.bf16 %v3268_v11, %v3268_v11  ;;  %5864 = vrcp.f32 %v3047_v35  ;;  %v7588_v9 = vunpack.c.l.b16 %v3333_v34  ;;  %v4259_v46 = vpack.c.bf16 %v3413_v7, %v3413_v7 }
 0x3fa   :  { %v3318_v38 = vpack.c.bf16 %v3254_v29, %v3254_v29 }
 0x3fb   :  { %v7590_v8 = vunpack.c.l.b16 %v3332_v49  ;;  %v7592_v28 = vpop.xlane.xlu0 %2770  ;;  %4323 = vst.msk [vmem:[#allocation5 + $0xc] sm:$0xf] %vm756_vm0, %v4259_v46 }
 0x3fc   :  { %v3439_v60 = vpop.f32.mrf.mxu0  ;;  %v3670_v30 = vunpack.c.l.b16 %v3318_v38 }
 0x3fd   :  { %v3868_v36 = vpack.c.b16 %v7588_v9, %v7590_v8  ;;  %v4260_v15 = vpack.c.bf16 %v3439_v60, %v3439_v60  ;;  %v3050_v40 = vpop.xlane.xlu2 %3049  ;;  %v5633_v60 = vld [vmem:[#allocation4 + $0x98] sm:$0xff] }
 0x3fe   :  { %v7597_v52 = vpop.eup %5862  ;;  %5866 = vrcp.f32 %v3050_v40 }
 0x3ff   :  { %v5865_v37 = vpop.eup %5864  ;;  %v3056_v12 = vpop.xlane.xlu1 %3055  ;;  %v3159_v2 = vsel %vm2591_vm2, %v7597_v52, 0.0  ;;  %4324 = vst.msk [vmem:[#allocation5 + $0x10] sm:$0xf] %vm756_vm0, %v4260_v15 }
 0x400   :  { %v3255_v6 = vmul.f32 %v5865_v37, %v7373_v22  ;;  %3160 = vadd.xlane.f32.xlu1 %v3159_v2  ;;  %1389 = vrot.lane.b32.xlu2 %v7973_v4, %s6163_s6  ;;  %5868 = vrcp.f32 %v3056_v12 }
 0x402   :  { %v3319_v14 = vpack.c.bf16 %v3255_v6, %v3255_v6  ;;  %v3467_v11 = vpop.f32.mrf.mxu1 }
 0x403   :  { %v7606_v35 = vpop.xlane.xlu0 %2782  ;;  %v4262_v24 = vpack.c.bf16 %v3467_v11, %v3467_v11  ;;  %v7974_v11 = vld [vmem:[#allocation40_spill] sm:$0xff] }
 0x404   :  { %v3671_v34 = vunpack.c.l.b16 %v3319_v14  ;;  %v3441_v49 = vpop.f32.mrf.mxu0  ;;  %v5867_v40 = vpop.eup %5866 }
 0x405   :  { %v4261_v47 = vpack.c.bf16 %v3441_v49, %v3441_v49  ;;  %4326 = vst.msk [vmem:[#allocation5 + $0x18] sm:$0xf] %vm756_vm0, %v4262_v24  ;;  %v7609_v29 = vpop.xlane.xlu2 %2779 }
 0x406   :  { %v3672_v7 = vpack.c.b16 %v3671_v34, %v3670_v30  ;;  %v3495_v22 = vpop.f32.mrf.mxu2  ;;  %v5869_v14 = vpop.eup %5868  ;;  %v2839_v30 = vsub.f32 %v7974_v11, %v7555_v62  ;;  %v3256_v34 = vmul.f32 %v5867_v40, %v7389_v10 }
 0x407   :  { %v4264_v46 = vpack.c.bf16 %v3495_v22, %v3495_v22  ;;  %v3077_v15 = vpop.xlane.xlu1 %3076  ;;  %4325 = vst.msk [vmem:[#allocation5 + $0x14] sm:$0xf] %vm756_vm0, %v4261_v47 }
 0x408   :  { %5337 = vmatmul.msk.bf16.vlgmr.msrb.gmra.mxu1 %vm2591_vm2, %v3672_v7  ;;  %v3258_v7 = vmul.f32 %v5869_v14, %v7393_v41  ;;  %v2958_v47 = vmul.f32 1.442695, %v2839_v30  ;;  %v3320_v22 = vpack.c.bf16 %v3256_v34, %v3256_v34 }
 0x409   :  { %4328 = vst.msk [vmem:[#allocation5 + $0x20] sm:$0xf] %vm756_vm0, %v4264_v46  ;;  %3913 = vmatpush.bf16.msrb.mxu1 %v5633_v60 }
 0x40a   :  { %v3469_v37 = vpop.f32.mrf.mxu1  ;;  %v3322_v62 = vpack.c.bf16 %v3258_v7, %v3258_v7 }
 0x40b   :  { %v3053_v2 = vpop.xlane.xlu0 %3052  ;;  %v4263_v38 = vpack.c.bf16 %v3469_v37, %v3469_v37 }
 0x40c   :  { %5870 = vrcp.f32 %v3053_v2  ;;  %v3726_v34 = vunpack.c.l.b16 %v3322_v62 }
 0x40d   :  { %4327 = vst.msk [vmem:[#allocation5 + $0x1c] sm:$0xf] %vm756_vm0, %v4263_v38  ;;  %v3059_v4 = vpop.xlane.xlu2 %3058  ;;  %v2842_v38 = vsub.f32 %v7357_v19, %v7582_v45  ;;  %v2847_v45 = vsub.f32 %v7401_v1, %v7606_v35  ;;  %v7976_v1 = vld [vmem:[#allocation26_spill] sm:$0xff] }
 0x40e   :  { %v3497_v6 = vpop.f32.mrf.mxu2  ;;  %5872 = vrcp.f32 %v3059_v4 }
 0x40f   :  { %v4265_v24 = vpack.c.bf16 %v3497_v6, %v3497_v6  ;;  %v7618_v12 = vpop.xlane.xlu1 %3109  ;;  %v3698_v6 = vunpack.c.l.b16 %v3320_v22 }
 0x411   :  { %4329 = vst.msk [vmem:[#allocation5 + $0x24] sm:$0xf] %vm756_vm0, %v4265_v24 }
 0x412   :  { %v5871_v49 = vpop.eup %5870 }
 0x413   :  { %v3257_v46 = vmul.f32 %v5871_v49, %v7416_v26  ;;  %v3074_v60 = vpop.xlane.xlu0 %3073  ;;  %v7975_v26 = vld [vmem:[#allocation28_spill] sm:$0xff] }
 0x414   :  { %5874 = vrcp.f32 %v3074_v60  ;;  %v5873_v37 = vpop.eup %5872  ;;  %v5634_v49 = vld [vmem:[#allocation4 + $0xa0] sm:$0xff] }
 0x415   :  { %v3321_v2 = vpack.c.bf16 %v3257_v46, %v3257_v46  ;;  %5876 = vrcp.f32 %v3077_v15  ;;  %v3259_v10 = vmul.f32 %v5873_v37, %v7419_v58  ;;  %v3062_v40 = vpop.xlane.xlu2 %3061  ;;  %v2964_v15 = vmul.f32 1.442695, %v2842_v38  ;;  %v5635_v46 = vld [vmem:[#allocation4 + $0xa8] sm:$0xff] }
 0x416   :  { %5878 = vpow2.f32 %v2958_v47 }
 0x417   :  { %v3699_v4 = vunpack.c.l.b16 %v3321_v2  ;;  %v3080_v41 = vpop.xlane.xlu1 %3079  ;;  %v3323_v14 = vpack.c.bf16 %v3259_v10, %v3259_v10  ;;  %5880 = vrcp.f32 %v3062_v40  ;;  %v2974_v10 = vmul.f32 1.442695, %v2847_v45 }
 0x418   :  { %5882 = vpow2.f32 %v2964_v15 }
 0x419   :  { %v3700_v11 = vpack.c.b16 %v3699_v4, %v3698_v6  ;;  %1397 = vrot.lane.b32.xlu1 %v7975_v26, %s6163_s6  ;;  %v3727_v24 = vunpack.c.l.b16 %v3323_v14  ;;  %5884 = vrcp.f32 %v3080_v41 }
 0x41a   :  { %v5875_v30 = vpop.eup %5874 }
 0x41b   :  { %5342 = vmatmul.msk.bf16.vlgmr.msrb.gmra.mxu2 %vm2591_vm2, %v3700_v11  ;;  %v3098_v58 = vpop.xlane.xlu0 %3097  ;;  %v5877_v7 = vpop.eup %5876  ;;  %v3728_v47 = vpack.c.b16 %v3727_v24, %v3726_v34  ;;  %v3264_v22 = vmul.f32 %v5875_v30, %v7431_v55 }
 0x41c   :  { %3941 = vmatpush.bf16.msrb.mxu2 %v5634_v49  ;;  %v7629_v19 = vpop.eup %5878  ;;  %v3265_v37 = vmul.f32 %v5877_v7, %v7407_v39  ;;  %v7977_v49 = vld [vmem:[#allocation27_spill] sm:$0xff]  ;;  %v5638_v7 = vld [vmem:[#allocation4 + $0xc0] sm:$0xff] }
 0x41d   :  { %5347 = vmatmul.msk.bf16.vlgmr.msra.gmra.mxu3 %vm2591_vm2, %v3728_v47  ;;  %v7635_v60 = vpop.xlane.xlu2 %3112  ;;  %v3141_v62 = vsel %vm2591_vm2, %v7629_v19, 0.0  ;;  %v3328_v38 = vpack.c.bf16 %v3264_v22, %v3264_v22  ;;  %v5881_v40 = vpop.eup %5880 }
 0x41e   :  { %3969 = vmatpush.bf16.msra.mxu3 %v5635_v46  ;;  %v3329_v55 = vpack.c.bf16 %v3265_v37, %v3265_v37  ;;  %v7642_v6 = vpop.eup %5882  ;;  %v3260_v26 = vmul.f32 %v5881_v40, %v7436_v56 }
 0x41f   :  { %v3101_v2 = vpop.xlane.xlu1 %3100  ;;  %v3810_v39 = vunpack.c.l.b16 %v3328_v38  ;;  %v5885_v14 = vpop.eup %5884  ;;  %v3150_v30 = vsel %vm2591_vm2, %v7642_v6, 0.0 }
 0x420   :  { %3142 = vadd.xlane.f32.xlu0 %v3141_v62  ;;  %5886 = vrcp.f32 %v3101_v2  ;;  %v3811_v11 = vunpack.c.l.b16 %v3329_v55  ;;  %v3324_v45 = vpack.c.bf16 %v3260_v26, %v3260_v26 }
 0x421   :  { %1393 = vrot.lane.b32.xlu1 %v7976_v1, %s6163_s6 }
 0x422   :  { %v3812_v24 = vpack.c.b16 %v3811_v11, %v3810_v39 }
 0x423   :  { %v3065_v35 = vpop.xlane.xlu0 %3064 }
 0x424   :  { %5888 = vrcp.f32 %v3065_v35 }
 0x425   :  { %5890 = vpow2.f32 %v2974_v10  ;;  %v3083_v4 = vpop.xlane.xlu2 %3082 }
 0x426   :  { %5892 = vrcp.f32 %v3098_v58  ;;  %v5887_v34 = vpop.eup %5886  ;;  %v3266_v58 = vmul.f32 %v5885_v14, %v7440_v61  ;;  %v3754_v61 = vunpack.c.l.b16 %v3324_v45 }
 0x427   :  { %v3068_v41 = vpop.xlane.xlu1 %3067  ;;  %5894 = vrcp.f32 %v3083_v4  ;;  %v3273_v37 = vmul.f32 %v5887_v34, %v7456_v44 }
 0x428   :  { %5896 = vrcp.f32 %v3068_v41  ;;  %v3330_v62 = vpack.c.bf16 %v3266_v58, %v3266_v58  ;;  %v7978_v58 = vld [vmem:[#allocation29_spill] sm:$0xff] }
 0x429   :  { %1395 = vrot.lane.b32.xlu1 %v7977_v49, %s6163_s6  ;;  %3151 = vadd.xlane.f32.xlu2 %v3150_v30  ;;  %v3337_v11 = vpack.c.bf16 %v3273_v37, %v3273_v37  ;;  %v5636_v30 = vld [vmem:[#allocation4 + $0xb0] sm:$0xff] }
 0x42a   :  { %v5889_v15 = vpop.eup %5888  ;;  %v3838_v26 = vunpack.c.l.b16 %v3330_v62 }
 0x42b   :  { %v7650_v47 = vpop.eup %5890  ;;  %v3261_v56 = vmul.f32 %v5889_v15, %v7463_v63  ;;  %5362 = vmatmul.msk.bf16.vlgmr.msra.gmra.mxu2 %vm2591_vm2, %v3812_v24  ;;  %v3923_v15 = vunpack.c.l.b16 %v3337_v11 }
 0x42c   :  { %v5893_v22 = vpop.eup %5892  ;;  %4053 = vmatpush.bf16.msra.mxu2 %v5638_v7  ;;  %v3165_v14 = vsel %vm2591_vm2, %v7650_v47, 0.0  ;;  %v5639_v7 = vld [vmem:[#allocation4 + $0xc8] sm:$0xff] }
 0x42d   :  { %v5895_v46 = vpop.eup %5894  ;;  %v3325_v2 = vpack.c.bf16 %v3261_v56, %v3261_v56  ;;  %v3272_v55 = vmul.f32 %v5893_v22, %v7448_v23 }
 0x42e   :  { %v3267_v10 = vmul.f32 %v5895_v46, %v7467_v42  ;;  %v3071_v38 = vpop.xlane.xlu2 %3070  ;;  %v5897_v1 = vpop.eup %5896 }
 0x42f   :  { %v3755_v35 = vunpack.c.l.b16 %v3325_v2  ;;  %v3122_v40 = vpop.xlane.xlu1 %3121  ;;  %5898 = vrcp.f32 %v3071_v38  ;;  %v3523_v63 = vpop.f32.mrf.mxu3  ;;  %v3262_v42 = vmul.f32 %v5897_v1, %v7472_v54  ;;  %v3336_v23 = vpack.c.bf16 %v3272_v55, %v3272_v55 }
 0x430   :  { %v3331_v39 = vpack.c.bf16 %v3267_v10, %v3267_v10  ;;  %v4266_v4 = vpack.c.bf16 %v3523_v63, %v3523_v63 }
 0x431   :  { %v3756_v44 = vpack.c.b16 %v3755_v35, %v3754_v61  ;;  %3166 = vadd.xlane.f32.xlu2 %v3165_v14  ;;  %v3326_v45 = vpack.c.bf16 %v3262_v42, %v3262_v42  ;;  %v3922_v22 = vunpack.c.l.b16 %v3336_v23 }
 0x432   :  { %v3839_v41 = vunpack.c.l.b16 %v3331_v39  ;;  %4330 = vst.msk [vmem:[#allocation5 + $0x28] sm:$0xf] %vm756_vm0, %v4266_v4  ;;  %v5637_v39 = vld [vmem:[#allocation4 + $0xb8] sm:$0xff] }
 0x433   :  { %5352 = vmatmul.msk.bf16.vlgmr.msra.gmra.mxu0 %vm2591_vm2, %v3756_v44  ;;  %v3107_v34 = vpop.xlane.xlu0 %3106  ;;  %v3924_v10 = vpack.c.b16 %v3923_v15, %v3922_v22  ;;  %v3782_v1 = vunpack.c.l.b16 %v3326_v45 }
 0x434   :  { %v3840_v24 = vpack.c.b16 %v3839_v41, %v3838_v26  ;;  %3997 = vmatpush.bf16.msra.mxu0 %v5636_v30  ;;  %5900 = vrcp.f32 %v3107_v34  ;;  %1399 = vrot.lane.b32.xlu0 %v7978_v58, %s6163_s6 }
 0x435   :  { %v5899_v49 = vpop.eup %5898 }
 0x436   :  { %v3263_v54 = vmul.f32 %v5899_v49, %v7484_v43  ;;  %5367 = vmatmul.msk.bf16.vlgmr.msrb.gmra.mxu3 %vm2591_vm2, %v3840_v24  ;;  %v3104_v56 = vpop.xlane.xlu2 %3103 }
 0x437   :  { %v7666_v46 = vpop.xlane.xlu1 %3136  ;;  %4081 = vmatpush.bf16.msrb.mxu3 %v5639_v7  ;;  %5902 = vrcp.f32 %v3104_v56  ;;  %v3525_v37 = vpop.f32.mrf.mxu3  ;;  %v7979_v56 = vld [vmem:[#allocation31_spill] sm:$0xff] }
 0x438   :  { %v3327_v2 = vpack.c.bf16 %v3263_v54, %v3263_v54  ;;  %v4267_v62 = vpack.c.bf16 %v3525_v37, %v3525_v37  ;;  %5904 = vrcp.f32 %v3122_v40 }
 0x439   :  { %5906 = vrcp.f32 %v7635_v60 }
 0x43a   :  { %v5901_v38 = vpop.eup %5900  ;;  %v3783_v61 = vunpack.c.l.b16 %v3327_v2  ;;  %4331 = vst.msk [vmem:[#allocation5 + $0x2c] sm:$0xf] %vm756_vm0, %v4267_v62  ;;  %5908 = vrcp.f32 %v7618_v12  ;;  %v5640_v12 = vld [vmem:[#allocation4 + $0xd0] sm:$0xff] }
 0x43b   :  { %v3275_v43 = vmul.f32 %v5901_v38, %v7495_v25  ;;  %5382 = vmatmul.msk.bf16.vlgmr.msrb.gmra.mxu2 %vm2591_vm2, %v3924_v10  ;;  %v3134_v55 = vpop.xlane.xlu0 %3133  ;;  %v2846_v25 = vsub.f32 %v7376_v33, %v7609_v29 }
 0x43c   :  { %v3784_v35 = vpack.c.b16 %v3783_v61, %v3782_v1  ;;  %v2843_v61 = vsub.f32 %v7383_v51, %v7592_v28 }
 0x43d   :  { %v5903_v63 = vpop.eup %5902  ;;  %v3339_v4 = vpack.c.bf16 %v3275_v43, %v3275_v43  ;;  %v2972_v23 = vmul.f32 1.442695, %v2846_v25 }
 0x43e   :  { %v3274_v40 = vmul.f32 %v5903_v63, %v7492_v27  ;;  %5357 = vmatmul.msk.bf16.vlgmr.msra.gmra.mxu1 %vm2591_vm2, %v3784_v35  ;;  %v3125_v14 = vpop.xlane.xlu2 %3124  ;;  %v5905_v11 = vpop.eup %5904 }
 0x43f   :  { %v3128_v44 = vpop.xlane.xlu1 %3127  ;;  %4025 = vmatpush.bf16.msra.mxu1 %v5637_v39  ;;  %5910 = vrcp.f32 %v3125_v14  ;;  %v5907_v60 = vpop.eup %5906  ;;  %v3280_v42 = vmul.f32 %v5905_v11, %v7482_v17  ;;  %v3951_v41 = vunpack.c.l.b16 %v3339_v4  ;;  %v2966_v11 = vmul.f32 1.442695, %v2843_v61 }
 0x440   :  { %v3338_v26 = vpack.c.bf16 %v3274_v40, %v3274_v40  ;;  %5912 = vrcp.f32 %v3128_v44  ;;  %v5909_v33 = vpop.eup %5908  ;;  %v3277_v17 = vmul.f32 %v5907_v60, %v7452_v13 }
 0x441   :  { %v3344_v15 = vpack.c.bf16 %v3280_v42, %v3280_v42  ;;  %v3276_v9 = vmul.f32 %v5909_v33, %v7423_v31 }
 0x442   :  { %v3950_v30 = vunpack.c.l.b16 %v3338_v26  ;;  %v3341_v54 = vpack.c.bf16 %v3277_v17, %v3277_v17 }
 0x443   :  { %v3551_v27 = vpop.f32.mrf.mxu0  ;;  %5372 = vmatmul.msk.bf16.vlgmr.msrb.gmra.mxu0 %vm2591_vm2, %v3868_v36  ;;  %v3092_v34 = vpop.xlane.xlu0 %3091  ;;  %v4034_v22 = vunpack.c.l.b16 %v3344_v15  ;;  %v3340_v37 = vpack.c.bf16 %v3276_v9, %v3276_v9 }
 0x444   :  { %v3952_v29 = vpack.c.b16 %v3951_v41, %v3950_v30  ;;  %v4268_v24 = vpack.c.bf16 %v3551_v27, %v3551_v27  ;;  %4109 = vmatpush.bf16.msrb.mxu0 %v5640_v12  ;;  %5914 = vrcp.f32 %v3092_v34  ;;  %v3979_v43 = vunpack.c.l.b16 %v3341_v54  ;;  %v5641_v34 = vld [vmem:[#allocation4 + $0xd8] sm:$0xff] }
 0x445   :  { %v5911_v49 = vpop.eup %5910  ;;  %5916 = vpow2.f32 %v2972_v23 }
 0x446   :  { %v3281_v58 = vmul.f32 %v5911_v49, %v7511_v21  ;;  %4332 = vst.msk [vmem:[#allocation5 + $0x30] sm:$0xf] %vm756_vm0, %v4268_v24  ;;  %5387 = vmatmul.msk.bf16.vlgmr.msra.gmra.mxu3 %vm2591_vm2, %v3952_v29  ;;  %v3131_v7 = vpop.xlane.xlu2 %3130  ;;  %v5913_v45 = vpop.eup %5912 }
 0x447   :  { %v3095_v8 = vpop.xlane.xlu1 %3094  ;;  %v3282_v31 = vmul.f32 %v5913_v45, %v7515_v3 }
 0x448   :  { %v3345_v36 = vpack.c.bf16 %v3281_v58, %v3281_v58  ;;  %5918 = vrcp.f32 %v3095_v8 }
 0x449   :  { %5920 = vrcp.f32 %v3131_v7  ;;  %1403 = vrot.lane.b32.xlu2 %v7979_v56, %s6163_s6  ;;  %v3346_v40 = vpack.c.bf16 %v3282_v31, %v3282_v31 }
 0x44a   :  { %v5915_v13 = vpop.eup %5914  ;;  %v4035_v21 = vunpack.c.l.b16 %v3345_v36  ;;  %5922 = vrcp.f32 %v3134_v55  ;;  %v3978_v55 = vunpack.c.l.b16 %v3340_v37 }
 0x44b   :  { %v3270_v2 = vmul.f32 %v5915_v13, %v7523_v32  ;;  %v3553_v62 = vpop.f32.mrf.mxu0  ;;  %v7691_v1 = vpop.eup %5916  ;;  %5924 = vrcp.f32 %v7666_v46  ;;  %v4062_v30 = vunpack.c.l.b16 %v3346_v40 }
 0x44c   :  { %v4036_v10 = vpack.c.b16 %v4035_v21, %v4034_v22  ;;  %v4269_v38 = vpack.c.bf16 %v3553_v62, %v3553_v62  ;;  %v3980_v51 = vpack.c.b16 %v3979_v43, %v3978_v55  ;;  %v3162_v60 = vsel %vm2591_vm2, %v7691_v1, 0.0 }
 0x44d   :  { %v3146_v32 = vpop.xlane.xlu0 %3145  ;;  %v3334_v39 = vpack.c.bf16 %v3270_v2, %v3270_v2  ;;  %5926 = vpow2.f32 %v2966_v11 }
 0x44e   :  { %v5919_v35 = vpop.eup %5918  ;;  %4333 = vst.msk [vmem:[#allocation5 + $0x34] sm:$0xf] %vm756_vm0, %v4269_v38  ;;  %5402 = vmatmul.msk.bf16.vlgmr.msra.gmra.mxu2 %vm2591_vm2, %v4036_v10 }
 0x44f   :  { %v5921_v63 = vpop.eup %5920  ;;  %v3271_v3 = vmul.f32 %v5919_v35, %v7530_v57  ;;  %v3149_v4 = vpop.xlane.xlu1 %3148  ;;  %v3894_v42 = vunpack.c.l.b16 %v3334_v39 }
 0x450   :  { %v3283_v14 = vmul.f32 %v5921_v63, %v7533_v18  ;;  %v3579_v25 = vpop.f32.mrf.mxu1  ;;  %v5923_v44 = vpop.eup %5922 }
 0x451   :  { %v3335_v28 = vpack.c.bf16 %v3271_v3, %v3271_v3  ;;  %v4270_v26 = vpack.c.bf16 %v3579_v25, %v3579_v25  ;;  %v5925_v57 = vpop.eup %5924  ;;  %v3284_v18 = vmul.f32 %v5923_v44, %v7508_v20 }
 0x452   :  { %v3347_v46 = vpack.c.bf16 %v3283_v14, %v3283_v14  ;;  %v3285_v29 = vmul.f32 %v5925_v57, %v7501_v16 }
 0x453   :  { %v3895_v41 = vunpack.c.l.b16 %v3335_v28  ;;  %3163 = vadd.xlane.f32.xlu1 %v3162_v60  ;;  %5392 = vmatmul.msk.bf16.vlgmr.msra.gmra.mxu0 %vm2591_vm2, %v3980_v51  ;;  %4334 = vst.msk [vmem:[#allocation5 + $0x38] sm:$0xf] %vm756_vm0, %v4270_v26  ;;  %v3348_v49 = vpack.c.bf16 %v3284_v18, %v3284_v18  ;;  %v7708_v58 = vpop.eup %5926 }
 0x454   :  { %v4063_v12 = vunpack.c.l.b16 %v3347_v46  ;;  %v3349_v20 = vpack.c.bf16 %v3285_v29, %v3285_v29  ;;  %v3153_v45 = vsel %vm2591_vm2, %v7708_v58, 0.0 }
 0x455   :  { %v3896_v23 = vpack.c.b16 %v3895_v41, %v3894_v42  ;;  %v3116_v33 = vpop.xlane.xlu0 %3115  ;;  %v4090_v36 = vunpack.c.l.b16 %v3348_v49 }
 0x456   :  { %v4064_v27 = vpack.c.b16 %v4063_v12, %v4062_v30  ;;  %5928 = vrcp.f32 %v3116_v33  ;;  %v4091_v54 = vunpack.c.l.b16 %v3349_v20 }
 0x457   :  { %v3119_v24 = vpop.xlane.xlu1 %3118  ;;  %5377 = vmatmul.msk.bf16.vlgmr.msrb.gmra.mxu1 %vm2591_vm2, %v3896_v23 }
 0x458   :  { %5930 = vrcp.f32 %v3119_v24  ;;  %5407 = vmatmul.msk.bf16.vlgmr.msrb.gmra.mxu3 %vm2591_vm2, %v4064_v27  ;;  %4137 = vmatpush.bf16.msrb.mxu1 %v5641_v34  ;;  %v3581_v17 = vpop.f32.mrf.mxu1  ;;  %v4092_v22 = vpack.c.b16 %v4091_v54, %v4090_v36 }
 0x459   :  { %v4271_v15 = vpack.c.bf16 %v3581_v17, %v3581_v17  ;;  %5932 = vrcp.f32 %v3146_v32 }
 0x45a   :  { %5934 = vrcp.f32 %v3149_v4  ;;  %v7980_v4 = vld [vmem:[#allocation30_spill] sm:$0xff] }
 0x45b   :  { %v3140_v9 = vpop.xlane.xlu2 %3139  ;;  %4335 = vst.msk [vmem:[#allocation5 + $0x3c] sm:$0xf] %vm756_vm0, %v4271_v15 }
 0x45c   :  { %v5929_v8 = vpop.eup %5928  ;;  %5936 = vrcp.f32 %v3140_v9 }
 0x45d   :  { %v3278_v7 = vmul.f32 %v5929_v8, %v7552_v53 }
 0x45e   :  { %v5931_v16 = vpop.eup %5930  ;;  %3154 = vadd.xlane.f32.xlu0 %v3153_v45 }
 0x45f   :  { %v3279_v56 = vmul.f32 %v5931_v16, %v7557_v5  ;;  %v3342_v13 = vpack.c.bf16 %v3278_v7, %v3278_v7  ;;  %v5933_v31 = vpop.eup %5932 }
 0x460   :  { %v5935_v53 = vpop.eup %5934  ;;  %v3288_v5 = vmul.f32 %v5933_v31, %v7543_v0 }
 0x461   :  { %v3343_v21 = vpack.c.bf16 %v3279_v56, %v3279_v56  ;;  %v4006_v37 = vunpack.c.l.b16 %v3342_v13  ;;  %v3289_v38 = vmul.f32 %v5935_v53, %v7541_v59 }
 0x462   :  { %v3352_v63 = vpack.c.bf16 %v3288_v5, %v3288_v5  ;;  %v5937_v12 = vpop.eup %5936 }
 0x463   :  { %v4007_v2 = vunpack.c.l.b16 %v3343_v21  ;;  %v1390_v62 = vpop.permute.xlu2 %1389  ;;  %5412 = vmatmul.msk.bf16.vlgmr.msrb.gmra.mxu0 %vm2591_vm2, %v4092_v22  ;;  %v3353_v32 = vpack.c.bf16 %v3289_v38, %v3289_v38  ;;  %v3286_v18 = vmul.f32 %v5937_v12, %v7565_v50 }
 0x464   :  { %1430 = vst.msk [vmem:[#allocation4 + $0xe0] sm:$0xf] %vm756_vm0, %v1390_v62  ;;  %v4146_v39 = vunpack.c.l.b16 %v3352_v63 }
 0x465   :  { %v4008_v10 = vpack.c.b16 %v4007_v2, %v4006_v37  ;;  %v4147_v55 = vunpack.c.l.b16 %v3353_v32  ;;  %v3158_v11 = vpop.xlane.xlu1 %3157  ;;  %v3350_v34 = vpack.c.bf16 %v3286_v18, %v3286_v18 }
 0x467   :  { %5397 = vmatmul.msk.bf16.vlgmr.msra.gmra.mxu1 %vm2591_vm2, %v4008_v10  ;;  %v4148_v40 = vpack.c.b16 %v4147_v55, %v4146_v39  ;;  %v4118_v20 = vunpack.c.l.b16 %v3350_v34 }
 0x468   :  { %v3607_v61 = vpop.f32.mrf.mxu2  ;;  %v1392_v43 = vpop.permute.xlu0 %1391 }
 0x469   :  { %v4272_v35 = vpack.c.bf16 %v3607_v61, %v3607_v61  ;;  %1431 = vst.msk [vmem:[#allocation4 + $0xe4] sm:$0xf] %vm756_vm0, %v1392_v43 }
 0x46a   :  { %v7737_v24 = vpop.f32.mrf.mxu0 }
 0x46b   :  { %4352 = vrot.lane.b32.xlu2 %v4272_v35, %s6163_s6 }
 0x470   :  { %v5642_v3 = vld [vmem:[#allocation4 + $0xe0] sm:$0xff]  ;;  %v3609_v59 = vpop.f32.mrf.mxu2 }
 0x471   :  { %4165 = vmatpush.bf16.msrb.mxu2 %v5642_v3  ;;  %v4273_v0 = vpack.c.bf16 %v3609_v59, %v3609_v59 }
 0x472   :  { %1401 = vrot.lane.b32.xlu0 %v7980_v4, %s6163_s6  ;;  %v7744_v21 = vpop.f32.mrf.mxu0 }
 0x473   :  { %v3161_v25 = vpop.xlane.xlu1 %3160 }
 0x474   :  { %5422 = vmatmul.msk.bf16.vlgmr.msrb.gmra.mxu2 %vm2591_vm2, %v4148_v40 }
 0x47a   :  { %v3635_v14 = vpop.f32.mrf.mxu3  ;;  %4354 = vrot.lane.b32.xlu0 %v4273_v0, %s6163_s6 }
 0x47b   :  { %v4274_v51 = vpack.c.bf16 %v3635_v14, %v3635_v14 }
 0x482   :  { %v3637_v28 = vpop.f32.mrf.mxu3  ;;  %4356 = vrot.lane.b32.xlu0 %v4274_v51, %s6163_s6 }
 0x483   :  { %v4275_v44 = vpack.c.bf16 %v3637_v28, %v3637_v28 }
 0x485   :  { %v3691_v46 = vpop.f32.mrf.mxu1  ;;  %4358 = vrot.lane.b32.xlu1 %v4275_v44, %s6163_s6 }
 0x486   :  { %v4278_v26 = vpack.c.bf16 %v3691_v46, %v3691_v46 }
 0x48a   :  { %4364 = vrot.lane.b32.xlu0 %v4278_v26, %s6163_s6 }
 0x48b   :  { %v1398_v60 = vpop.permute.xlu1 %1397 }
 0x48c   :  { %1434 = vst.msk [vmem:[#allocation4 + $0xf0] sm:$0xf] %vm756_vm0, %v1398_v60 }
 0x48d   :  { %v3693_v42 = vpop.f32.mrf.mxu1 }
 0x48e   :  { %v4279_v41 = vpack.c.bf16 %v3693_v42, %v3693_v42 }
 0x490   :  { %4366 = vrot.lane.b32.xlu2 %v4279_v41, %s6163_s6 }
 0x493   :  { %v1394_v57 = vpop.permute.xlu1 %1393  ;;  %v3143_v30 = vpop.xlane.xlu0 %3142 }
 0x494   :  { %1432 = vst.msk [vmem:[#allocation4 + $0xe8] sm:$0xf] %vm756_vm0, %v1394_v57  ;;  %5938 = vrcp.f32 %v3143_v30 }
 0x495   :  { %5940 = vrcp.f32 %v3161_v25 }
 0x496   :  { %5942 = vrcp.f32 %v3158_v11 }
 0x49a   :  { %v5939_v23 = vpop.eup %5938 }
 0x49b   :  { %v1396_v27 = vpop.permute.xlu1 %1395  ;;  %v3287_v33 = vmul.f32 %v5939_v23, %v7629_v19  ;;  %v5941_v16 = vpop.eup %5940 }
 0x49c   :  { %1433 = vst.msk [vmem:[#allocation4 + $0xec] sm:$0xf] %vm756_vm0, %v1396_v27  ;;  %v7735_v29 = vpop.xlane.xlu2 %3151  ;;  %v5943_v7 = vpop.eup %5942  ;;  %v3293_v54 = vmul.f32 %v5941_v16, %v7597_v52 }
 0x49d   :  { %v3351_v49 = vpack.c.bf16 %v3287_v33, %v3287_v33  ;;  %v3292_v37 = vmul.f32 %v5943_v7, %v7575_v48  ;;  %5944 = vrcp.f32 %v7735_v29 }
 0x49e   :  { %v3719_v17 = vpop.f32.mrf.mxu2  ;;  %v3357_v2 = vpack.c.bf16 %v3293_v54, %v3293_v54 }
 0x49f   :  { %v4280_v15 = vpack.c.bf16 %v3719_v17, %v3719_v17  ;;  %v4119_v9 = vunpack.c.l.b16 %v3351_v49  ;;  %v3356_v53 = vpack.c.bf16 %v3292_v37, %v3292_v37 }
 0x4a0   :  { %v3747_v8 = vpop.f32.mrf.mxu3  ;;  %v4203_v10 = vunpack.c.l.b16 %v3357_v2 }
 0x4a1   :  { %4368 = vrot.lane.b32.xlu0 %v4280_v15, %s6163_s6  ;;  %v4120_v50 = vpack.c.b16 %v4119_v9, %v4118_v20  ;;  %v4282_v56 = vpack.c.bf16 %v3747_v8, %v3747_v8  ;;  %v4202_v35 = vunpack.c.l.b16 %v3356_v53 }
 0x4a3   :  { %v5643_v36 = vld [vmem:[#allocation4 + $0xe8] sm:$0xff]  ;;  %5417 = vmatmul.msk.bf16.vlgmr.msrb.gmra.mxu1 %vm2591_vm2, %v4120_v50  ;;  %v4204_v48 = vpack.c.b16 %v4203_v10, %v4202_v35  ;;  %v5945_v12 = vpop.eup %5944 }
 0x4a4   :  { %v7740_v19 = vpop.xlane.xlu2 %3166  ;;  %4193 = vmatpush.bf16.msra.mxu3 %v5643_v36  ;;  %v3290_v27 = vmul.f32 %v5945_v12, %v7642_v6  ;;  %v5657_v12 = vld [vmem:[#allocation17 + $0x18] sm:$0xff] }
 0x4a6   :  { %v3721_v45 = vpop.f32.mrf.mxu2  ;;  %v1400_v22 = vpop.permute.xlu0 %1399  ;;  %v3354_v15 = vpack.c.bf16 %v3290_v27, %v3290_v27 }
 0x4a7   :  { %v4281_v13 = vpack.c.bf16 %v3721_v45, %v3721_v45  ;;  %1435 = vst.msk [vmem:[#allocation4 + $0xf4] sm:$0xf] %vm756_vm0, %v1400_v22 }
 0x4a8   :  { %v3749_v62 = vpop.f32.mrf.mxu3  ;;  %v4174_v16 = vunpack.c.l.b16 %v3354_v15 }
 0x4a9   :  { %4372 = vrot.lane.b32.xlu0 %v4282_v56, %s6163_s6  ;;  %4370 = vrot.lane.b32.xlu1 %v4281_v13, %s6163_s6  ;;  %v4283_v38 = vpack.c.bf16 %v3749_v62, %v3749_v62 }
 0x4ac   :  { %v1404_v31 = vpop.permute.xlu2 %1403 }
 0x4ad   :  { %1437 = vst.msk [vmem:[#allocation4 + $0xfc] sm:$0xf] %vm756_vm0, %v1404_v31 }
 0x4ae   :  { %v3831_v52 = vpop.f32.mrf.mxu2  ;;  %v5644_v61 = vld [vmem:[#allocation4 + $0xf0] sm:$0xff] }
 0x4af   :  { %v4288_v5 = vpack.c.bf16 %v3831_v52, %v3831_v52  ;;  %4221 = vmatpush.bf16.msra.mxu0 %v5644_v61 }
 0x4b0   :  { %v3775_v43 = vpop.f32.mrf.mxu0 }
 0x4b1   :  { %4374 = vrot.lane.b32.xlu1 %v4283_v38, %s6163_s6  ;;  %4433 = vrot.lane.b32.xlu2 %v4288_v5, %s6155_s25  ;;  %v4284_v63 = vpack.c.bf16 %v3775_v43, %v3775_v43 }
 0x4b2   :  { %5432 = vmatmul.msk.bf16.vlgmr.msra.gmra.mxu0 %vm2591_vm2, %v4204_v48 }
 0x4b6   :  { %v3833_v32 = vpop.f32.mrf.mxu2 }
 0x4b7   :  { %v4289_v55 = vpack.c.bf16 %v3833_v32, %v3833_v32 }
 0x4b8   :  { %v3777_v39 = vpop.f32.mrf.mxu0 }
 0x4b9   :  { %4435 = vrot.lane.b32.xlu0 %v4289_v55, %s6155_s25  ;;  %4376 = vrot.lane.b32.xlu2 %v4284_v63, %s6163_s6  ;;  %v3859_v3 = vpop.f32.mrf.mxu3  ;;  %v4285_v0 = vpack.c.bf16 %v3777_v39, %v3777_v39 }
 0x4ba   :  { %v4290_v40 = vpack.c.bf16 %v3859_v3, %v3859_v3 }
 0x4bb   :  { %v3803_v14 = vpop.f32.mrf.mxu1 }
 0x4bc   :  { %v4286_v25 = vpack.c.bf16 %v3803_v14, %v3803_v14 }
 0x4be   :  { %v3943_v4 = vpop.f32.mrf.mxu2 }
 0x4bf   :  { %v4296_v59 = vpack.c.bf16 %v3943_v4, %v3943_v4 }
 0x4c0   :  { %v7759_v11 = vpop.f32.mrf.mxu0 }
 0x4c1   :  { %4449 = vrot.lane.b32.xlu1 %v4296_v59, %s6155_s25  ;;  %4437 = vrot.lane.b32.xlu2 %v4290_v40, %s6155_s25  ;;  %v3861_v51 = vpop.f32.mrf.mxu3 }
 0x4c2   :  { %4378 = vrot.lane.b32.xlu0 %v4285_v0, %s6163_s6  ;;  %v4291_v44 = vpack.c.bf16 %v3861_v51, %v3861_v51  ;;  %v5661_v0 = vld [vmem:[#allocation17 + $0x38] sm:$0xff] }
 0x4c3   :  { %v7764_v26 = vpop.f32.mrf.mxu1  ;;  %4711 = vmatpush.bf16.msrb.mxu0 %v5661_v0  ;;  %5662 = vmatpush.bf16.msra.mxu2 %v5661_v0 }
 0x4c4   :  { %5663 = vmatpush.bf16.msrb.mxu3 %v5661_v0 }
 0x4c5   :  { %v4353_v28 = vpop.permute.xlu2 %4352 }
 0x4c6   :  { %4401 = vst.msk [vmem:[#allocation5] sm:$0xf] %vm4400_vm3, %v4353_v28  ;;  %v3945_v46 = vpop.f32.mrf.mxu2  ;;  %v3164_v33 = vpop.xlane.xlu1 %3163  ;;  %v5660_v28 = vld [vmem:[#allocation17 + $0x30] sm:$0xff] }
 0x4c7   :  { %v4297_v42 = vpack.c.bf16 %v3945_v46, %v3945_v46  ;;  %4712 = vmatpush.bf16.msrb.mxu0 %v5660_v28  ;;  %5664 = vmatpush.bf16.msra.mxu2 %v5660_v28 }
 0x4c8   :  { %v7767_v60 = vpop.f32.mrf.mxu0  ;;  %5665 = vmatpush.bf16.msrb.mxu3 %v5660_v28 }
 0x4c9   :  { %4380 = vrot.lane.b32.xlu2 %v4286_v25, %s6163_s6  ;;  %v7772_v34 = vpop.f32.mrf.mxu3 }
 0x4ca   :  { %4439 = vrot.lane.b32.xlu0 %v4291_v44, %s6155_s25  ;;  %v5659_v44 = vld [vmem:[#allocation17 + $0x28] sm:$0xff] }
 0x4cb   :  { %4713 = vmatpush.bf16.msrb.mxu0 %v5659_v44  ;;  %5666 = vmatpush.bf16.msra.mxu2 %v5659_v44 }
 0x4cc   :  { %5667 = vmatpush.bf16.msrb.mxu3 %v5659_v44 }
 0x4d0   :  { %v3999_v29 = vpop.f32.mrf.mxu0 }
 0x4d1   :  { %v4055_v41 = vpop.f32.mrf.mxu2  ;;  %4451 = vrot.lane.b32.xlu2 %v4297_v42, %s6155_s25  ;;  %v3155_v30 = vpop.xlane.xlu0 %3154  ;;  %v4300_v6 = vpack.c.bf16 %v3999_v29, %v3999_v29  ;;  %v5656_v29 = vld [vmem:[#allocation17 + $0x10] sm:$0xff] }
 0x4d2   :  { %v4304_v57 = vpack.c.bf16 %v4055_v41, %v4055_v41  ;;  %5946 = vrcp.f32 %v3155_v30  ;;  %v7780_v45 = vpop.f32.mrf.mxu3 }
 0x4d3   :  { %5948 = vrcp.f32 %v3164_v33 }
 0x4d4   :  { %v3915_v18 = vpop.f32.mrf.mxu1  ;;  %4514 = vrot.lane.b32.xlu1 %v4304_v57, %s6164_s4  ;;  %5950 = vrcp.f32 %v7740_v19  ;;  %v5658_v57 = vld [vmem:[#allocation17 + $0x20] sm:$0xff] }
 0x4d5   :  { %v4294_v23 = vpack.c.bf16 %v3915_v18, %v3915_v18  ;;  %4714 = vmatpush.bf16.msrb.mxu0 %v5658_v57  ;;  %5668 = vmatpush.bf16.msra.mxu2 %v5658_v57 }
 0x4d6   :  { %5669 = vmatpush.bf16.msrb.mxu3 %v5658_v57 }
 0x4d7   :  { %4445 = vrot.lane.b32.xlu0 %v4294_v23, %s6155_s25 }
 0x4d8   :  { %v5947_v49 = vpop.eup %5946  ;;  %v4001_v56 = vpop.f32.mrf.mxu0 }
 0x4d9   :  { %v4057_v17 = vpop.f32.mrf.mxu2  ;;  %v3291_v20 = vmul.f32 %v5947_v49, %v7708_v58  ;;  %v5949_v58 = vpop.eup %5948  ;;  %v4301_v37 = vpack.c.bf16 %v4001_v56, %v4001_v56  ;;  %4715 = vmatpush.bf16.msrb.mxu0 %v5657_v12  ;;  %5670 = vmatpush.bf16.msra.mxu2 %v5657_v12  ;;  %v4298_v56 = vpack.c.bf16 %v7772_v34, %v7772_v34 }
 0x4da   :  { %v4305_v9 = vpack.c.bf16 %v4057_v17, %v4057_v17  ;;  %v5951_v13 = vpop.eup %5950  ;;  %v3294_v22 = vmul.f32 %v5949_v58, %v7691_v1  ;;  %5671 = vmatpush.bf16.msrb.mxu3 %v5657_v12  ;;  %v4299_v17 = vpack.c.bf16 %v7780_v45, %v7780_v45  ;;  %v4277_v34 = vpack.c.bf16 %v7744_v21, %v7744_v21  ;;  %v7882_v12 = vld [vmem:[%s7922_s10] ss:$0 sm:$0xff]  ;;  %s6165_s10 = smov [#allocation18]  }
 0x4db   :  { %v3355_v50 = vpack.c.bf16 %v3291_v20, %v3291_v20  ;;  %v3295_v2 = vmul.f32 %v5951_v13, %v7650_v47  ;;  %v4083_v53 = vpop.f32.mrf.mxu3  ;;  %s4780_s14 = sshll.u32 %s6165_s10, 4  ;;  %s4781_s14 = int_to_ptr.vmem [resolvable:$true] %s4780_s14 }
 0x4dc   :  { %v3917_v8 = vpop.f32.mrf.mxu1  ;;  %4516 = vrot.lane.b32.xlu2 %v4305_v9, %s6164_s4  ;;  %v3358_v62 = vpack.c.bf16 %v3294_v22, %v3294_v22  ;;  %v4306_v38 = vpack.c.bf16 %v4083_v53, %v4083_v53  ;;  %v5655_v9 = vld [vmem:[#allocation17 + $0x8] sm:$0xff] }
 0x4dd   :  { %v4295_v36 = vpack.c.bf16 %v3917_v8, %v3917_v8  ;;  %v4175_v7 = vunpack.c.l.b16 %v3355_v50  ;;  %v3359_v31 = vpack.c.bf16 %v3295_v2, %v3295_v2  ;;  %4716 = vmatpush.bf16.msrb.mxu0 %v5656_v29  ;;  %5672 = vmatpush.bf16.msra.mxu2 %v5656_v29 }
 0x4de   :  { %v4230_v10 = vunpack.c.l.b16 %v3358_v62  ;;  %5673 = vmatpush.bf16.msrb.mxu3 %v5656_v29 }
 0x4df   :  { %4457 = vrot.lane.b32.xlu0 %v4300_v6, %s6155_s25  ;;  %4447 = vrot.lane.b32.xlu1 %v4295_v36, %s6155_s25  ;;  %v4176_v54 = vpack.c.b16 %v4175_v7, %v4174_v16  ;;  %v4231_v43 = vunpack.c.l.b16 %v3359_v31  ;;  %v5654_v6 = vld [vmem:[#allocation17] sm:$0xff]  ;;  %v4287_v36 = vpack.c.bf16 %v7764_v26, %v7764_v26 }
 0x4e0   :  { %v7807_v30 = vpop.f32.mrf.mxu0 }
 0x4e1   :  { %5427 = vmatmul.msk.bf16.vlgmr.msra.gmra.mxu3 %vm2591_vm2, %v4176_v54  ;;  %v4232_v47 = vpack.c.b16 %v4231_v43, %v4230_v10  ;;  %4717 = vmatpush.bf16.msrb.mxu0 %v5655_v9 }
 0x4e2   :  { %5674 = vmatpush.bf16.msra.mxu2 %v5655_v9  ;;  %5675 = vmatpush.bf16.msrb.mxu3 %v5655_v9 }
 0x4e3   :  { %v4085_v55 = vpop.f32.mrf.mxu3 }
 0x4e4   :  { %v1402_v19 = vpop.permute.xlu0 %1401  ;;  %v4307_v3 = vpack.c.bf16 %v4085_v55, %v4085_v55  ;;  %v7798_v59 = vpop.f32.mrf.mxu1  ;;  %v4292_v55 = vpack.c.bf16 %v7759_v11, %v7759_v11 }
 0x4e5   :  { %1436 = vst.msk [vmem:[#allocation4 + $0xf8] sm:$0xf] %vm756_vm0, %v1402_v19  ;;  %4718 = vmatpush.bf16.msrb.mxu0 %v5654_v6  ;;  %v4302_v26 = vpack.c.bf16 %v7798_v59, %v7798_v59 }
 0x4e6   :  { %5676 = vmatpush.bf16.msra.mxu2 %v5654_v6  ;;  %5677 = vmatpush.bf16.msrb.mxu3 %v5654_v6 }
 0x4e7   :  { %4459 = vrot.lane.b32.xlu1 %v4301_v37, %s6155_s25 }
 0x4e8   :  { %v7814_v15 = vpop.f32.mrf.mxu0 }
 0x4e9   :  { %v4309_v11 = vpack.c.bf16 %v7814_v15, %v7814_v15 }
 0x4ea   :  { %v4367_v52 = vpop.permute.xlu2 %4366 }
 0x4eb   :  { %4408 = vst.msk [vmem:[#allocation5 + $0x1c] sm:$0xf] %vm4400_vm3, %v4367_v52 }
 0x4ec   :  { %v4355_v5 = vpop.permute.xlu0 %4354  ;;  %v5645_v61 = vld [vmem:[#allocation4 + $0xf8] sm:$0xff]  ;;  %v7802_v25 = vpop.f32.mrf.mxu1 }
 0x4ed   :  { %4402 = vst.msk [vmem:[#allocation5 + $0x4] sm:$0xf] %vm4400_vm3, %v4355_v5  ;;  %4249 = vmatpush.bf16.msra.mxu1 %v5645_v61  ;;  %v4303_v22 = vpack.c.bf16 %v7802_v25, %v7802_v25 }
 0x4ef   :  { %4518 = vrot.lane.b32.xlu1 %v4306_v38, %s6164_s4 }
 0x4f0   :  { %5437 = vmatmul.msk.bf16.vlgmr.msra.gmra.mxu1 %vm2591_vm2, %v4232_v47 }
 0x4f4   :  { %v4357_v1 = vpop.permute.xlu0 %4356 }
 0x4f5   :  { %4403 = vst.msk [vmem:[#allocation5 + $0x8] sm:$0xf] %vm4400_vm3, %v4357_v1 }
 0x4f7   :  { %v4359_v35 = vpop.permute.xlu1 %4358  ;;  %v4167_v48 = vpop.f32.mrf.mxu2 }
 0x4f8   :  { %4404 = vst.msk [vmem:[#allocation5 + $0xc] sm:$0xf] %vm4400_vm3, %v4359_v35  ;;  %v4312_v32 = vpack.c.bf16 %v4167_v48, %v4167_v48 }
 0x4fa   :  { %4530 = vrot.lane.b32.xlu2 %v4312_v32, %s6164_s4 }
 0x4fc   :  { %v4365_v63 = vpop.permute.xlu0 %4364 }
 0x4fd   :  { %4407 = vst.msk [vmem:[#allocation5 + $0x18] sm:$0xf] %vm4400_vm3, %v4365_v63  ;;  %v4276_v63 = vpack.c.bf16 %v7737_v24, %v7737_v24 }
 0x4ff   :  { %v4169_v39 = vpop.f32.mrf.mxu2 }
 0x500   :  { %v4313_v4 = vpack.c.bf16 %v4169_v39, %v4169_v39 }
 0x502   :  { %4520 = vrot.lane.b32.xlu2 %v4307_v3, %s6164_s4  ;;  %4532 = vrot.lane.b32.xlu0 %v4313_v4, %s6164_s4  ;;  %v4308_v3 = vpack.c.bf16 %v7807_v30, %v7807_v30 }
 0x50b   :  { %v4434_v40 = vpop.permute.xlu2 %4433 }
 0x50c   :  { %4482 = vst.msk [vmem:[#allocation5] sm:$0xf] %vm4481_vm4, %v4434_v40  ;;  %v4293_v40 = vpack.c.bf16 %v7767_v60, %v7767_v60 }
 0x513   :  { %v4377_v14 = vpop.permute.xlu2 %4376  ;;  %v4369_v51 = vpop.permute.xlu0 %4368 }
 0x514   :  { %4413 = vst.msk [vmem:[#allocation5 + $0x30] sm:$0xf] %vm4400_vm3, %v4377_v14 }
 0x515   :  { %4409 = vst.msk [vmem:[#allocation5 + $0x20] sm:$0xf] %vm4400_vm3, %v4369_v51 }
 0x51b   :  { %v4371_v46 = vpop.permute.xlu1 %4370  ;;  %v4438_v42 = vpop.permute.xlu2 %4437 }
 0x51c   :  { %4410 = vst.msk [vmem:[#allocation5 + $0x24] sm:$0xf] %vm4400_vm3, %v4371_v46  ;;  %v4373_v41 = vpop.permute.xlu0 %4372 }
 0x51d   :  { %4484 = vst.msk [vmem:[#allocation5 + $0x8] sm:$0xf] %vm4481_vm4, %v4438_v42 }
 0x51e   :  { %4411 = vst.msk [vmem:[#allocation5 + $0x28] sm:$0xf] %vm4400_vm3, %v4373_v41 }
 0x520   :  { %v4139_v18 = vpop.f32.mrf.mxu1 }
 0x521   :  { %v4310_v23 = vpack.c.bf16 %v4139_v18, %v4139_v18 }
 0x523   :  { %v4375_v27 = vpop.permute.xlu1 %4374  ;;  %v4381_v33 = vpop.permute.xlu2 %4380  ;;  %4526 = vrot.lane.b32.xlu2 %v4310_v23, %s6164_s4 }
 0x524   :  { %4412 = vst.msk [vmem:[#allocation5 + $0x2c] sm:$0xf] %vm4400_vm3, %v4375_v27 }
 0x525   :  { %4415 = vst.msk [vmem:[#allocation5 + $0x38] sm:$0xf] %vm4400_vm3, %v4381_v33 }
 0x528   :  { %v4141_v49 = vpop.f32.mrf.mxu1 }
 0x529   :  { %v4311_v20 = vpack.c.bf16 %v4141_v49, %v4141_v49 }
 0x52b   :  { %v4452_v50 = vpop.permute.xlu2 %4451  ;;  %v4436_v8 = vpop.permute.xlu0 %4435  ;;  %4455 = vrot.lane.b32.xlu2 %v4299_v17, %s6155_s25  ;;  %4528 = vrot.lane.b32.xlu0 %v4311_v20, %s6164_s4 }
 0x52c   :  { %4491 = vst.msk [vmem:[#allocation5 + $0x24] sm:$0xf] %vm4481_vm4, %v4452_v50 }
 0x52d   :  { %4483 = vst.msk [vmem:[#allocation5 + $0x4] sm:$0xf] %vm4481_vm4, %v4436_v8 }
 0x52f   :  { %v4223_v16 = vpop.f32.mrf.mxu0 }
 0x530   :  { %v4316_v7 = vpack.c.bf16 %v4223_v16, %v4223_v16 }
 0x532   :  { %4538 = vrot.lane.b32.xlu1 %v4316_v7, %s6164_s4 }
 0x533   :  { %v4450_v45 = vpop.permute.xlu1 %4449  ;;  %4382 = vrot.lane.b32.xlu0 %v4287_v36, %s6163_s6 }
 0x534   :  { %4490 = vst.msk [vmem:[#allocation5 + $0x20] sm:$0xf] %vm4481_vm4, %v4450_v45  ;;  %v4379_v54 = vpop.permute.xlu0 %4378 }
 0x535   :  { %4414 = vst.msk [vmem:[#allocation5 + $0x34] sm:$0xf] %vm4400_vm3, %v4379_v54 }
 0x536   :  { %v4517_v58 = vpop.permute.xlu2 %4516 }
 0x537   :  { %4564 = vst.msk [vmem:[#allocation5 + $0x4] sm:$0xf] %vm4562_vm5, %v4517_v58  ;;  %v4225_v43 = vpop.f32.mrf.mxu0 }
 0x538   :  { %v4317_v1 = vpack.c.bf16 %v4225_v43, %v4225_v43 }
 0x53a   :  { %4453 = vrot.lane.b32.xlu1 %v4298_v56, %s6155_s25 }
 0x53b   :  { %4461 = vrot.lane.b32.xlu0 %v4302_v26, %s6155_s25 }
 0x53c   :  { %v4440_v13 = vpop.permute.xlu0 %4439 }
 0x53d   :  { %4485 = vst.msk [vmem:[#allocation5 + $0xc] sm:$0xf] %vm4481_vm4, %v4440_v13 }
 0x542   :  { %4463 = vrot.lane.b32.xlu1 %v4303_v22, %s6155_s25 }
 0x546   :  { %v4515_v37 = vpop.permute.xlu1 %4514 }
 0x547   :  { %4563 = vst.msk [vmem:[#allocation5] sm:$0xf] %vm4562_vm5, %v4515_v37 }
 0x549   :  { %v4446_v19 = vpop.permute.xlu0 %4445 }
 0x54a   :  { %4488 = vst.msk [vmem:[#allocation5 + $0x18] sm:$0xf] %vm4481_vm4, %v4446_v19  ;;  %4362 = vrot.lane.b32.xlu1 %v4277_v34, %s6163_s6 }
 0x54e   :  { %v5646_v2 = vld [vmem:[#allocation5] sm:$0xff] }
 0x54f   :  { %4719 = vmatmul.bf16.vlgmr.msrb.gmra.mxu0 %v5646_v2 }
 0x551   :  { %v4448_v62 = vpop.permute.xlu1 %4447  ;;  %v4458_v31 = vpop.permute.xlu0 %4457 }
 0x552   :  { %4489 = vst.msk [vmem:[#allocation5 + $0x1c] sm:$0xf] %vm4481_vm4, %v4448_v62 }
 0x553   :  { %4494 = vst.msk [vmem:[#allocation5 + $0x30] sm:$0xf] %vm4481_vm4, %v4458_v31 }
 0x554   :  { %v4531_v53 = vpop.permute.xlu2 %4530 }
 0x555   :  { %4571 = vst.msk [vmem:[#allocation5 + $0x20] sm:$0xf] %vm4562_vm5, %v4531_v53 }
 0x559   :  { %v4460_v52 = vpop.permute.xlu1 %4459 }
 0x55a   :  { %4495 = vst.msk [vmem:[#allocation5 + $0x34] sm:$0xf] %vm4481_vm4, %v4460_v52 }
 0x55c   :  { %v4521_v10 = vpop.permute.xlu2 %4520 }
 0x55d   :  { %4566 = vst.msk [vmem:[#allocation5 + $0xc] sm:$0xf] %vm4562_vm5, %v4521_v10 }
 0x561   :  { %v4519_v21 = vpop.permute.xlu1 %4518 }
 0x562   :  { %4565 = vst.msk [vmem:[#allocation5 + $0x8] sm:$0xf] %vm4562_vm5, %v4519_v21 }
 0x564   :  { %v4195_v38 = vpop.f32.mrf.mxu3 }
 0x565   :  { %v4314_v5 = vpack.c.bf16 %v4195_v38, %v4195_v38 }
 0x567   :  { %4534 = vrot.lane.b32.xlu2 %v4314_v5, %s6164_s4 }
 0x569   :  { %v5647_v61 = vld [vmem:[#allocation5 + $0x8] sm:$0xff] }
 0x56a   :  { %4724 = vmatmul.bf16.gmra.mxu0 %v5647_v61 }
 0x56c   :  { %v4197_v47 = vpop.f32.mrf.mxu3 }
 0x56d   :  { %v4315_v35 = vpack.c.bf16 %v4197_v47, %v4197_v47  ;;  %v4251_v48 = vpop.f32.mrf.mxu1 }
 0x56e   :  { %v4318_v32 = vpack.c.bf16 %v4251_v48, %v4251_v48 }
 0x56f   :  { %4540 = vrot.lane.b32.xlu2 %v4317_v1, %s6164_s4  ;;  %4536 = vrot.lane.b32.xlu0 %v4315_v35, %s6164_s4 }
 0x570   :  { %4542 = vrot.lane.b32.xlu1 %v4318_v32, %s6164_s4 }
 0x574   :  { %v4533_v39 = vpop.permute.xlu0 %4532 }
 0x575   :  { %4572 = vst.msk [vmem:[#allocation5 + $0x24] sm:$0xf] %vm4562_vm5, %v4533_v39  ;;  %v4253_v4 = vpop.f32.mrf.mxu1 }
 0x576   :  { %v4319_v24 = vpack.c.bf16 %v4253_v4, %v4253_v4 }
 0x577   :  { %4441 = vrot.lane.b32.xlu2 %v4292_v55, %s6155_s25  ;;  %4360 = vrot.lane.b32.xlu0 %v4276_v63, %s6163_s6 }
 0x578   :  { %4522 = vrot.lane.b32.xlu1 %v4308_v3, %s6164_s4 }
 0x57c   :  { %v5650_v46 = vld [vmem:[#allocation5 + $0x20] sm:$0xff] }
 0x57d   :  { %v4527_v59 = vpop.permute.xlu2 %4526 }
 0x57e   :  { %4569 = vst.msk [vmem:[#allocation5 + $0x18] sm:$0xf] %vm4562_vm5, %v4527_v59 }
 0x57f   :  { %4443 = vrot.lane.b32.xlu0 %v4293_v40, %s6155_s25  ;;  %4544 = vrot.lane.b32.xlu2 %v4319_v24, %s6164_s4 }
 0x585   :  { %v4456_v0 = vpop.permute.xlu2 %4455 }
 0x586   :  { %4493 = vst.msk [vmem:[#allocation5 + $0x2c] sm:$0xf] %vm4481_vm4, %v4456_v0 }
 0x587   :  { %4524 = vrot.lane.b32.xlu2 %v4309_v11, %s6164_s4 }
 0x59d   :  { %v4529_v14 = vpop.permute.xlu0 %4528 }
 0x59e   :  { %4570 = vst.msk [vmem:[#allocation5 + $0x1c] sm:$0xf] %vm4562_vm5, %v4529_v14 }
 0x5a4   :  { %v4539_v28 = vpop.permute.xlu1 %4538 }
 0x5a5   :  { %v4383_v60 = vpop.permute.xlu0 %4382  ;;  %v5649_v51 = vld [vmem:[#allocation5 + $0x18] sm:$0xff]  ;;  %4575 = vst.msk [vmem:[#allocation5 + $0x30] sm:$0xf] %vm4562_vm5, %v4539_v28 }
 0x5a6   :  { %4416 = vst.msk [vmem:[#allocation5 + $0x3c] sm:$0xf] %vm4400_vm3, %v4383_v60  ;;  %4734 = vmatmul.bf16.vlgmr.msra.gmra.mxu2 %v5649_v51 }
 0x5ac   :  { %v4454_v44 = vpop.permute.xlu1 %4453 }
 0x5ad   :  { %v4462_v25 = vpop.permute.xlu0 %4461  ;;  %4492 = vst.msk [vmem:[#allocation5 + $0x28] sm:$0xf] %vm4481_vm4, %v4454_v44 }
 0x5ae   :  { %4496 = vst.msk [vmem:[#allocation5 + $0x38] sm:$0xf] %vm4481_vm4, %v4462_v25 }
 0x5b4   :  { %v4464_v42 = vpop.permute.xlu1 %4463 }
 0x5b5   :  { %4497 = vst.msk [vmem:[#allocation5 + $0x3c] sm:$0xf] %vm4481_vm4, %v4464_v42 }
 0x5b6   :  { %4739 = vmatmul.bf16.gmra.mxu2 %v5650_v46 }
 0x5bc   :  { %v4363_v41 = vpop.permute.xlu1 %4362 }
 0x5bd   :  { %4406 = vst.msk [vmem:[#allocation5 + $0x14] sm:$0xf] %vm4400_vm3, %v4363_v41 }
 0x5c1   :  { %v4535_v57 = vpop.permute.xlu2 %4534 }
 0x5c2   :  { %4573 = vst.msk [vmem:[#allocation5 + $0x28] sm:$0xf] %vm4562_vm5, %v4535_v57 }
 0x5c9   :  { %v4541_v30 = vpop.permute.xlu2 %4540 }
 0x5ca   :  { %4576 = vst.msk [vmem:[#allocation5 + $0x34] sm:$0xf] %vm4562_vm5, %v4541_v30 }
 0x5cc   :  { %v4720_v18 = vpop.f32.mrf.mxu0 }
 0x5cd   :  { %v4721_v23 = vadd.f32 %v7882_v12, %v4720_v18 }
 0x5cf   :  { %4760 = vst [vmem:[#allocation18] sm:$0xff] %v4721_v23 }
 0x5d1   :  { %v4442_v27 = vpop.permute.xlu2 %4441  ;;  %v5652_v33 = vld [vmem:[#allocation5 + $0x30] sm:$0xff] }
 0x5d2   :  { %4749 = vmatmul.bf16.vlgmr.msrb.gmra.mxu3 %v5652_v33 }
 0x5d4   :  { %v4722_v29 = vpop.f32.mrf.mxu0 }
 0x5d5   :  { %v4723_v49 = vadd.f32 %v7882_v12, %v4722_v29 }
 0x5d7   :  { %4761 = vst [vmem:[#allocation18 + $0x8] sm:$0xff] %v4723_v49 }
 0x5d9   :  { %v4545_v17 = vpop.permute.xlu2 %4544 }
 0x5da   :  { %4578 = vst.msk [vmem:[#allocation5 + $0x3c] sm:$0xf] %vm4562_vm5, %v4545_v17 }
 0x5e1   :  { %v4537_v15 = vpop.permute.xlu0 %4536  ;;  %v4525_v58 = vpop.permute.xlu2 %4524 }
 0x5e2   :  { %4574 = vst.msk [vmem:[#allocation5 + $0x2c] sm:$0xf] %vm4562_vm5, %v4537_v15  ;;  %v4543_v20 = vpop.permute.xlu1 %4542 }
 0x5e3   :  { %4577 = vst.msk [vmem:[#allocation5 + $0x38] sm:$0xf] %vm4562_vm5, %v4543_v20 }
 0x5e7   :  { %v4725_v9 = vpop.f32.mrf.mxu0 }
 0x5e8   :  { %v4726_v50 = vadd.f32 %v7882_v12, %v4725_v9 }
 0x5e9   :  { %v4361_v8 = vpop.permute.xlu0 %4360  ;;  %v5651_v6 = vld [vmem:[#allocation5 + $0x28] sm:$0xff] }
 0x5ea   :  { %4762 = vst [vmem:[#allocation18 + $0x10] sm:$0xff] %v4726_v50  ;;  %v4523_v36 = vpop.permute.xlu1 %4522  ;;  %4744 = vmatmul.bf16.gmra.mxu2 %v5651_v6  ;;  %v5653_v16 = vld [vmem:[#allocation5 + $0x38] sm:$0xff] }
 0x5eb   :  { %4405 = vst.msk [vmem:[#allocation5 + $0x10] sm:$0xf] %vm4400_vm3, %v4361_v8  ;;  %4754 = vmatmul.bf16.gmra.mxu3 %v5653_v16 }
 0x5ec   :  { %4486 = vst.msk [vmem:[#allocation5 + $0x10] sm:$0xf] %vm4481_vm4, %v4442_v27 }
 0x5ed   :  { %4567 = vst.msk [vmem:[#allocation5 + $0x10] sm:$0xf] %vm4562_vm5, %v4523_v36 }
 0x5ef   :  { %v4727_v7 = vpop.f32.mrf.mxu0 }
 0x5f0   :  { %v4728_v45 = vadd.f32 %v7882_v12, %v4727_v7 }
 0x5f1   :  { %v4444_v54 = vpop.permute.xlu0 %4443 }
 0x5f2   :  { %4763 = vst [vmem:[#allocation18 + $0x18] sm:$0xff] %v4728_v45 }
 0x5f3   :  { %4487 = vst.msk [vmem:[#allocation5 + $0x14] sm:$0xf] %vm4481_vm4, %v4444_v54 }
 0x5f4   :  { %4568 = vst.msk [vmem:[#allocation5 + $0x14] sm:$0xf] %vm4562_vm5, %v4525_v58 }
 0x5fb   :  { %v5648_v26 = vld [vmem:[#allocation5 + $0x10] sm:$0xff] }
 0x5fc   :  { %4729 = vmatmul.bf16.gmra.mxu0 %v5648_v26 }
 0x629   :  { %v4735_v56 = vpop.f32.mrf.mxu2 }
 0x62a   :  { %v4736_v13 = vadd.f32 %v7882_v12, %v4735_v56 }
 0x62c   :  { %4766 = vst [vmem:[#allocation18 + $0x30] sm:$0xff] %v4736_v13 }
 0x631   :  { %v4737_v22 = vpop.f32.mrf.mxu2 }
 0x632   :  { %v4738_v37 = vadd.f32 %v7882_v12, %v4737_v22 }
 0x634   :  { %4767 = vst [vmem:[#allocation18 + $0x38] sm:$0xff] %v4738_v37 }
 0x639   :  { %v4740_v19 = vpop.f32.mrf.mxu2 }
 0x63a   :  { %v4741_v34 = vadd.f32 %v7882_v12, %v4740_v19 }
 0x63c   :  { %4768 = vst [vmem:[#allocation18 + $0x40] sm:$0xff] %v4741_v34 }
 0x641   :  { %v4742_v2 = vpop.f32.mrf.mxu2 }
 0x642   :  { %v4743_v62 = vadd.f32 %v7882_v12, %v4742_v2 }
 0x644   :  { %4769 = vst [vmem:[#allocation18 + $0x48] sm:$0xff] %v4743_v62 }
 0x655   :  { %v4750_v31 = vpop.f32.mrf.mxu3 }
 0x656   :  { %v4751_v53 = vadd.f32 %v7882_v12, %v4750_v31 }
 0x658   :  { %4772 = vst [vmem:[#allocation18 + $0x60] sm:$0xff] %v4751_v53 }
 0x65d   :  { %v4752_v52 = vpop.f32.mrf.mxu3 }
 0x65e   :  { %v4753_v10 = vadd.f32 %v7882_v12, %v4752_v52 }
 0x660   :  { %4773 = vst [vmem:[#allocation18 + $0x68] sm:$0xff] %v4753_v10 }
 0x66d   :  { %v4745_v21 = vpop.f32.mrf.mxu2 }
 0x66e   :  { %v4746_v38 = vadd.f32 %v7882_v12, %v4745_v21  ;;  %v4755_v5 = vpop.f32.mrf.mxu3 }
 0x66f   :  { %v4756_v61 = vadd.f32 %v7882_v12, %v4755_v5 }
 0x670   :  { %4770 = vst [vmem:[#allocation18 + $0x50] sm:$0xff] %v4746_v38 }
 0x671   :  { %4774 = vst [vmem:[#allocation18 + $0x70] sm:$0xff] %v4756_v61 }
 0x675   :  { %v4747_v43 = vpop.f32.mrf.mxu2 }
 0x676   :  { %v4748_v47 = vadd.f32 %v7882_v12, %v4747_v43  ;;  %v4757_v1 = vpop.f32.mrf.mxu3 }
 0x677   :  { %v4758_v35 = vadd.f32 %v7882_v12, %v4757_v1 }
 0x678   :  { %4771 = vst [vmem:[#allocation18 + $0x58] sm:$0xff] %v4748_v47 }
 0x679   :  { %v4730_v48 = vpop.f32.mrf.mxu0  ;;  %4775 = vst [vmem:[#allocation18 + $0x78] sm:$0xff] %v4758_v35 }
 0x67a   :  { %v4731_v32 = vadd.f32 %v7882_v12, %v4730_v48 }
 0x67c   :  { %4764 = vst [vmem:[#allocation18 + $0x20] sm:$0xff] %v4731_v32 }
 0x681   :  { %v4732_v63 = vpop.f32.mrf.mxu0 }
 0x682   :  { %v4733_v55 = vadd.f32 %v7882_v12, %v4732_v63 }
 0x684   :  { %4765 = vst [vmem:[#allocation18 + $0x28] sm:$0xff] %v4733_v55 }
 0x685   :  { %4788 = dma.vmem_to_hbm [thread:$0]  %s4781_s14, 2048, %s4783_s7, [#allocation8], %s6166_s17, %s6166_s17, %s6167_s18  }
 0x686   :  { %6152 = dma.done.wait [#allocation8], 2048  }
 0x687   :  { %6153 = vsyncadd [#allocation8], 4294965248 }
 0x688   :  { %4793 = vsyncpa [#allocation7], 1 }
 0x689   :  { %4794 = vsyncpa [#allocation10], 1 }
 0x68a   :  { %4795 = vsyncpa [#allocation13], 1 }
 0x68b   :  { %4796 = vsyncpa [#allocation16], 1 }
 0x68c   :  { %4797 = vsyncpa [#allocation8], 1 }

</bundles_post_ra>
